<compile_context>
chip_gen: v7x
topology: tpu7x:2x2x1
jax: 0.10.0
libtpu: 0.0.40
codegen_flags: <defaults>
</compile_context>

<pallas_src>
import jax
import jax.numpy as jnp
from jax import lax
from jax.experimental import pallas as pl
from jax.experimental.pallas import tpu as pltpu


def bilstm_kernel(x_ref,        # (T*Bp, E)   bf16   (time-major, batch padded)
                  wih_ref,      # (E, 8H)     bf16   [fwd i,f,g,o | bwd i,f,g,o]
                  b_ref,        # (1, 8H)     f32    combined biases, both dirs
                  whh_f_ref,    # (H, 4H)     bf16
                  whh_b_ref,    # (H, 4H)     bf16
                  wfc_ref,      # (2H, 128)   bf16   (cols >= 2 are zero-padding)
                  bfc_ref,      # (1, 128)    f32
                  out_ref,      # (Bp, 128)   f32    lane-dense output
                  xw_ref):      # scratch (T, Bp, 8H) f32
    T, Bp, G = xw_ref.shape
    H = whh_f_ref.shape[0]

    # --- (1) Hoisted input projection: one batched MXU matmul for both
    #     directions, biases added once, off the serial critical path.
    xw = jnp.dot(x_ref[...], wih_ref[...], preferred_element_type=jnp.float32)
    xw_ref[...] = (xw + b_ref[...]).reshape(T, Bp, G)

    whh_f = whh_f_ref[...]
    whh_b = whh_b_ref[...]

    def gates_to_hc(gates, c):
        i = jax.nn.sigmoid(gates[:, 0 * H:1 * H])
        f = jax.nn.sigmoid(gates[:, 1 * H:2 * H])
        g = jnp.tanh(gates[:, 2 * H:3 * H])
        o = jax.nn.sigmoid(gates[:, 3 * H:4 * H])
        c_new = f * c + i * g
        h_new = o * jnp.tanh(c_new)
        return h_new, c_new

    # --- (2)+(3) Fused fwd/bwd recurrence, fully unrolled. Only h @ Whh is
    #     left on the serial path; state stays in vregs via the loop carry.
    def body(t, carry):
        hf, cf, hb, cb = carry
        xw_f = xw_ref[t]                 # (Bp, 8H) f32
        xw_b = xw_ref[T - 1 - t]         # (Bp, 8H) f32
        gf = xw_f[:, :4 * H] + jnp.dot(hf.astype(jnp.bfloat16), whh_f,
                                       preferred_element_type=jnp.float32)
        gb = xw_b[:, 4 * H:] + jnp.dot(hb.astype(jnp.bfloat16), whh_b,
                                       preferred_element_type=jnp.float32)
        hf, cf = gates_to_hc(gf, cf)
        hb, cb = gates_to_hc(gb, cb)
        return hf, cf, hb, cb

    zeros = jnp.zeros((Bp, H), jnp.float32)
    hf, cf, hb, cb = lax.fori_loop(0, T, body, (zeros, zeros, zeros, zeros),
                                   unroll=True)

    # fc(cat([fwd_last, bwd_first], dim=1)) without an explicit concat;
    # output is lane-dense (128 cols), real logits live in cols 0:2.
    out_ref[...] = (
        jnp.dot(hf.astype(jnp.bfloat16), wfc_ref[0:H, :],
                preferred_element_type=jnp.float32)
        + jnp.dot(hb.astype(jnp.bfloat16), wfc_ref[H:2 * H, :],
                  preferred_element_type=jnp.float32)
        + bfc_ref[...]
    )


def bilstm_sentiment_pallas(input_ids, attention_mask, params):
    """input_ids: (B, T) int32, attention_mask: (B, T) f32. Returns (B, 2) f32."""
    embed = params["embed"]                                    # (V, E)
    x = jnp.take(embed, input_ids, axis=0)                     # (B, T, E) glue
    x = x * attention_mask[..., None]
    x_tbe = jnp.transpose(x, (1, 0, 2)).astype(jnp.float32)    # (T, B, E)

    B, T = input_ids.shape
    E = embed.shape[1]
    H = params["whh_f"].shape[0]                               # (H, 4H)
    Bp = max(8, ((B + 7) // 8) * 8)                            # pad batch to sublanes
    NPAD = 128                                                 # lane-dense FC output

    x_pad = jnp.zeros((T, Bp, E), jnp.float32).at[:, :B, :].set(x_tbe)
    x_flat = x_pad.reshape(T * Bp, E).astype(jnp.bfloat16)

    # bf16 matmul operands (f32 accumulation inside the kernel).
    wih_cat = jnp.concatenate([params["wih_f"], params["wih_b"]],
                              axis=1).astype(jnp.bfloat16)      # (E, 8H)
    b_cat = jnp.concatenate([params["b_f"], params["b_b"]],
                            axis=1).astype(jnp.float32)         # (1, 8H)
    whh_f = params["whh_f"].astype(jnp.bfloat16)                # (H, 4H)
    whh_b = params["whh_b"].astype(jnp.bfloat16)                # (H, 4H)
    wfc_pad = (jnp.zeros((2 * H, NPAD), jnp.float32)
               .at[:, :2].set(params["wfc"]).astype(jnp.bfloat16))
    bfc_pad = jnp.zeros((1, NPAD), jnp.float32).at[:, :2].set(params["bfc"])

    vmem = pl.BlockSpec(memory_space=pltpu.MemorySpace.VMEM)
    out = pl.pallas_call(
        bilstm_kernel,
        out_shape=jax.ShapeDtypeStruct((Bp, NPAD), jnp.float32),
        in_specs=[vmem] * 7,
        out_specs=vmem,
        scratch_shapes=[pltpu.VMEM((T, Bp, 8 * H), jnp.float32)],
    )(x_flat, wih_cat, b_cat, whh_f, whh_b, wfc_pad, bfc_pad)
    return out[:B, :2]


def make_params(key, vocab_size, embed_dim, hidden_dim, pad_id=0):
    ks = jax.random.split(key, 12)
    s = 1.0 / jnp.sqrt(hidden_dim)

    def u(k, shape):
        return jax.random.uniform(k, shape, jnp.float32, -s, s)

    embed = jax.random.normal(ks[0], (vocab_size, embed_dim), jnp.float32) * 0.1
    embed = embed.at[pad_id].set(0.0)            # padding_idx row is zero

    # PyTorch LSTM weights: W_ih (4H, E), W_hh (4H, H); store transposed.
    wih_f = u(ks[1], (4 * hidden_dim, embed_dim)).T
    whh_f = u(ks[2], (4 * hidden_dim, hidden_dim)).T
    b_f = (u(ks[3], (4 * hidden_dim,)) + u(ks[4], (4 * hidden_dim,))).reshape(1, -1)
    wih_b = u(ks[5], (4 * hidden_dim, embed_dim)).T
    whh_b = u(ks[6], (4 * hidden_dim, hidden_dim)).T
    b_b = (u(ks[7], (4 * hidden_dim,)) + u(ks[8], (4 * hidden_dim,))).reshape(1, -1)

    wfc = u(ks[9], (2, 2 * hidden_dim)).T        # stored as (2H, 2)
    bfc = u(ks[10], (2,)).reshape(1, 2)
    return dict(embed=embed,
                wih_f=wih_f, whh_f=whh_f, b_f=b_f,
                wih_b=wih_b, whh_b=whh_b, b_b=b_b,
                wfc=wfc, bfc=bfc)


def reference_forward(input_ids, attention_mask, params):
    """Pure-JAX f32 reference mirroring the PyTorch forward (no packing)."""
    x = jnp.take(params["embed"], input_ids, axis=0) * attention_mask[..., None]
    H = params["whh_f"].shape[0]

    def run(x_seq, wih, whh, b):
        def step(carry, x_t):
            h, c = carry
            gates = x_t @ wih + h @ whh + b[0]
            i = jax.nn.sigmoid(gates[:, 0 * H:1 * H])
            f = jax.nn.sigmoid(gates[:, 1 * H:2 * H])
            g = jnp.tanh(gates[:, 2 * H:3 * H])
            o = jax.nn.sigmoid(gates[:, 3 * H:4 * H])
            c = f * c + i * g
            h = o * jnp.tanh(c)
            return (h, c), None

        B = x_seq.shape[1]
        init = (jnp.zeros((B, H)), jnp.zeros((B, H)))
        (h, _), _ = lax.scan(step, init, x_seq)
        return h

    x_tbe = jnp.transpose(x, (1, 0, 2))
    h_fwd = run(x_tbe, params["wih_f"], params["whh_f"], params["b_f"])
    h_bwd = run(x_tbe[::-1], params["wih_b"], params["whh_b"], params["b_b"])
    feat = jnp.concatenate([h_fwd, h_bwd], axis=1)
    return feat @ params["wfc"] + params["bfc"]


if __name__ == "__main__":
    B, T = 2, 8
    VOCAB, E, H = 512, 128, 128
    PAD_ID = 0

    key = jax.random.PRNGKey(0)
    k_par, k_ids = jax.random.split(key)
    params = make_params(k_par, VOCAB, E, H, pad_id=PAD_ID)

    input_ids = jax.random.randint(k_ids, (B, T), 1, VOCAB).astype(jnp.int32)
    # last two tokens of sample 1 are padding
    input_ids = input_ids.at[1, -2:].set(PAD_ID)
    attention_mask = (input_ids != PAD_ID).astype(jnp.float32)

    logits = bilstm_sentiment_pallas(input_ids, attention_mask, params)
    jax.block_until_ready(logits)

    ref = reference_forward(input_ids, attention_mask, params)
    assert logits.shape == (B, 2)
    # bf16 MXU operands with f32 accumulation vs. full-f32 reference.
    assert jnp.allclose(logits, ref, atol=2e-2, rtol=2e-2), (logits, ref)

    print("KERNEL_OK")
</pallas_src>

<mosaic_0001>
module attributes {stable_mosaic.version = 11 : i64} {
  func.func @bilstm_kernel(%arg0: memref<64x128xbf16, #tpu.memory_space<vmem>>, %arg1: memref<128x1024xbf16, #tpu.memory_space<vmem>>, %arg2: memref<1x1024xf32, #tpu.memory_space<vmem>>, %arg3: memref<128x512xbf16, #tpu.memory_space<vmem>>, %arg4: memref<128x512xbf16, #tpu.memory_space<vmem>>, %arg5: memref<256x128xbf16, #tpu.memory_space<vmem>>, %arg6: memref<1x128xf32, #tpu.memory_space<vmem>>, %arg7: memref<8x128xf32, #tpu.memory_space<vmem>>, %arg8: memref<8x8x1024xf32, #tpu.memory_space<vmem>>) attributes {dimension_semantics = [], scalar_prefetch = 0 : i64, scratch_operands = 1 : i64, tpu.core_type = #tpu.core_type<tc>} {
    %c0 = arith.constant 0 : index
    %c0_0 = arith.constant 0 : index
    %0 = vector.load %arg0[%c0, %c0_0] : memref<64x128xbf16, #tpu.memory_space<vmem>>, vector<64x128xbf16>
    %c0_1 = arith.constant 0 : index
    %c0_2 = arith.constant 0 : index
    %1 = vector.load %arg1[%c0_1, %c0_2] : memref<128x1024xbf16, #tpu.memory_space<vmem>>, vector<128x1024xbf16>
    %cst = arith.constant dense<0.000000e+00> : vector<64x1024xf32>
    %2 = tpu.matmul %0, %1, %cst {dimension_numbers = #tpu.dot_dimension_numbers<[1], [0], [0], [1], [0, 0, 1, 1], [], []>} : vector<64x128xbf16>, vector<128x1024xbf16>, vector<64x1024xf32> -> vector<64x1024xf32>
    %c0_3 = arith.constant 0 : index
    %c0_4 = arith.constant 0 : index
    %3 = vector.load %arg2[%c0_3, %c0_4] : memref<1x1024xf32, #tpu.memory_space<vmem>>, vector<1x1024xf32>
    %4 = vector.broadcast %3 : vector<1x1024xf32> to vector<64x1024xf32>
    %5 = arith.addf %2, %4 : vector<64x1024xf32>
    %6 = vector.shape_cast %5 : vector<64x1024xf32> to vector<8x8x1024xf32>
    %c0_5 = arith.constant 0 : index
    %c0_6 = arith.constant 0 : index
    %c0_7 = arith.constant 0 : index
    %7 = vector.load %arg8[%c0_5, %c0_6, %c0_7] : memref<8x8x1024xf32, #tpu.memory_space<vmem>>, vector<8x8x1024xf32>
    tpu.vector_store %arg8[%c0_5, %c0_6, %c0_7], %6 {strides = array<i32>} : memref<8x8x1024xf32, #tpu.memory_space<vmem>>, vector<8x8x1024xf32>,
    %c0_8 = arith.constant 0 : index
    %c0_9 = arith.constant 0 : index
    %8 = vector.load %arg3[%c0_8, %c0_9] : memref<128x512xbf16, #tpu.memory_space<vmem>>, vector<128x512xbf16>
    %c0_10 = arith.constant 0 : index
    %c0_11 = arith.constant 0 : index
    %9 = vector.load %arg4[%c0_10, %c0_11] : memref<128x512xbf16, #tpu.memory_space<vmem>>, vector<128x512xbf16>
    %cst_12 = arith.constant 0.000000e+00 : f32
    %10 = vector.broadcast %cst_12 : f32 to vector<8x128xf32>
    %c0_i32 = arith.constant 0 : i32
    %11 = arith.index_cast %c0_i32 : i32 to index
    %c0_13 = arith.constant 0 : index
    %c0_14 = arith.constant 0 : index
    %12 = vector.load %arg8[%11, %c0_13, %c0_14] : memref<8x8x1024xf32, #tpu.memory_space<vmem>>, vector<1x8x1024xf32>
    %13 = vector.shape_cast %12 : vector<1x8x1024xf32> to vector<8x1024xf32>
    %c7_i32 = arith.constant 7 : i32
    %14 = arith.subi %c7_i32, %c0_i32 : i32
    %15 = arith.index_cast %14 : i32 to index
    %c0_15 = arith.constant 0 : index
    %c0_16 = arith.constant 0 : index
    %16 = vector.load %arg8[%15, %c0_15, %c0_16] : memref<8x8x1024xf32, #tpu.memory_space<vmem>>, vector<1x8x1024xf32>
    %17 = vector.shape_cast %16 : vector<1x8x1024xf32> to vector<8x1024xf32>
    %18 = vector.extract_strided_slice %13 {offsets = [0, 0], sizes = [8, 512], strides = [1, 1]} : vector<8x1024xf32> to vector<8x512xf32>
    %19 = arith.truncf %10 : vector<8x128xf32> to vector<8x128xbf16>
    %cst_17 = arith.constant dense<0.000000e+00> : vector<8x512xf32>
    %20 = tpu.matmul %19, %8, %cst_17 {dimension_numbers = #tpu.dot_dimension_numbers<[1], [0], [0], [1], [0, 0, 1, 1], [], []>} : vector<8x128xbf16>, vector<128x512xbf16>, vector<8x512xf32> -> vector<8x512xf32>
    %21 = arith.addf %18, %20 : vector<8x512xf32>
    %22 = vector.extract_strided_slice %17 {offsets = [0, 512], sizes = [8, 512], strides = [1, 1]} : vector<8x1024xf32> to vector<8x512xf32>
    %23 = arith.truncf %10 : vector<8x128xf32> to vector<8x128xbf16>
    %cst_18 = arith.constant dense<0.000000e+00> : vector<8x512xf32>
    %24 = tpu.matmul %23, %9, %cst_18 {dimension_numbers = #tpu.dot_dimension_numbers<[1], [0], [0], [1], [0, 0, 1, 1], [], []>} : vector<8x128xbf16>, vector<128x512xbf16>, vector<8x512xf32> -> vector<8x512xf32>
    %25 = arith.addf %22, %24 : vector<8x512xf32>
    %26 = vector.extract_strided_slice %21 {offsets = [0, 0], sizes = [8, 128], strides = [1, 1]} : vector<8x512xf32> to vector<8x128xf32>
    %27 = arith.negf %26 : vector<8x128xf32>
    %28 = math.exp %27 : vector<8x128xf32>
    %cst_19 = arith.constant 1.000000e+00 : f32
    %29 = vector.broadcast %cst_19 : f32 to vector<8x128xf32>
    %30 = arith.addf %29, %28 : vector<8x128xf32>
    %31 = arith.divf %29, %30 : vector<8x128xf32>
    %32 = vector.extract_strided_slice %21 {offsets = [0, 128], sizes = [8, 128], strides = [1, 1]} : vector<8x512xf32> to vector<8x128xf32>
    %33 = arith.negf %32 : vector<8x128xf32>
    %34 = math.exp %33 : vector<8x128xf32>
    %cst_20 = arith.constant 1.000000e+00 : f32
    %35 = vector.broadcast %cst_20 : f32 to vector<8x128xf32>
    %36 = arith.addf %35, %34 : vector<8x128xf32>
    %37 = arith.divf %35, %36 : vector<8x128xf32>
    %38 = vector.extract_strided_slice %21 {offsets = [0, 256], sizes = [8, 128], strides = [1, 1]} : vector<8x512xf32> to vector<8x128xf32>
    %39 = math.tanh %38 : vector<8x128xf32>
    %40 = vector.extract_strided_slice %21 {offsets = [0, 384], sizes = [8, 128], strides = [1, 1]} : vector<8x512xf32> to vector<8x128xf32>
    %41 = arith.negf %40 : vector<8x128xf32>
    %42 = math.exp %41 : vector<8x128xf32>
    %cst_21 = arith.constant 1.000000e+00 : f32
    %43 = vector.broadcast %cst_21 : f32 to vector<8x128xf32>
    %44 = arith.addf %43, %42 : vector<8x128xf32>
    %45 = arith.divf %43, %44 : vector<8x128xf32>
    %46 = arith.mulf %37, %10 : vector<8x128xf32>
    %47 = arith.mulf %31, %39 : vector<8x128xf32>
    %48 = arith.addf %46, %47 : vector<8x128xf32>
    %49 = math.tanh %48 : vector<8x128xf32>
    %50 = arith.mulf %45, %49 : vector<8x128xf32>
    %51 = vector.extract_strided_slice %25 {offsets = [0, 0], sizes = [8, 128], strides = [1, 1]} : vector<8x512xf32> to vector<8x128xf32>
    %52 = arith.negf %51 : vector<8x128xf32>
    %53 = math.exp %52 : vector<8x128xf32>
    %cst_22 = arith.constant 1.000000e+00 : f32
    %54 = vector.broadcast %cst_22 : f32 to vector<8x128xf32>
    %55 = arith.addf %54, %53 : vector<8x128xf32>
    %56 = arith.divf %54, %55 : vector<8x128xf32>
    %57 = vector.extract_strided_slice %25 {offsets = [0, 128], sizes = [8, 128], strides = [1, 1]} : vector<8x512xf32> to vector<8x128xf32>
    %58 = arith.negf %57 : vector<8x128xf32>
    %59 = math.exp %58 : vector<8x128xf32>
    %cst_23 = arith.constant 1.000000e+00 : f32
    %60 = vector.broadcast %cst_23 : f32 to vector<8x128xf32>
    %61 = arith.addf %60, %59 : vector<8x128xf32>
    %62 = arith.divf %60, %61 : vector<8x128xf32>
    %63 = vector.extract_strided_slice %25 {offsets = [0, 256], sizes = [8, 128], strides = [1, 1]} : vector<8x512xf32> to vector<8x128xf32>
    %64 = math.tanh %63 : vector<8x128xf32>
    %65 = vector.extract_strided_slice %25 {offsets = [0, 384], sizes = [8, 128], strides = [1, 1]} : vector<8x512xf32> to vector<8x128xf32>
    %66 = arith.negf %65 : vector<8x128xf32>
    %67 = math.exp %66 : vector<8x128xf32>
    %cst_24 = arith.constant 1.000000e+00 : f32
    %68 = vector.broadcast %cst_24 : f32 to vector<8x128xf32>
    %69 = arith.addf %68, %67 : vector<8x128xf32>
    %70 = arith.divf %68, %69 : vector<8x128xf32>
    %71 = arith.mulf %62, %10 : vector<8x128xf32>
    %72 = arith.mulf %56, %64 : vector<8x128xf32>
    %73 = arith.addf %71, %72 : vector<8x128xf32>
    %74 = math.tanh %73 : vector<8x128xf32>
    %75 = arith.mulf %70, %74 : vector<8x128xf32>
    %c1_i32 = arith.constant 1 : i32
    %76 = arith.index_cast %c1_i32 : i32 to index
    %c0_25 = arith.constant 0 : index
    %c0_26 = arith.constant 0 : index
    %77 = vector.load %arg8[%76, %c0_25, %c0_26] : memref<8x8x1024xf32, #tpu.memory_space<vmem>>, vector<1x8x1024xf32>
    %78 = vector.shape_cast %77 : vector<1x8x1024xf32> to vector<8x1024xf32>
    %c7_i32_27 = arith.constant 7 : i32
    %79 = arith.subi %c7_i32_27, %c1_i32 : i32
    %80 = arith.index_cast %79 : i32 to index
    %c0_28 = arith.constant 0 : index
    %c0_29 = arith.constant 0 : index
    %81 = vector.load %arg8[%80, %c0_28, %c0_29] : memref<8x8x1024xf32, #tpu.memory_space<vmem>>, vector<1x8x1024xf32>
    %82 = vector.shape_cast %81 : vector<1x8x1024xf32> to vector<8x1024xf32>
    %83 = vector.extract_strided_slice %78 {offsets = [0, 0], sizes = [8, 512], strides = [1, 1]} : vector<8x1024xf32> to vector<8x512xf32>
    %84 = arith.truncf %50 : vector<8x128xf32> to vector<8x128xbf16>
    %cst_30 = arith.constant dense<0.000000e+00> : vector<8x512xf32>
    %85 = tpu.matmul %84, %8, %cst_30 {dimension_numbers = #tpu.dot_dimension_numbers<[1], [0], [0], [1], [0, 0, 1, 1], [], []>} : vector<8x128xbf16>, vector<128x512xbf16>, vector<8x512xf32> -> vector<8x512xf32>
    %86 = arith.addf %83, %85 : vector<8x512xf32>
    %87 = vector.extract_strided_slice %82 {offsets = [0, 512], sizes = [8, 512], strides = [1, 1]} : vector<8x1024xf32> to vector<8x512xf32>
    %88 = arith.truncf %75 : vector<8x128xf32> to vector<8x128xbf16>
    %cst_31 = arith.constant dense<0.000000e+00> : vector<8x512xf32>
    %89 = tpu.matmul %88, %9, %cst_31 {dimension_numbers = #tpu.dot_dimension_numbers<[1], [0], [0], [1], [0, 0, 1, 1], [], []>} : vector<8x128xbf16>, vector<128x512xbf16>, vector<8x512xf32> -> vector<8x512xf32>
    %90 = arith.addf %87, %89 : vector<8x512xf32>
    %91 = vector.extract_strided_slice %86 {offsets = [0, 0], sizes = [8, 128], strides = [1, 1]} : vector<8x512xf32> to vector<8x128xf32>
    %92 = arith.negf %91 : vector<8x128xf32>
    %93 = math.exp %92 : vector<8x128xf32>
    %cst_32 = arith.constant 1.000000e+00 : f32
    %94 = vector.broadcast %cst_32 : f32 to vector<8x128xf32>
    %95 = arith.addf %94, %93 : vector<8x128xf32>
    %96 = arith.divf %94, %95 : vector<8x128xf32>
    %97 = vector.extract_strided_slice %86 {offsets = [0, 128], sizes = [8, 128], strides = [1, 1]} : vector<8x512xf32> to vector<8x128xf32>
    %98 = arith.negf %97 : vector<8x128xf32>
    %99 = math.exp %98 : vector<8x128xf32>
    %cst_33 = arith.constant 1.000000e+00 : f32
    %100 = vector.broadcast %cst_33 : f32 to vector<8x128xf32>
    %101 = arith.addf %100, %99 : vector<8x128xf32>
    %102 = arith.divf %100, %101 : vector<8x128xf32>
    %103 = vector.extract_strided_slice %86 {offsets = [0, 256], sizes = [8, 128], strides = [1, 1]} : vector<8x512xf32> to vector<8x128xf32>
    %104 = math.tanh %103 : vector<8x128xf32>
    %105 = vector.extract_strided_slice %86 {offsets = [0, 384], sizes = [8, 128], strides = [1, 1]} : vector<8x512xf32> to vector<8x128xf32>
    %106 = arith.negf %105 : vector<8x128xf32>
    %107 = math.exp %106 : vector<8x128xf32>
    %cst_34 = arith.constant 1.000000e+00 : f32
    %108 = vector.broadcast %cst_34 : f32 to vector<8x128xf32>
    %109 = arith.addf %108, %107 : vector<8x128xf32>
    %110 = arith.divf %108, %109 : vector<8x128xf32>
    %111 = arith.mulf %102, %48 : vector<8x128xf32>
    %112 = arith.mulf %96, %104 : vector<8x128xf32>
    %113 = arith.addf %111, %112 : vector<8x128xf32>
    %114 = math.tanh %113 : vector<8x128xf32>
    %115 = arith.mulf %110, %114 : vector<8x128xf32>
    %116 = vector.extract_strided_slice %90 {offsets = [0, 0], sizes = [8, 128], strides = [1, 1]} : vector<8x512xf32> to vector<8x128xf32>
    %117 = arith.negf %116 : vector<8x128xf32>
    %118 = math.exp %117 : vector<8x128xf32>
    %cst_35 = arith.constant 1.000000e+00 : f32
    %119 = vector.broadcast %cst_35 : f32 to vector<8x128xf32>
    %120 = arith.addf %119, %118 : vector<8x128xf32>
    %121 = arith.divf %119, %120 : vector<8x128xf32>
    %122 = vector.extract_strided_slice %90 {offsets = [0, 128], sizes = [8, 128], strides = [1, 1]} : vector<8x512xf32> to vector<8x128xf32>
    %123 = arith.negf %122 : vector<8x128xf32>
    %124 = math.exp %123 : vector<8x128xf32>
    %cst_36 = arith.constant 1.000000e+00 : f32
    %125 = vector.broadcast %cst_36 : f32 to vector<8x128xf32>
    %126 = arith.addf %125, %124 : vector<8x128xf32>
    %127 = arith.divf %125, %126 : vector<8x128xf32>
    %128 = vector.extract_strided_slice %90 {offsets = [0, 256], sizes = [8, 128], strides = [1, 1]} : vector<8x512xf32> to vector<8x128xf32>
    %129 = math.tanh %128 : vector<8x128xf32>
    %130 = vector.extract_strided_slice %90 {offsets = [0, 384], sizes = [8, 128], strides = [1, 1]} : vector<8x512xf32> to vector<8x128xf32>
    %131 = arith.negf %130 : vector<8x128xf32>
    %132 = math.exp %131 : vector<8x128xf32>
    %cst_37 = arith.constant 1.000000e+00 : f32
    %133 = vector.broadcast %cst_37 : f32 to vector<8x128xf32>
    %134 = arith.addf %133, %132 : vector<8x128xf32>
    %135 = arith.divf %133, %134 : vector<8x128xf32>
    %136 = arith.mulf %127, %73 : vector<8x128xf32>
    %137 = arith.mulf %121, %129 : vector<8x128xf32>
    %138 = arith.addf %136, %137 : vector<8x128xf32>
    %139 = math.tanh %138 : vector<8x128xf32>
    %140 = arith.mulf %135, %139 : vector<8x128xf32>
    %c2_i32 = arith.constant 2 : i32
    %141 = arith.index_cast %c2_i32 : i32 to index
    %c0_38 = arith.constant 0 : index
    %c0_39 = arith.constant 0 : index
    %142 = vector.load %arg8[%141, %c0_38, %c0_39] : memref<8x8x1024xf32, #tpu.memory_space<vmem>>, vector<1x8x1024xf32>
    %143 = vector.shape_cast %142 : vector<1x8x1024xf32> to vector<8x1024xf32>
    %c7_i32_40 = arith.constant 7 : i32
    %144 = arith.subi %c7_i32_40, %c2_i32 : i32
    %145 = arith.index_cast %144 : i32 to index
    %c0_41 = arith.constant 0 : index
    %c0_42 = arith.constant 0 : index
    %146 = vector.load %arg8[%145, %c0_41, %c0_42] : memref<8x8x1024xf32, #tpu.memory_space<vmem>>, vector<1x8x1024xf32>
    %147 = vector.shape_cast %146 : vector<1x8x1024xf32> to vector<8x1024xf32>
    %148 = vector.extract_strided_slice %143 {offsets = [0, 0], sizes = [8, 512], strides = [1, 1]} : vector<8x1024xf32> to vector<8x512xf32>
    %149 = arith.truncf %115 : vector<8x128xf32> to vector<8x128xbf16>
    %cst_43 = arith.constant dense<0.000000e+00> : vector<8x512xf32>
    %150 = tpu.matmul %149, %8, %cst_43 {dimension_numbers = #tpu.dot_dimension_numbers<[1], [0], [0], [1], [0, 0, 1, 1], [], []>} : vector<8x128xbf16>, vector<128x512xbf16>, vector<8x512xf32> -> vector<8x512xf32>
    %151 = arith.addf %148, %150 : vector<8x512xf32>
    %152 = vector.extract_strided_slice %147 {offsets = [0, 512], sizes = [8, 512], strides = [1, 1]} : vector<8x1024xf32> to vector<8x512xf32>
    %153 = arith.truncf %140 : vector<8x128xf32> to vector<8x128xbf16>
    %cst_44 = arith.constant dense<0.000000e+00> : vector<8x512xf32>
    %154 = tpu.matmul %153, %9, %cst_44 {dimension_numbers = #tpu.dot_dimension_numbers<[1], [0], [0], [1], [0, 0, 1, 1], [], []>} : vector<8x128xbf16>, vector<128x512xbf16>, vector<8x512xf32> -> vector<8x512xf32>
    %155 = arith.addf %152, %154 : vector<8x512xf32>
    %156 = vector.extract_strided_slice %151 {offsets = [0, 0], sizes = [8, 128], strides = [1, 1]} : vector<8x512xf32> to vector<8x128xf32>
    %157 = arith.negf %156 : vector<8x128xf32>
    %158 = math.exp %157 : vector<8x128xf32>
    %cst_45 = arith.constant 1.000000e+00 : f32
    %159 = vector.broadcast %cst_45 : f32 to vector<8x128xf32>
    %160 = arith.addf %159, %158 : vector<8x128xf32>
    %161 = arith.divf %159, %160 : vector<8x128xf32>
    %162 = vector.extract_strided_slice %151 {offsets = [0, 128], sizes = [8, 128], strides = [1, 1]} : vector<8x512xf32> to vector<8x128xf32>
    %163 = arith.negf %162 : vector<8x128xf32>
    %164 = math.exp %163 : vector<8x128xf32>
    %cst_46 = arith.constant 1.000000e+00 : f32
    %165 = vector.broadcast %cst_46 : f32 to vector<8x128xf32>
    %166 = arith.addf %165, %164 : vector<8x128xf32>
    %167 = arith.divf %165, %166 : vector<8x128xf32>
    %168 = vector.extract_strided_slice %151 {offsets = [0, 256], sizes = [8, 128], strides = [1, 1]} : vector<8x512xf32> to vector<8x128xf32>
    %169 = math.tanh %168 : vector<8x128xf32>
    %170 = vector.extract_strided_slice %151 {offsets = [0, 384], sizes = [8, 128], strides = [1, 1]} : vector<8x512xf32> to vector<8x128xf32>
    %171 = arith.negf %170 : vector<8x128xf32>
    %172 = math.exp %171 : vector<8x128xf32>
    %cst_47 = arith.constant 1.000000e+00 : f32
    %173 = vector.broadcast %cst_47 : f32 to vector<8x128xf32>
    %174 = arith.addf %173, %172 : vector<8x128xf32>
    %175 = arith.divf %173, %174 : vector<8x128xf32>
    %176 = arith.mulf %167, %113 : vector<8x128xf32>
    %177 = arith.mulf %161, %169 : vector<8x128xf32>
    %178 = arith.addf %176, %177 : vector<8x128xf32>
    %179 = math.tanh %178 : vector<8x128xf32>
    %180 = arith.mulf %175, %179 : vector<8x128xf32>
    %181 = vector.extract_strided_slice %155 {offsets = [0, 0], sizes = [8, 128], strides = [1, 1]} : vector<8x512xf32> to vector<8x128xf32>
    %182 = arith.negf %181 : vector<8x128xf32>
    %183 = math.exp %182 : vector<8x128xf32>
    %cst_48 = arith.constant 1.000000e+00 : f32
    %184 = vector.broadcast %cst_48 : f32 to vector<8x128xf32>
    %185 = arith.addf %184, %183 : vector<8x128xf32>
    %186 = arith.divf %184, %185 : vector<8x128xf32>
    %187 = vector.extract_strided_slice %155 {offsets = [0, 128], sizes = [8, 128], strides = [1, 1]} : vector<8x512xf32> to vector<8x128xf32>
    %188 = arith.negf %187 : vector<8x128xf32>
    %189 = math.exp %188 : vector<8x128xf32>
    %cst_49 = arith.constant 1.000000e+00 : f32
    %190 = vector.broadcast %cst_49 : f32 to vector<8x128xf32>
    %191 = arith.addf %190, %189 : vector<8x128xf32>
    %192 = arith.divf %190, %191 : vector<8x128xf32>
    %193 = vector.extract_strided_slice %155 {offsets = [0, 256], sizes = [8, 128], strides = [1, 1]} : vector<8x512xf32> to vector<8x128xf32>
    %194 = math.tanh %193 : vector<8x128xf32>
    %195 = vector.extract_strided_slice %155 {offsets = [0, 384], sizes = [8, 128], strides = [1, 1]} : vector<8x512xf32> to vector<8x128xf32>
    %196 = arith.negf %195 : vector<8x128xf32>
    %197 = math.exp %196 : vector<8x128xf32>
    %cst_50 = arith.constant 1.000000e+00 : f32
    %198 = vector.broadcast %cst_50 : f32 to vector<8x128xf32>
    %199 = arith.addf %198, %197 : vector<8x128xf32>
    %200 = arith.divf %198, %199 : vector<8x128xf32>
    %201 = arith.mulf %192, %138 : vector<8x128xf32>
    %202 = arith.mulf %186, %194 : vector<8x128xf32>
    %203 = arith.addf %201, %202 : vector<8x128xf32>
    %204 = math.tanh %203 : vector<8x128xf32>
    %205 = arith.mulf %200, %204 : vector<8x128xf32>
    %c3_i32 = arith.constant 3 : i32
    %206 = arith.index_cast %c3_i32 : i32 to index
    %c0_51 = arith.constant 0 : index
    %c0_52 = arith.constant 0 : index
    %207 = vector.load %arg8[%206, %c0_51, %c0_52] : memref<8x8x1024xf32, #tpu.memory_space<vmem>>, vector<1x8x1024xf32>
    %208 = vector.shape_cast %207 : vector<1x8x1024xf32> to vector<8x1024xf32>
    %c7_i32_53 = arith.constant 7 : i32
    %209 = arith.subi %c7_i32_53, %c3_i32 : i32
    %210 = arith.index_cast %209 : i32 to index
    %c0_54 = arith.constant 0 : index
    %c0_55 = arith.constant 0 : index
    %211 = vector.load %arg8[%210, %c0_54, %c0_55] : memref<8x8x1024xf32, #tpu.memory_space<vmem>>, vector<1x8x1024xf32>
    %212 = vector.shape_cast %211 : vector<1x8x1024xf32> to vector<8x1024xf32>
    %213 = vector.extract_strided_slice %208 {offsets = [0, 0], sizes = [8, 512], strides = [1, 1]} : vector<8x1024xf32> to vector<8x512xf32>
    %214 = arith.truncf %180 : vector<8x128xf32> to vector<8x128xbf16>
    %cst_56 = arith.constant dense<0.000000e+00> : vector<8x512xf32>
    %215 = tpu.matmul %214, %8, %cst_56 {dimension_numbers = #tpu.dot_dimension_numbers<[1], [0], [0], [1], [0, 0, 1, 1], [], []>} : vector<8x128xbf16>, vector<128x512xbf16>, vector<8x512xf32> -> vector<8x512xf32>
    %216 = arith.addf %213, %215 : vector<8x512xf32>
    %217 = vector.extract_strided_slice %212 {offsets = [0, 512], sizes = [8, 512], strides = [1, 1]} : vector<8x1024xf32> to vector<8x512xf32>
    %218 = arith.truncf %205 : vector<8x128xf32> to vector<8x128xbf16>
    %cst_57 = arith.constant dense<0.000000e+00> : vector<8x512xf32>
    %219 = tpu.matmul %218, %9, %cst_57 {dimension_numbers = #tpu.dot_dimension_numbers<[1], [0], [0], [1], [0, 0, 1, 1], [], []>} : vector<8x128xbf16>, vector<128x512xbf16>, vector<8x512xf32> -> vector<8x512xf32>
    %220 = arith.addf %217, %219 : vector<8x512xf32>
    %221 = vector.extract_strided_slice %216 {offsets = [0, 0], sizes = [8, 128], strides = [1, 1]} : vector<8x512xf32> to vector<8x128xf32>
    %222 = arith.negf %221 : vector<8x128xf32>
    %223 = math.exp %222 : vector<8x128xf32>
    %cst_58 = arith.constant 1.000000e+00 : f32
    %224 = vector.broadcast %cst_58 : f32 to vector<8x128xf32>
    %225 = arith.addf %224, %223 : vector<8x128xf32>
    %226 = arith.divf %224, %225 : vector<8x128xf32>
    %227 = vector.extract_strided_slice %216 {offsets = [0, 128], sizes = [8, 128], strides = [1, 1]} : vector<8x512xf32> to vector<8x128xf32>
    %228 = arith.negf %227 : vector<8x128xf32>
    %229 = math.exp %228 : vector<8x128xf32>
    %cst_59 = arith.constant 1.000000e+00 : f32
    %230 = vector.broadcast %cst_59 : f32 to vector<8x128xf32>
    %231 = arith.addf %230, %229 : vector<8x128xf32>
    %232 = arith.divf %230, %231 : vector<8x128xf32>
    %233 = vector.extract_strided_slice %216 {offsets = [0, 256], sizes = [8, 128], strides = [1, 1]} : vector<8x512xf32> to vector<8x128xf32>
    %234 = math.tanh %233 : vector<8x128xf32>
    %235 = vector.extract_strided_slice %216 {offsets = [0, 384], sizes = [8, 128], strides = [1, 1]} : vector<8x512xf32> to vector<8x128xf32>
    %236 = arith.negf %235 : vector<8x128xf32>
    %237 = math.exp %236 : vector<8x128xf32>
    %cst_60 = arith.constant 1.000000e+00 : f32
    %238 = vector.broadcast %cst_60 : f32 to vector<8x128xf32>
    %239 = arith.addf %238, %237 : vector<8x128xf32>
    %240 = arith.divf %238, %239 : vector<8x128xf32>
    %241 = arith.mulf %232, %178 : vector<8x128xf32>
    %242 = arith.mulf %226, %234 : vector<8x128xf32>
    %243 = arith.addf %241, %242 : vector<8x128xf32>
    %244 = math.tanh %243 : vector<8x128xf32>
    %245 = arith.mulf %240, %244 : vector<8x128xf32>
    %246 = vector.extract_strided_slice %220 {offsets = [0, 0], sizes = [8, 128], strides = [1, 1]} : vector<8x512xf32> to vector<8x128xf32>
    %247 = arith.negf %246 : vector<8x128xf32>
    %248 = math.exp %247 : vector<8x128xf32>
    %cst_61 = arith.constant 1.000000e+00 : f32
    %249 = vector.broadcast %cst_61 : f32 to vector<8x128xf32>
    %250 = arith.addf %249, %248 : vector<8x128xf32>
    %251 = arith.divf %249, %250 : vector<8x128xf32>
    %252 = vector.extract_strided_slice %220 {offsets = [0, 128], sizes = [8, 128], strides = [1, 1]} : vector<8x512xf32> to vector<8x128xf32>
    %253 = arith.negf %252 : vector<8x128xf32>
    %254 = math.exp %253 : vector<8x128xf32>
    %cst_62 = arith.constant 1.000000e+00 : f32
    %255 = vector.broadcast %cst_62 : f32 to vector<8x128xf32>
    %256 = arith.addf %255, %254 : vector<8x128xf32>
    %257 = arith.divf %255, %256 : vector<8x128xf32>
    %258 = vector.extract_strided_slice %220 {offsets = [0, 256], sizes = [8, 128], strides = [1, 1]} : vector<8x512xf32> to vector<8x128xf32>
    %259 = math.tanh %258 : vector<8x128xf32>
    %260 = vector.extract_strided_slice %220 {offsets = [0, 384], sizes = [8, 128], strides = [1, 1]} : vector<8x512xf32> to vector<8x128xf32>
    %261 = arith.negf %260 : vector<8x128xf32>
    %262 = math.exp %261 : vector<8x128xf32>
    %cst_63 = arith.constant 1.000000e+00 : f32
    %263 = vector.broadcast %cst_63 : f32 to vector<8x128xf32>
    %264 = arith.addf %263, %262 : vector<8x128xf32>
    %265 = arith.divf %263, %264 : vector<8x128xf32>
    %266 = arith.mulf %257, %203 : vector<8x128xf32>
    %267 = arith.mulf %251, %259 : vector<8x128xf32>
    %268 = arith.addf %266, %267 : vector<8x128xf32>
    %269 = math.tanh %268 : vector<8x128xf32>
    %270 = arith.mulf %265, %269 : vector<8x128xf32>
    %c4_i32 = arith.constant 4 : i32
    %271 = arith.index_cast %c4_i32 : i32 to index
    %c0_64 = arith.constant 0 : index
    %c0_65 = arith.constant 0 : index
    %272 = vector.load %arg8[%271, %c0_64, %c0_65] : memref<8x8x1024xf32, #tpu.memory_space<vmem>>, vector<1x8x1024xf32>
    %273 = vector.shape_cast %272 : vector<1x8x1024xf32> to vector<8x1024xf32>
    %c7_i32_66 = arith.constant 7 : i32
    %274 = arith.subi %c7_i32_66, %c4_i32 : i32
    %275 = arith.index_cast %274 : i32 to index
    %c0_67 = arith.constant 0 : index
    %c0_68 = arith.constant 0 : index
    %276 = vector.load %arg8[%275, %c0_67, %c0_68] : memref<8x8x1024xf32, #tpu.memory_space<vmem>>, vector<1x8x1024xf32>
    %277 = vector.shape_cast %276 : vector<1x8x1024xf32> to vector<8x1024xf32>
    %278 = vector.extract_strided_slice %273 {offsets = [0, 0], sizes = [8, 512], strides = [1, 1]} : vector<8x1024xf32> to vector<8x512xf32>
    %279 = arith.truncf %245 : vector<8x128xf32> to vector<8x128xbf16>
    %cst_69 = arith.constant dense<0.000000e+00> : vector<8x512xf32>
    %280 = tpu.matmul %279, %8, %cst_69 {dimension_numbers = #tpu.dot_dimension_numbers<[1], [0], [0], [1], [0, 0, 1, 1], [], []>} : vector<8x128xbf16>, vector<128x512xbf16>, vector<8x512xf32> -> vector<8x512xf32>
    %281 = arith.addf %278, %280 : vector<8x512xf32>
    %282 = vector.extract_strided_slice %277 {offsets = [0, 512], sizes = [8, 512], strides = [1, 1]} : vector<8x1024xf32> to vector<8x512xf32>
    %283 = arith.truncf %270 : vector<8x128xf32> to vector<8x128xbf16>
    %cst_70 = arith.constant dense<0.000000e+00> : vector<8x512xf32>
    %284 = tpu.matmul %283, %9, %cst_70 {dimension_numbers = #tpu.dot_dimension_numbers<[1], [0], [0], [1], [0, 0, 1, 1], [], []>} : vector<8x128xbf16>, vector<128x512xbf16>, vector<8x512xf32> -> vector<8x512xf32>
    %285 = arith.addf %282, %284 : vector<8x512xf32>
    %286 = vector.extract_strided_slice %281 {offsets = [0, 0], sizes = [8, 128], strides = [1, 1]} : vector<8x512xf32> to vector<8x128xf32>
    %287 = arith.negf %286 : vector<8x128xf32>
    %288 = math.exp %287 : vector<8x128xf32>
    %cst_71 = arith.constant 1.000000e+00 : f32
    %289 = vector.broadcast %cst_71 : f32 to vector<8x128xf32>
    %290 = arith.addf %289, %288 : vector<8x128xf32>
    %291 = arith.divf %289, %290 : vector<8x128xf32>
    %292 = vector.extract_strided_slice %281 {offsets = [0, 128], sizes = [8, 128], strides = [1, 1]} : vector<8x512xf32> to vector<8x128xf32>
    %293 = arith.negf %292 : vector<8x128xf32>
    %294 = math.exp %293 : vector<8x128xf32>
    %cst_72 = arith.constant 1.000000e+00 : f32
    %295 = vector.broadcast %cst_72 : f32 to vector<8x128xf32>
    %296 = arith.addf %295, %294 : vector<8x128xf32>
    %297 = arith.divf %295, %296 : vector<8x128xf32>
    %298 = vector.extract_strided_slice %281 {offsets = [0, 256], sizes = [8, 128], strides = [1, 1]} : vector<8x512xf32> to vector<8x128xf32>
    %299 = math.tanh %298 : vector<8x128xf32>
    %300 = vector.extract_strided_slice %281 {offsets = [0, 384], sizes = [8, 128], strides = [1, 1]} : vector<8x512xf32> to vector<8x128xf32>
    %301 = arith.negf %300 : vector<8x128xf32>
    %302 = math.exp %301 : vector<8x128xf32>
    %cst_73 = arith.constant 1.000000e+00 : f32
    %303 = vector.broadcast %cst_73 : f32 to vector<8x128xf32>
    %304 = arith.addf %303, %302 : vector<8x128xf32>
    %305 = arith.divf %303, %304 : vector<8x128xf32>
    %306 = arith.mulf %297, %243 : vector<8x128xf32>
    %307 = arith.mulf %291, %299 : vector<8x128xf32>
    %308 = arith.addf %306, %307 : vector<8x128xf32>
    %309 = math.tanh %308 : vector<8x128xf32>
    %310 = arith.mulf %305, %309 : vector<8x128xf32>
    %311 = vector.extract_strided_slice %285 {offsets = [0, 0], sizes = [8, 128], strides = [1, 1]} : vector<8x512xf32> to vector<8x128xf32>
    %312 = arith.negf %311 : vector<8x128xf32>
    %313 = math.exp %312 : vector<8x128xf32>
    %cst_74 = arith.constant 1.000000e+00 : f32
    %314 = vector.broadcast %cst_74 : f32 to vector<8x128xf32>
    %315 = arith.addf %314, %313 : vector<8x128xf32>
    %316 = arith.divf %314, %315 : vector<8x128xf32>
    %317 = vector.extract_strided_slice %285 {offsets = [0, 128], sizes = [8, 128], strides = [1, 1]} : vector<8x512xf32> to vector<8x128xf32>
    %318 = arith.negf %317 : vector<8x128xf32>
    %319 = math.exp %318 : vector<8x128xf32>
    %cst_75 = arith.constant 1.000000e+00 : f32
    %320 = vector.broadcast %cst_75 : f32 to vector<8x128xf32>
    %321 = arith.addf %320, %319 : vector<8x128xf32>
    %322 = arith.divf %320, %321 : vector<8x128xf32>
    %323 = vector.extract_strided_slice %285 {offsets = [0, 256], sizes = [8, 128], strides = [1, 1]} : vector<8x512xf32> to vector<8x128xf32>
    %324 = math.tanh %323 : vector<8x128xf32>
    %325 = vector.extract_strided_slice %285 {offsets = [0, 384], sizes = [8, 128], strides = [1, 1]} : vector<8x512xf32> to vector<8x128xf32>
    %326 = arith.negf %325 : vector<8x128xf32>
    %327 = math.exp %326 : vector<8x128xf32>
    %cst_76 = arith.constant 1.000000e+00 : f32
    %328 = vector.broadcast %cst_76 : f32 to vector<8x128xf32>
    %329 = arith.addf %328, %327 : vector<8x128xf32>
    %330 = arith.divf %328, %329 : vector<8x128xf32>
    %331 = arith.mulf %322, %268 : vector<8x128xf32>
    %332 = arith.mulf %316, %324 : vector<8x128xf32>
    %333 = arith.addf %331, %332 : vector<8x128xf32>
    %334 = math.tanh %333 : vector<8x128xf32>
    %335 = arith.mulf %330, %334 : vector<8x128xf32>
    %c5_i32 = arith.constant 5 : i32
    %336 = arith.index_cast %c5_i32 : i32 to index
    %c0_77 = arith.constant 0 : index
    %c0_78 = arith.constant 0 : index
    %337 = vector.load %arg8[%336, %c0_77, %c0_78] : memref<8x8x1024xf32, #tpu.memory_space<vmem>>, vector<1x8x1024xf32>
    %338 = vector.shape_cast %337 : vector<1x8x1024xf32> to vector<8x1024xf32>
    %c7_i32_79 = arith.constant 7 : i32
    %339 = arith.subi %c7_i32_79, %c5_i32 : i32
    %340 = arith.index_cast %339 : i32 to index
    %c0_80 = arith.constant 0 : index
    %c0_81 = arith.constant 0 : index
    %341 = vector.load %arg8[%340, %c0_80, %c0_81] : memref<8x8x1024xf32, #tpu.memory_space<vmem>>, vector<1x8x1024xf32>
    %342 = vector.shape_cast %341 : vector<1x8x1024xf32> to vector<8x1024xf32>
    %343 = vector.extract_strided_slice %338 {offsets = [0, 0], sizes = [8, 512], strides = [1, 1]} : vector<8x1024xf32> to vector<8x512xf32>
    %344 = arith.truncf %310 : vector<8x128xf32> to vector<8x128xbf16>
    %cst_82 = arith.constant dense<0.000000e+00> : vector<8x512xf32>
    %345 = tpu.matmul %344, %8, %cst_82 {dimension_numbers = #tpu.dot_dimension_numbers<[1], [0], [0], [1], [0, 0, 1, 1], [], []>} : vector<8x128xbf16>, vector<128x512xbf16>, vector<8x512xf32> -> vector<8x512xf32>
    %346 = arith.addf %343, %345 : vector<8x512xf32>
    %347 = vector.extract_strided_slice %342 {offsets = [0, 512], sizes = [8, 512], strides = [1, 1]} : vector<8x1024xf32> to vector<8x512xf32>
    %348 = arith.truncf %335 : vector<8x128xf32> to vector<8x128xbf16>
    %cst_83 = arith.constant dense<0.000000e+00> : vector<8x512xf32>
    %349 = tpu.matmul %348, %9, %cst_83 {dimension_numbers = #tpu.dot_dimension_numbers<[1], [0], [0], [1], [0, 0, 1, 1], [], []>} : vector<8x128xbf16>, vector<128x512xbf16>, vector<8x512xf32> -> vector<8x512xf32>
    %350 = arith.addf %347, %349 : vector<8x512xf32>
    %351 = vector.extract_strided_slice %346 {offsets = [0, 0], sizes = [8, 128], strides = [1, 1]} : vector<8x512xf32> to vector<8x128xf32>
    %352 = arith.negf %351 : vector<8x128xf32>
    %353 = math.exp %352 : vector<8x128xf32>
    %cst_84 = arith.constant 1.000000e+00 : f32
    %354 = vector.broadcast %cst_84 : f32 to vector<8x128xf32>
    %355 = arith.addf %354, %353 : vector<8x128xf32>
    %356 = arith.divf %354, %355 : vector<8x128xf32>
    %357 = vector.extract_strided_slice %346 {offsets = [0, 128], sizes = [8, 128], strides = [1, 1]} : vector<8x512xf32> to vector<8x128xf32>
    %358 = arith.negf %357 : vector<8x128xf32>
    %359 = math.exp %358 : vector<8x128xf32>
    %cst_85 = arith.constant 1.000000e+00 : f32
    %360 = vector.broadcast %cst_85 : f32 to vector<8x128xf32>
    %361 = arith.addf %360, %359 : vector<8x128xf32>
    %362 = arith.divf %360, %361 : vector<8x128xf32>
    %363 = vector.extract_strided_slice %346 {offsets = [0, 256], sizes = [8, 128], strides = [1, 1]} : vector<8x512xf32> to vector<8x128xf32>
    %364 = math.tanh %363 : vector<8x128xf32>
    %365 = vector.extract_strided_slice %346 {offsets = [0, 384], sizes = [8, 128], strides = [1, 1]} : vector<8x512xf32> to vector<8x128xf32>
    %366 = arith.negf %365 : vector<8x128xf32>
    %367 = math.exp %366 : vector<8x128xf32>
    %cst_86 = arith.constant 1.000000e+00 : f32
    %368 = vector.broadcast %cst_86 : f32 to vector<8x128xf32>
    %369 = arith.addf %368, %367 : vector<8x128xf32>
    %370 = arith.divf %368, %369 : vector<8x128xf32>
    %371 = arith.mulf %362, %308 : vector<8x128xf32>
    %372 = arith.mulf %356, %364 : vector<8x128xf32>
    %373 = arith.addf %371, %372 : vector<8x128xf32>
    %374 = math.tanh %373 : vector<8x128xf32>
    %375 = arith.mulf %370, %374 : vector<8x128xf32>
    %376 = vector.extract_strided_slice %350 {offsets = [0, 0], sizes = [8, 128], strides = [1, 1]} : vector<8x512xf32> to vector<8x128xf32>
    %377 = arith.negf %376 : vector<8x128xf32>
    %378 = math.exp %377 : vector<8x128xf32>
    %cst_87 = arith.constant 1.000000e+00 : f32
    %379 = vector.broadcast %cst_87 : f32 to vector<8x128xf32>
    %380 = arith.addf %379, %378 : vector<8x128xf32>
    %381 = arith.divf %379, %380 : vector<8x128xf32>
    %382 = vector.extract_strided_slice %350 {offsets = [0, 128], sizes = [8, 128], strides = [1, 1]} : vector<8x512xf32> to vector<8x128xf32>
    %383 = arith.negf %382 : vector<8x128xf32>
    %384 = math.exp %383 : vector<8x128xf32>
    %cst_88 = arith.constant 1.000000e+00 : f32
    %385 = vector.broadcast %cst_88 : f32 to vector<8x128xf32>
    %386 = arith.addf %385, %384 : vector<8x128xf32>
    %387 = arith.divf %385, %386 : vector<8x128xf32>
    %388 = vector.extract_strided_slice %350 {offsets = [0, 256], sizes = [8, 128], strides = [1, 1]} : vector<8x512xf32> to vector<8x128xf32>
    %389 = math.tanh %388 : vector<8x128xf32>
    %390 = vector.extract_strided_slice %350 {offsets = [0, 384], sizes = [8, 128], strides = [1, 1]} : vector<8x512xf32> to vector<8x128xf32>
    %391 = arith.negf %390 : vector<8x128xf32>
    %392 = math.exp %391 : vector<8x128xf32>
    %cst_89 = arith.constant 1.000000e+00 : f32
    %393 = vector.broadcast %cst_89 : f32 to vector<8x128xf32>
    %394 = arith.addf %393, %392 : vector<8x128xf32>
    %395 = arith.divf %393, %394 : vector<8x128xf32>
    %396 = arith.mulf %387, %333 : vector<8x128xf32>
    %397 = arith.mulf %381, %389 : vector<8x128xf32>
    %398 = arith.addf %396, %397 : vector<8x128xf32>
    %399 = math.tanh %398 : vector<8x128xf32>
    %400 = arith.mulf %395, %399 : vector<8x128xf32>
    %c6_i32 = arith.constant 6 : i32
    %401 = arith.index_cast %c6_i32 : i32 to index
    %c0_90 = arith.constant 0 : index
    %c0_91 = arith.constant 0 : index
    %402 = vector.load %arg8[%401, %c0_90, %c0_91] : memref<8x8x1024xf32, #tpu.memory_space<vmem>>, vector<1x8x1024xf32>
    %403 = vector.shape_cast %402 : vector<1x8x1024xf32> to vector<8x1024xf32>
    %c7_i32_92 = arith.constant 7 : i32
    %404 = arith.subi %c7_i32_92, %c6_i32 : i32
    %405 = arith.index_cast %404 : i32 to index
    %c0_93 = arith.constant 0 : index
    %c0_94 = arith.constant 0 : index
    %406 = vector.load %arg8[%405, %c0_93, %c0_94] : memref<8x8x1024xf32, #tpu.memory_space<vmem>>, vector<1x8x1024xf32>
    %407 = vector.shape_cast %406 : vector<1x8x1024xf32> to vector<8x1024xf32>
    %408 = vector.extract_strided_slice %403 {offsets = [0, 0], sizes = [8, 512], strides = [1, 1]} : vector<8x1024xf32> to vector<8x512xf32>
    %409 = arith.truncf %375 : vector<8x128xf32> to vector<8x128xbf16>
    %cst_95 = arith.constant dense<0.000000e+00> : vector<8x512xf32>
    %410 = tpu.matmul %409, %8, %cst_95 {dimension_numbers = #tpu.dot_dimension_numbers<[1], [0], [0], [1], [0, 0, 1, 1], [], []>} : vector<8x128xbf16>, vector<128x512xbf16>, vector<8x512xf32> -> vector<8x512xf32>
    %411 = arith.addf %408, %410 : vector<8x512xf32>
    %412 = vector.extract_strided_slice %407 {offsets = [0, 512], sizes = [8, 512], strides = [1, 1]} : vector<8x1024xf32> to vector<8x512xf32>
    %413 = arith.truncf %400 : vector<8x128xf32> to vector<8x128xbf16>
    %cst_96 = arith.constant dense<0.000000e+00> : vector<8x512xf32>
    %414 = tpu.matmul %413, %9, %cst_96 {dimension_numbers = #tpu.dot_dimension_numbers<[1], [0], [0], [1], [0, 0, 1, 1], [], []>} : vector<8x128xbf16>, vector<128x512xbf16>, vector<8x512xf32> -> vector<8x512xf32>
    %415 = arith.addf %412, %414 : vector<8x512xf32>
    %416 = vector.extract_strided_slice %411 {offsets = [0, 0], sizes = [8, 128], strides = [1, 1]} : vector<8x512xf32> to vector<8x128xf32>
    %417 = arith.negf %416 : vector<8x128xf32>
    %418 = math.exp %417 : vector<8x128xf32>
    %cst_97 = arith.constant 1.000000e+00 : f32
    %419 = vector.broadcast %cst_97 : f32 to vector<8x128xf32>
    %420 = arith.addf %419, %418 : vector<8x128xf32>
    %421 = arith.divf %419, %420 : vector<8x128xf32>
    %422 = vector.extract_strided_slice %411 {offsets = [0, 128], sizes = [8, 128], strides = [1, 1]} : vector<8x512xf32> to vector<8x128xf32>
    %423 = arith.negf %422 : vector<8x128xf32>
    %424 = math.exp %423 : vector<8x128xf32>
    %cst_98 = arith.constant 1.000000e+00 : f32
    %425 = vector.broadcast %cst_98 : f32 to vector<8x128xf32>
    %426 = arith.addf %425, %424 : vector<8x128xf32>
    %427 = arith.divf %425, %426 : vector<8x128xf32>
    %428 = vector.extract_strided_slice %411 {offsets = [0, 256], sizes = [8, 128], strides = [1, 1]} : vector<8x512xf32> to vector<8x128xf32>
    %429 = math.tanh %428 : vector<8x128xf32>
    %430 = vector.extract_strided_slice %411 {offsets = [0, 384], sizes = [8, 128], strides = [1, 1]} : vector<8x512xf32> to vector<8x128xf32>
    %431 = arith.negf %430 : vector<8x128xf32>
    %432 = math.exp %431 : vector<8x128xf32>
    %cst_99 = arith.constant 1.000000e+00 : f32
    %433 = vector.broadcast %cst_99 : f32 to vector<8x128xf32>
    %434 = arith.addf %433, %432 : vector<8x128xf32>
    %435 = arith.divf %433, %434 : vector<8x128xf32>
    %436 = arith.mulf %427, %373 : vector<8x128xf32>
    %437 = arith.mulf %421, %429 : vector<8x128xf32>
    %438 = arith.addf %436, %437 : vector<8x128xf32>
    %439 = math.tanh %438 : vector<8x128xf32>
    %440 = arith.mulf %435, %439 : vector<8x128xf32>
    %441 = vector.extract_strided_slice %415 {offsets = [0, 0], sizes = [8, 128], strides = [1, 1]} : vector<8x512xf32> to vector<8x128xf32>
    %442 = arith.negf %441 : vector<8x128xf32>
    %443 = math.exp %442 : vector<8x128xf32>
    %cst_100 = arith.constant 1.000000e+00 : f32
    %444 = vector.broadcast %cst_100 : f32 to vector<8x128xf32>
    %445 = arith.addf %444, %443 : vector<8x128xf32>
    %446 = arith.divf %444, %445 : vector<8x128xf32>
    %447 = vector.extract_strided_slice %415 {offsets = [0, 128], sizes = [8, 128], strides = [1, 1]} : vector<8x512xf32> to vector<8x128xf32>
    %448 = arith.negf %447 : vector<8x128xf32>
    %449 = math.exp %448 : vector<8x128xf32>
    %cst_101 = arith.constant 1.000000e+00 : f32
    %450 = vector.broadcast %cst_101 : f32 to vector<8x128xf32>
    %451 = arith.addf %450, %449 : vector<8x128xf32>
    %452 = arith.divf %450, %451 : vector<8x128xf32>
    %453 = vector.extract_strided_slice %415 {offsets = [0, 256], sizes = [8, 128], strides = [1, 1]} : vector<8x512xf32> to vector<8x128xf32>
    %454 = math.tanh %453 : vector<8x128xf32>
    %455 = vector.extract_strided_slice %415 {offsets = [0, 384], sizes = [8, 128], strides = [1, 1]} : vector<8x512xf32> to vector<8x128xf32>
    %456 = arith.negf %455 : vector<8x128xf32>
    %457 = math.exp %456 : vector<8x128xf32>
    %cst_102 = arith.constant 1.000000e+00 : f32
    %458 = vector.broadcast %cst_102 : f32 to vector<8x128xf32>
    %459 = arith.addf %458, %457 : vector<8x128xf32>
    %460 = arith.divf %458, %459 : vector<8x128xf32>
    %461 = arith.mulf %452, %398 : vector<8x128xf32>
    %462 = arith.mulf %446, %454 : vector<8x128xf32>
    %463 = arith.addf %461, %462 : vector<8x128xf32>
    %464 = math.tanh %463 : vector<8x128xf32>
    %465 = arith.mulf %460, %464 : vector<8x128xf32>
    %c7_i32_103 = arith.constant 7 : i32
    %466 = arith.index_cast %c7_i32_103 : i32 to index
    %c0_104 = arith.constant 0 : index
    %c0_105 = arith.constant 0 : index
    %467 = vector.load %arg8[%466, %c0_104, %c0_105] : memref<8x8x1024xf32, #tpu.memory_space<vmem>>, vector<1x8x1024xf32>
    %468 = vector.shape_cast %467 : vector<1x8x1024xf32> to vector<8x1024xf32>
    %c7_i32_106 = arith.constant 7 : i32
    %469 = arith.subi %c7_i32_106, %c7_i32_103 : i32
    %470 = arith.index_cast %469 : i32 to index
    %c0_107 = arith.constant 0 : index
    %c0_108 = arith.constant 0 : index
    %471 = vector.load %arg8[%470, %c0_107, %c0_108] : memref<8x8x1024xf32, #tpu.memory_space<vmem>>, vector<1x8x1024xf32>
    %472 = vector.shape_cast %471 : vector<1x8x1024xf32> to vector<8x1024xf32>
    %473 = vector.extract_strided_slice %468 {offsets = [0, 0], sizes = [8, 512], strides = [1, 1]} : vector<8x1024xf32> to vector<8x512xf32>
    %474 = arith.truncf %440 : vector<8x128xf32> to vector<8x128xbf16>
    %cst_109 = arith.constant dense<0.000000e+00> : vector<8x512xf32>
    %475 = tpu.matmul %474, %8, %cst_109 {dimension_numbers = #tpu.dot_dimension_numbers<[1], [0], [0], [1], [0, 0, 1, 1], [], []>} : vector<8x128xbf16>, vector<128x512xbf16>, vector<8x512xf32> -> vector<8x512xf32>
    %476 = arith.addf %473, %475 : vector<8x512xf32>
    %477 = vector.extract_strided_slice %472 {offsets = [0, 512], sizes = [8, 512], strides = [1, 1]} : vector<8x1024xf32> to vector<8x512xf32>
    %478 = arith.truncf %465 : vector<8x128xf32> to vector<8x128xbf16>
    %cst_110 = arith.constant dense<0.000000e+00> : vector<8x512xf32>
    %479 = tpu.matmul %478, %9, %cst_110 {dimension_numbers = #tpu.dot_dimension_numbers<[1], [0], [0], [1], [0, 0, 1, 1], [], []>} : vector<8x128xbf16>, vector<128x512xbf16>, vector<8x512xf32> -> vector<8x512xf32>
    %480 = arith.addf %477, %479 : vector<8x512xf32>
    %481 = vector.extract_strided_slice %476 {offsets = [0, 0], sizes = [8, 128], strides = [1, 1]} : vector<8x512xf32> to vector<8x128xf32>
    %482 = arith.negf %481 : vector<8x128xf32>
    %483 = math.exp %482 : vector<8x128xf32>
    %cst_111 = arith.constant 1.000000e+00 : f32
    %484 = vector.broadcast %cst_111 : f32 to vector<8x128xf32>
    %485 = arith.addf %484, %483 : vector<8x128xf32>
    %486 = arith.divf %484, %485 : vector<8x128xf32>
    %487 = vector.extract_strided_slice %476 {offsets = [0, 128], sizes = [8, 128], strides = [1, 1]} : vector<8x512xf32> to vector<8x128xf32>
    %488 = arith.negf %487 : vector<8x128xf32>
    %489 = math.exp %488 : vector<8x128xf32>
    %cst_112 = arith.constant 1.000000e+00 : f32
    %490 = vector.broadcast %cst_112 : f32 to vector<8x128xf32>
    %491 = arith.addf %490, %489 : vector<8x128xf32>
    %492 = arith.divf %490, %491 : vector<8x128xf32>
    %493 = vector.extract_strided_slice %476 {offsets = [0, 256], sizes = [8, 128], strides = [1, 1]} : vector<8x512xf32> to vector<8x128xf32>
    %494 = math.tanh %493 : vector<8x128xf32>
    %495 = vector.extract_strided_slice %476 {offsets = [0, 384], sizes = [8, 128], strides = [1, 1]} : vector<8x512xf32> to vector<8x128xf32>
    %496 = arith.negf %495 : vector<8x128xf32>
    %497 = math.exp %496 : vector<8x128xf32>
    %cst_113 = arith.constant 1.000000e+00 : f32
    %498 = vector.broadcast %cst_113 : f32 to vector<8x128xf32>
    %499 = arith.addf %498, %497 : vector<8x128xf32>
    %500 = arith.divf %498, %499 : vector<8x128xf32>
    %501 = arith.mulf %492, %438 : vector<8x128xf32>
    %502 = arith.mulf %486, %494 : vector<8x128xf32>
    %503 = arith.addf %501, %502 : vector<8x128xf32>
    %504 = math.tanh %503 : vector<8x128xf32>
    %505 = arith.mulf %500, %504 : vector<8x128xf32>
    %506 = vector.extract_strided_slice %480 {offsets = [0, 0], sizes = [8, 128], strides = [1, 1]} : vector<8x512xf32> to vector<8x128xf32>
    %507 = arith.negf %506 : vector<8x128xf32>
    %508 = math.exp %507 : vector<8x128xf32>
    %cst_114 = arith.constant 1.000000e+00 : f32
    %509 = vector.broadcast %cst_114 : f32 to vector<8x128xf32>
    %510 = arith.addf %509, %508 : vector<8x128xf32>
    %511 = arith.divf %509, %510 : vector<8x128xf32>
    %512 = vector.extract_strided_slice %480 {offsets = [0, 128], sizes = [8, 128], strides = [1, 1]} : vector<8x512xf32> to vector<8x128xf32>
    %513 = arith.negf %512 : vector<8x128xf32>
    %514 = math.exp %513 : vector<8x128xf32>
    %cst_115 = arith.constant 1.000000e+00 : f32
    %515 = vector.broadcast %cst_115 : f32 to vector<8x128xf32>
    %516 = arith.addf %515, %514 : vector<8x128xf32>
    %517 = arith.divf %515, %516 : vector<8x128xf32>
    %518 = vector.extract_strided_slice %480 {offsets = [0, 256], sizes = [8, 128], strides = [1, 1]} : vector<8x512xf32> to vector<8x128xf32>
    %519 = math.tanh %518 : vector<8x128xf32>
    %520 = vector.extract_strided_slice %480 {offsets = [0, 384], sizes = [8, 128], strides = [1, 1]} : vector<8x512xf32> to vector<8x128xf32>
    %521 = arith.negf %520 : vector<8x128xf32>
    %522 = math.exp %521 : vector<8x128xf32>
    %cst_116 = arith.constant 1.000000e+00 : f32
    %523 = vector.broadcast %cst_116 : f32 to vector<8x128xf32>
    %524 = arith.addf %523, %522 : vector<8x128xf32>
    %525 = arith.divf %523, %524 : vector<8x128xf32>
    %526 = arith.mulf %517, %463 : vector<8x128xf32>
    %527 = arith.mulf %511, %519 : vector<8x128xf32>
    %528 = arith.addf %526, %527 : vector<8x128xf32>
    %529 = math.tanh %528 : vector<8x128xf32>
    %530 = arith.mulf %525, %529 : vector<8x128xf32>
    %c8_i32 = arith.constant 8 : i32
    %531 = arith.truncf %505 : vector<8x128xf32> to vector<8x128xbf16>
    %c0_117 = arith.constant 0 : index
    %c0_118 = arith.constant 0 : index
    %532 = vector.load %arg5[%c0_117, %c0_118] : memref<256x128xbf16, #tpu.memory_space<vmem>>, vector<128x128xbf16>
    %cst_119 = arith.constant dense<0.000000e+00> : vector<8x128xf32>
    %533 = tpu.matmul %531, %532, %cst_119 {dimension_numbers = #tpu.dot_dimension_numbers<[1], [0], [0], [1], [0, 0, 1, 1], [], []>} : vector<8x128xbf16>, vector<128x128xbf16>, vector<8x128xf32> -> vector<8x128xf32>
    %534 = arith.truncf %530 : vector<8x128xf32> to vector<8x128xbf16>
    %c128 = arith.constant 128 : index
    %c0_120 = arith.constant 0 : index
    %535 = vector.load %arg5[%c128, %c0_120] : memref<256x128xbf16, #tpu.memory_space<vmem>>, vector<128x128xbf16>
    %cst_121 = arith.constant dense<0.000000e+00> : vector<8x128xf32>
    %536 = tpu.matmul %534, %535, %cst_121 {dimension_numbers = #tpu.dot_dimension_numbers<[1], [0], [0], [1], [0, 0, 1, 1], [], []>} : vector<8x128xbf16>, vector<128x128xbf16>, vector<8x128xf32> -> vector<8x128xf32>
    %537 = arith.addf %533, %536 : vector<8x128xf32>
    %c0_122 = arith.constant 0 : index
    %c0_123 = arith.constant 0 : index
    %538 = vector.load %arg6[%c0_122, %c0_123] : memref<1x128xf32, #tpu.memory_space<vmem>>, vector<1x128xf32>
    %539 = vector.broadcast %538 : vector<1x128xf32> to vector<8x128xf32>
    %540 = arith.addf %537, %539 : vector<8x128xf32>
    %c0_124 = arith.constant 0 : index
    %c0_125 = arith.constant 0 : index
    %541 = vector.load %arg7[%c0_124, %c0_125] : memref<8x128xf32, #tpu.memory_space<vmem>>, vector<8x128xf32>
    tpu.vector_store %arg7[%c0_124, %c0_125], %540 {strides = array<i32>} : memref<8x128xf32, #tpu.memory_space<vmem>>, vector<8x128xf32>,
    return
  }
}

</mosaic_0001>

<bundles_post_ra>
// kernel: tpu_custom_call.1
= control target key start
LH: loop header
LB: loop body
LE: loop exit
PB: predicated region body
PF: predicated region fallthrough
CT: control target
= control target key end

     0   :  { %12 = vsyncpa [#allocation4], 0  ;;  %s5594_s0 = inlined_call_operand.hbm [shape: bf16[64,128], index: 0, kind: input, shape index: {}]   ;;  %s5595_s1 = inlined_call_operand.hbm [shape: bf16[128,1024], index: 1, kind: input, shape index: {}]   ;;  %s5596_s2 = inlined_call_operand.hbm [shape: f32[1,1024], index: 2, kind: input, shape index: {}]   ;;  %s5597_s3 = inlined_call_operand.hbm [shape: bf16[128,512], index: 3, kind: input, shape index: {}]   ;;  %s5598_s4 = inlined_call_operand.hbm [shape: bf16[128,512], index: 4, kind: input, shape index: {}]   ;;  %s5599_s5 = inlined_call_operand.hbm [shape: bf16[256,128], index: 5, kind: input, shape index: {}]   ;;  %s5600_s6 = inlined_call_operand.vmem [shape: f32[1,128], index: 6, kind: input, shape index: {}]   ;;  %s5601_s7 = inlined_call_operand.hbm [shape: f32[8,128], index: 7, kind: output, shape index: {}]  }
   0x1   :  { %13 = vsyncpa [#allocation7], 0 }
   0x2   :  { %14 = vsyncpa [#allocation10], 0 }
   0x3   :  { %15 = vsyncpa [#allocation13], 0 }
   0x4   :  { %16 = vsyncpa [#allocation5], 0  ;;  %s4323_s24 = smov [#allocation6]   ;;  %s4159_s28 = scalar_lea.hbm %s5595_s1, 8192 }
   0x5   :  { %s34_s25 = sshll.u32 %s4323_s24, 4  ;;  %p4160_p0 = scmp.ne.s32.totalorder %s5595_s1, %s4159_s28  ;;  %s35_s25 = int_to_ptr.vmem [resolvable:$true] %s34_s25 }
   0x6   :  { %p4163_p1 = scmp.lt.u32.totalorder %s4159_s28, %s5595_s1 }
   0x8   :  { %p4165_p2 = pnand %p4163_p1, %p4160_p0 }
   0xa   :  { %4168 = shalt.err (!%p4165_p2)
}
   0xb   :  { %s4169_s10 = scalar_lea.vmem %s35_s25, 8192  ;;  %p4174_p4 = scmp.lt.s32.totalorder %s35_s25, %s35_s25 }
   0xc   :  { %p4170_p3 = scmp.ne.s32.totalorder %s35_s25, %s4169_s10  ;;  %p4175_p5 = scmp.lt.s32.totalorder %s4169_s10, %s4169_s10 }
   0xe   :  { %p4176_p6 = por %p4175_p5, %p4174_p4 }
  0x10   :  { %p4177_p7 = pnand %p4176_p6, %p4170_p3 }
  0x12   :  { %4180 = shalt.err (!%p4177_p7)
}
  0x13   :  { %s4324_s11 = smov 512   ;;  %s4325_s12 = smov 32  }
  0x14   :  { %40 = dma.hbm_to_vmem [thread:$0]  %s5595_s1, 8192, %s35_s25, [#allocation7], %s4324_s11, %s4324_s11, %s4325_s12  }
  0x15   :  { %s4326_s15 = smov [#allocation9]   ;;  %s4181_s19 = scalar_lea.hbm %s5597_s3, 4096 }
  0x16   :  { %s56_s16 = sshll.u32 %s4326_s15, 4  ;;  %p4182_p8 = scmp.ne.s32.totalorder %s5597_s3, %s4181_s19  ;;  %s57_s16 = int_to_ptr.vmem [resolvable:$true] %s56_s16 }
  0x17   :  { %p4185_p9 = scmp.lt.u32.totalorder %s4181_s19, %s5597_s3 }
  0x19   :  { %p4187_p10 = pnand %p4185_p9, %p4182_p8 }
  0x1b   :  { %4190 = shalt.err (!%p4187_p10)
}
  0x1c   :  { %s4191_s24 = scalar_lea.vmem %s57_s16, 4096  ;;  %p4196_p12 = scmp.lt.s32.totalorder %s57_s16, %s57_s16 }
  0x1d   :  { %p4192_p11 = scmp.ne.s32.totalorder %s57_s16, %s4191_s24  ;;  %p4197_p13 = scmp.lt.s32.totalorder %s4191_s24, %s4191_s24 }
  0x1f   :  { %p4198_p0 = por %p4197_p13, %p4196_p12 }
  0x21   :  { %p4199_p1 = pnand %p4198_p0, %p4192_p11 }
  0x23   :  { %4202 = shalt.err (!%p4199_p1)
}
  0x24   :  { %s4327_s1 = smov 256   ;;  %s4328_s25 = smov 16  }
  0x25   :  { %62 = dma.hbm_to_vmem [thread:$0]  %s5597_s3, 4096, %s57_s16, [#allocation10], %s4327_s1, %s4327_s1, %s4328_s25  }
  0x26   :  { %s4329_s28 = smov [#allocation3]   ;;  %s4203_s9 = scalar_lea.hbm %s5594_s0, 512 }
  0x27   :  { %s22_s29 = sshll.u32 %s4329_s28, 4  ;;  %p4204_p2 = scmp.ne.s32.totalorder %s5594_s0, %s4203_s9  ;;  %s23_s29 = int_to_ptr.vmem [resolvable:$true] %s22_s29 }
  0x28   :  { %p4207_p3 = scmp.lt.u32.totalorder %s4203_s9, %s5594_s0 }
  0x2a   :  { %p4209_p4 = pnand %p4207_p3, %p4204_p2 }
  0x2c   :  { %4212 = shalt.err (!%p4209_p4)
}
  0x2d   :  { %s4213_s14 = scalar_lea.vmem %s23_s29, 512  ;;  %p4218_p6 = scmp.lt.s32.totalorder %s23_s29, %s23_s29 }
  0x2e   :  { %p4214_p5 = scmp.ne.s32.totalorder %s23_s29, %s4213_s14  ;;  %p4219_p7 = scmp.lt.s32.totalorder %s4213_s14, %s4213_s14 }
  0x30   :  { %p4220_p8 = por %p4219_p7, %p4218_p6 }
  0x32   :  { %p4221_p9 = pnand %p4220_p8, %p4214_p5 }
  0x34   :  { %4224 = shalt.err (!%p4221_p9)
}
  0x35   :  { %s4330_s3 = smov 64   ;;  %s4331_s15 = smov 4  }
  0x36   :  { %28 = dma.hbm_to_vmem [thread:$0]  %s5594_s0, 512, %s23_s29, [#allocation4], %s4330_s3, %s4330_s3, %s4331_s15  }
  0x37   :  { %s4332_s18 = smov [#allocation8]   ;;  %s4333_s20 = smov [#allocation11]  }
  0x38   :  { %s47_s19 = sshll.u32 %s4332_s18, 4  ;;  %s68_s21 = sshll.u32 %s4333_s20, 4  ;;  %s48_s19 = int_to_ptr.vmem [resolvable:$true] %s47_s19  ;;  %s69_s21 = int_to_ptr.vmem [resolvable:$true] %s68_s21 }
  0x39   :  { %s4225_s24 = scalar_lea.hbm %s5596_s2, 128 }
  0x3a   :  { %p4226_p10 = scmp.ne.s32.totalorder %s5596_s2, %s4225_s24  ;;  %p4229_p11 = scmp.lt.u32.totalorder %s4225_s24, %s5596_s2 }
  0x3c   :  { %p4231_p12 = pnand %p4229_p11, %p4226_p10 }
  0x3e   :  { %4234 = shalt.err (!%p4231_p12)
}
  0x3f   :  { %s4235_s0 = scalar_lea.vmem %s48_s19, 128  ;;  %p4240_p0 = scmp.lt.s32.totalorder %s48_s19, %s48_s19 }
  0x40   :  { %p4236_p13 = scmp.ne.s32.totalorder %s48_s19, %s4235_s0  ;;  %p4241_p1 = scmp.lt.s32.totalorder %s4235_s0, %s4235_s0 }
  0x42   :  { %p4242_p2 = por %p4241_p1, %p4240_p0 }
  0x44   :  { %p4243_p3 = pnand %p4242_p2, %p4236_p13 }
  0x46   :  { %4246 = shalt.err (!%p4243_p3)
}
  0x47   :  { %50 = dma.hbm_to_vmem [thread:$0]  %s5596_s2, 128, %s48_s19, [#allocation7]  }
  0x48   :  { %s4247_s11 = scalar_lea.hbm %s5598_s4, 4096 }
  0x49   :  { %p4248_p4 = scmp.ne.s32.totalorder %s5598_s4, %s4247_s11  ;;  %p4251_p5 = scmp.lt.u32.totalorder %s4247_s11, %s5598_s4 }
  0x4b   :  { %p4253_p6 = pnand %p4251_p5, %p4248_p4 }
  0x4d   :  { %4256 = shalt.err (!%p4253_p6)
}
  0x4e   :  { %s4257_s17 = scalar_lea.vmem %s69_s21, 4096  ;;  %p4262_p8 = scmp.lt.s32.totalorder %s69_s21, %s69_s21 }
  0x4f   :  { %p4258_p7 = scmp.ne.s32.totalorder %s69_s21, %s4257_s17  ;;  %p4263_p9 = scmp.lt.s32.totalorder %s4257_s17, %s4257_s17 }
  0x51   :  { %p4264_p10 = por %p4263_p9, %p4262_p8 }
  0x53   :  { %p4265_p11 = pnand %p4264_p10, %p4258_p7 }
  0x55   :  { %4268 = shalt.err (!%p4265_p11)
}
  0x56   :  { %74 = dma.hbm_to_vmem [thread:$0]  %s5598_s4, 4096, %s69_s21, [#allocation10], %s4327_s1, %s4327_s1, %s4328_s25  }
  0x57   :  { %s4334_s19 = smov [#allocation12]   ;;  %s4269_s24 = scalar_lea.hbm %s5599_s5, 2048 }
  0x58   :  { %s80_s20 = sshll.u32 %s4334_s19, 4  ;;  %p4270_p12 = scmp.ne.s32.totalorder %s5599_s5, %s4269_s24  ;;  %s81_s20 = int_to_ptr.vmem [resolvable:$true] %s80_s20 }
  0x59   :  { %p4273_p13 = scmp.lt.u32.totalorder %s4269_s24, %s5599_s5 }
  0x5b   :  { %p4275_p0 = pnand %p4273_p13, %p4270_p12 }
  0x5d   :  { %4278 = shalt.err (!%p4275_p0)
}
  0x5e   :  { %s4279_s0 = scalar_lea.vmem %s81_s20, 2048  ;;  %p4284_p2 = scmp.lt.s32.totalorder %s81_s20, %s81_s20 }
  0x5f   :  { %p4280_p1 = scmp.ne.s32.totalorder %s81_s20, %s4279_s0  ;;  %p4285_p3 = scmp.lt.s32.totalorder %s4279_s0, %s4279_s0 }
  0x61   :  { %p4286_p4 = por %p4285_p3, %p4284_p2 }
  0x63   :  { %p4287_p5 = pnand %p4286_p4, %p4280_p1 }
  0x65   :  { %4290 = shalt.err (!%p4287_p5)
}
  0x66   :  { %86 = dma.hbm_to_vmem [thread:$0]  %s5599_s5, 2048, %s81_s20, [#allocation13], %s4330_s3, %s4330_s3, %s4331_s15  }
  0x67   :  { %4313 = dma.done.wait [#allocation4], 512  }
  0x68   :  { %4314 = vsyncadd [#allocation4], 4294966784 }
  0x69   :  { %4315 = dma.done.wait [#allocation7], 8320  }
  0x6a   :  { %4316 = vsyncadd [#allocation7], 4294958976 }
  0x6b   :  { %4317 = dma.done.wait [#allocation10], 8192  }
  0x6c   :  { %4318 = vsyncadd [#allocation10], 4294959104 }
  0x6d   :  { %4319 = dma.done.wait [#allocation13], 2048  }
  0x6e   :  { %4320 = vsyncadd [#allocation13], 4294965248  ;;  %v5602_v0 = vmov 0   ;;  %v116_v1 = vld [vmem:[#allocation6] sm:$0xff]  ;;  %v117_v3 = vld [vmem:[#allocation6 + $0x8] sm:$0xff]  ;;  %vm4337_vm0 = vmmov 0  }
  0x6f   :  { %598 = vmatprep.mubr.bf16.mxu0 %v5602_v0  ;;  %671 = vmatprep.mubr.bf16.mxu1 %v5602_v0  ;;  %v120_v2 = vld [vmem:[#allocation6 + $0x20] sm:$0xff]  ;;  %v121_v5 = vld [vmem:[#allocation6 + $0x28] sm:$0xff]  ;;  %v118_v62 = vld [vmem:[#allocation6 + $0x10] sm:$0xff]  ;;  %s4338_s3 = smov [#allocation14]  }
  0x70   :  { %v3393_v4 = vcombine.high %v116_v1, %v120_v2  ;;  %v3392_v6 = vcombine.low %v116_v1, %v120_v2  ;;  %v124_v7 = vld [vmem:[#allocation6 + $0x40] sm:$0xff]  ;;  %v3395_v9 = vcombine.high %v117_v3, %v121_v5  ;;  %v3394_v10 = vcombine.low %v117_v3, %v121_v5  ;;  %v125_v12 = vld [vmem:[#allocation6 + $0x48] sm:$0xff]  ;;  %v122_v1 = vld [vmem:[#allocation6 + $0x30] sm:$0xff]  ;;  %s3376_s15 = sshll.u32 %s4338_s3, 4  ;;  %s3377_s15 = int_to_ptr.vmem [resolvable:$true] %s3376_s15 }
  0x71   :  { %v128_v8 = vld [vmem:[#allocation6 + $0x60] sm:$0xff]  ;;  %v129_v13 = vld [vmem:[#allocation6 + $0x68] sm:$0xff]  ;;  %v119_v2 = vld [vmem:[#allocation6 + $0x18] sm:$0xff]  ;;  %s4291_s21 = scalar_lea.vmem %s3377_s15, 128  ;;  %p4296_p7 = scmp.lt.s32.totalorder %s3377_s15, %s3377_s15 }
  0x72   :  { %v3401_v11 = vcombine.high %v124_v7, %v128_v8  ;;  %v132_v14 = vld [vmem:[#allocation6 + $0x80] sm:$0xff]  ;;  %566 = vmatprep.subr.bf16.mxu0 %v3393_v4  ;;  %v3403_v15 = vcombine.high %v125_v12, %v129_v13  ;;  %v133_v17 = vld [vmem:[#allocation6 + $0x88] sm:$0xff]  ;;  %639 = vmatprep.subr.bf16.mxu1 %v3395_v9  ;;  %v3400_v19 = vcombine.low %v124_v7, %v128_v8  ;;  %v123_v3 = vld [vmem:[#allocation6 + $0x38] sm:$0xff]  ;;  %p4292_p6 = scmp.ne.s32.totalorder %s3377_s15, %s4291_s21  ;;  %p4297_p8 = scmp.lt.s32.totalorder %s4291_s21, %s4291_s21 }
  0x73   :  { %v136_v16 = vld [vmem:[#allocation6 + $0xa0] sm:$0xff]  ;;  %v137_v18 = vld [vmem:[#allocation6 + $0xa8] sm:$0xff]  ;;  %567 = vmatpush1.bf16.msra.mxu0 %v3392_v6  ;;  %640 = vmatpush1.bf16.msra.mxu1 %v3394_v10  ;;  %v3402_v20 = vcombine.low %v125_v12, %v129_v13  ;;  %v3397_v7 = vcombine.high %v118_v62, %v122_v1  ;;  %v126_v8 = vld [vmem:[#allocation6 + $0x50] sm:$0xff]  ;;  %v3399_v9 = vcombine.high %v119_v2, %v123_v3 }
  0x74   :  { %568 = vmatprep.subr.bf16.mxu0 %v3401_v11  ;;  %v3409_v21 = vcombine.high %v132_v14, %v136_v16  ;;  %641 = vmatprep.subr.bf16.mxu1 %v3403_v15  ;;  %v3411_v22 = vcombine.high %v133_v17, %v137_v18  ;;  %v140_v23 = vld [vmem:[#allocation6 + $0xc0] sm:$0xff]  ;;  %v141_v25 = vld [vmem:[#allocation6 + $0xc8] sm:$0xff]  ;;  %v3408_v27 = vcombine.low %v132_v14, %v136_v16  ;;  %v130_v10 = vld [vmem:[#allocation6 + $0x70] sm:$0xff]  ;;  %p4298_p9 = por %p4297_p8, %p4296_p7 }
  0x75   :  { %v144_v24 = vld [vmem:[#allocation6 + $0xe0] sm:$0xff]  ;;  %v145_v26 = vld [vmem:[#allocation6 + $0xe8] sm:$0xff]  ;;  %v3410_v28 = vcombine.low %v133_v17, %v137_v18  ;;  %v127_v11 = vld [vmem:[#allocation6 + $0x58] sm:$0xff]  ;;  %v3396_v13 = vcombine.low %v118_v62, %v122_v1  ;;  %v3398_v14 = vcombine.low %v119_v2, %v123_v3  ;;  %v3405_v15 = vcombine.high %v126_v8, %v130_v10 }
  0x76   :  { %v3417_v29 = vcombine.high %v140_v23, %v144_v24  ;;  %v3419_v30 = vcombine.high %v141_v25, %v145_v26  ;;  %v148_v31 = vld [vmem:[#allocation6 + $0x100] sm:$0xff]  ;;  %v149_v33 = vld [vmem:[#allocation6 + $0x108] sm:$0xff]  ;;  %v3416_v35 = vcombine.low %v140_v23, %v144_v24  ;;  %v3418_v36 = vcombine.low %v141_v25, %v145_v26  ;;  %v131_v12 = vld [vmem:[#allocation6 + $0x78] sm:$0xff]  ;;  %p4299_p10 = pnand %p4298_p9, %p4292_p6 }
  0x77   :  { %569 = vmatpush1.bf16.msra.mxu0 %v3400_v19  ;;  %642 = vmatpush1.bf16.msra.mxu1 %v3402_v20  ;;  %v152_v32 = vld [vmem:[#allocation6 + $0x120] sm:$0xff]  ;;  %v153_v34 = vld [vmem:[#allocation6 + $0x128] sm:$0xff]  ;;  %v134_v16 = vld [vmem:[#allocation6 + $0x90] sm:$0xff]  ;;  %v3407_v17 = vcombine.high %v127_v11, %v131_v12 }
  0x78   :  { %570 = vmatprep.subr.bf16.mxu0 %v3409_v21  ;;  %643 = vmatprep.subr.bf16.mxu1 %v3411_v22  ;;  %v3425_v37 = vcombine.high %v148_v31, %v152_v32  ;;  %v156_v38 = vld [vmem:[#allocation6 + $0x140] sm:$0xff]  ;;  %v3427_v39 = vcombine.high %v149_v33, %v153_v34  ;;  %v157_v41 = vld [vmem:[#allocation6 + $0x148] sm:$0xff]  ;;  %v3424_v43 = vcombine.low %v148_v31, %v152_v32  ;;  %v138_v18 = vld [vmem:[#allocation6 + $0xb0] sm:$0xff] }
  0x79   :  { %v160_v40 = vld [vmem:[#allocation6 + $0x160] sm:$0xff]  ;;  %v161_v42 = vld [vmem:[#allocation6 + $0x168] sm:$0xff]  ;;  %v3426_v44 = vcombine.low %v149_v33, %v153_v34  ;;  %v135_v19 = vld [vmem:[#allocation6 + $0x98] sm:$0xff]  ;;  %v3404_v21 = vcombine.low %v126_v8, %v130_v10  ;;  %v3406_v22 = vcombine.low %v127_v11, %v131_v12  ;;  %v3413_v24 = vcombine.high %v134_v16, %v138_v18 }
  0x7a   :  { %v3433_v45 = vcombine.high %v156_v38, %v160_v40  ;;  %v164_v46 = vld [vmem:[#allocation6 + $0x180] sm:$0xff]  ;;  %v3435_v47 = vcombine.high %v157_v41, %v161_v42  ;;  %v165_v49 = vld [vmem:[#allocation6 + $0x188] sm:$0xff]  ;;  %v3432_v51 = vcombine.low %v156_v38, %v160_v40  ;;  %v3434_v52 = vcombine.low %v157_v41, %v161_v42  ;;  %v139_v20 = vld [vmem:[#allocation6 + $0xb8] sm:$0xff] }
  0x7b   :  { %571 = vmatpush1.bf16.msra.mxu0 %v3408_v27  ;;  %644 = vmatpush1.bf16.msra.mxu1 %v3410_v28  ;;  %v168_v48 = vld [vmem:[#allocation6 + $0x1a0] sm:$0xff]  ;;  %v169_v50 = vld [vmem:[#allocation6 + $0x1a8] sm:$0xff]  ;;  %v142_v25 = vld [vmem:[#allocation6 + $0xd0] sm:$0xff]  ;;  %v3415_v26 = vcombine.high %v135_v19, %v139_v20  ;;  %v3414_v31 = vcombine.low %v135_v19, %v139_v20 }
  0x7c   :  { %572 = vmatprep.subr.bf16.mxu0 %v3417_v29  ;;  %645 = vmatprep.subr.bf16.mxu1 %v3419_v30  ;;  %v3441_v53 = vcombine.high %v164_v46, %v168_v48  ;;  %v3443_v54 = vcombine.high %v165_v49, %v169_v50  ;;  %v172_v55 = vld [vmem:[#allocation6 + $0x1c0] sm:$0xff]  ;;  %v173_v57 = vld [vmem:[#allocation6 + $0x1c8] sm:$0xff]  ;;  %v3440_v59 = vcombine.low %v164_v46, %v168_v48  ;;  %v146_v27 = vld [vmem:[#allocation6 + $0xf0] sm:$0xff] }
  0x7d   :  { %v176_v56 = vld [vmem:[#allocation6 + $0x1e0] sm:$0xff]  ;;  %v177_v58 = vld [vmem:[#allocation6 + $0x1e8] sm:$0xff]  ;;  %v3442_v60 = vcombine.low %v165_v49, %v169_v50  ;;  %v143_v28 = vld [vmem:[#allocation6 + $0xd8] sm:$0xff]  ;;  %v3412_v30 = vcombine.low %v134_v16, %v138_v18  ;;  %v3421_v32 = vcombine.high %v142_v25, %v146_v27  ;;  %v3420_v38 = vcombine.low %v142_v25, %v146_v27 }
  0x7e   :  { %v3449_v61 = vcombine.high %v172_v55, %v176_v56  ;;  %v3451_v63 = vcombine.high %v173_v57, %v177_v58  ;;  %v3448_v4 = vcombine.low %v172_v55, %v176_v56  ;;  %v3450_v5 = vcombine.low %v173_v57, %v177_v58  ;;  %v4465_v6 = vld [vmem:[#allocation3] sm:$0xff]   ;;  %v4469_v23 = vld [vmem:[#allocation3 + $0x8] sm:$0xff]   ;;  %v147_v29 = vld [vmem:[#allocation6 + $0xf8] sm:$0xff] }
  0x7f   :  { %573 = vmatpush1.bf16.msra.mxu0 %v3416_v35  ;;  %646 = vmatpush1.bf16.msra.mxu1 %v3418_v36  ;;  %v150_v33 = vld [vmem:[#allocation6 + $0x110] sm:$0xff]  ;;  %v3423_v34 = vcombine.high %v143_v28, %v147_v29  ;;  %v151_v36 = vld [vmem:[#allocation6 + $0x118] sm:$0xff] }
  0x80   :  { %574 = vmatprep.subr.bf16.mxu0 %v3425_v37  ;;  %647 = vmatprep.subr.bf16.mxu1 %v3427_v39  ;;  %v154_v35 = vld [vmem:[#allocation6 + $0x130] sm:$0xff]  ;;  %v155_v37 = vld [vmem:[#allocation6 + $0x138] sm:$0xff]  ;;  %v3422_v39 = vcombine.low %v143_v28, %v147_v29 }
  0x81   :  { %v4475_v40 = vld [vmem:[#allocation3 + $0x10] sm:$0xff]   ;;  %v3429_v41 = vcombine.high %v150_v33, %v154_v35  ;;  %v163_v46 = vld [vmem:[#allocation6 + $0x178] sm:$0xff]  ;;  %v3430_v48 = vcombine.low %v151_v36, %v155_v37 }
  0x82   :  { %v158_v42 = vld [vmem:[#allocation6 + $0x150] sm:$0xff]  ;;  %v4481_v57 = vld [vmem:[#allocation3 + $0x18] sm:$0xff]  }
  0x83   :  { %575 = vmatpush1.bf16.msra.mxu0 %v3424_v43  ;;  %648 = vmatpush1.bf16.msra.mxu1 %v3426_v44  ;;  %v3431_v43 = vcombine.high %v151_v36, %v155_v37  ;;  %v162_v44 = vld [vmem:[#allocation6 + $0x170] sm:$0xff]  ;;  %v175_v62 = vld [vmem:[#allocation6 + $0x1d8] sm:$0xff] }
  0x84   :  { %576 = vmatprep.subr.bf16.mxu0 %v3433_v45  ;;  %649 = vmatprep.subr.bf16.mxu1 %v3435_v47  ;;  %v159_v45 = vld [vmem:[#allocation6 + $0x158] sm:$0xff]  ;;  %v3428_v47 = vcombine.low %v150_v33, %v154_v35  ;;  %v3437_v49 = vcombine.high %v158_v42, %v162_v44  ;;  %v166_v50 = vld [vmem:[#allocation6 + $0x190] sm:$0xff]  ;;  %v3436_v55 = vcombine.low %v158_v42, %v162_v44 }
  0x85   :  { %v3438_v56 = vcombine.low %v159_v45, %v163_v46  ;;  %v4487_v8 = vld [vmem:[#allocation9 + $0x4] ss:$16 sps:$4 sm:$0xff]   ;;  %v4493_v10 = vld [vmem:[#allocation9] ss:$16 sps:$4 sm:$0xff]   ;;  %v4495_v11 = vld [vmem:[#allocation9 + $0x8] ss:$16 sps:$4 sm:$0xff]  }
  0x86   :  { %5693 = vst [vmem:[#allocation20_spill] sm:$0xff] %v4493_v10  ;;  %5694 = vst [vmem:[#allocation21_spill] sm:$0xff] %v4495_v11  ;;  %v4498_v12 = vld [vmem:[#allocation9 + $0x24] ss:$16 sps:$4 sm:$0xff]   ;;  %v4518_v18 = vld [vmem:[#allocation9 + $0x40] ss:$16 sps:$4 sm:$0xff]  }
  0x87   :  { %577 = vmatpush1.bf16.msra.mxu0 %v3432_v51  ;;  %650 = vmatpush1.bf16.msra.mxu1 %v3434_v52  ;;  %v3439_v51 = vcombine.high %v159_v45, %v163_v46  ;;  %v170_v52 = vld [vmem:[#allocation6 + $0x1b0] sm:$0xff]  ;;  %5695 = vst [vmem:[#allocation22_spill] sm:$0xff] %v4498_v12  ;;  %v4508_v16 = vld [vmem:[#allocation9 + $0x44] ss:$16 sps:$4 sm:$0xff]   ;;  %5701 = vst [vmem:[#allocation28_spill] sm:$0xff] %v4518_v18 }
  0x88   :  { %578 = vmatprep.subr.bf16.mxu0 %v3441_v53  ;;  %651 = vmatprep.subr.bf16.mxu1 %v3443_v54  ;;  %v167_v53 = vld [vmem:[#allocation6 + $0x198] sm:$0xff]  ;;  %v3445_v58 = vcombine.high %v166_v50, %v170_v52  ;;  %v3444_v1 = vcombine.low %v166_v50, %v170_v52  ;;  %5699 = vst [vmem:[#allocation26_spill] sm:$0xff] %v4508_v16  ;;  %v4521_v19 = vld [vmem:[#allocation9 + $0x48] ss:$16 sps:$4 sm:$0xff]   ;;  %v4540_v25 = vld [vmem:[#allocation9 + $0x8c] ss:$16 sps:$4 sm:$0xff]  }
  0x89   :  { %v171_v54 = vld [vmem:[#allocation6 + $0x1b8] sm:$0xff]  ;;  %5702 = vst [vmem:[#allocation29_spill] sm:$0xff] %v4521_v19  ;;  %5708 = vst [vmem:[#allocation35_spill] sm:$0xff] %v4540_v25  ;;  %v4557_v28 = vld [vmem:[#allocation9 + $0xac] ss:$16 sps:$4 sm:$0xff]  }
  0x8a   :  { %v3446_v2 = vcombine.low %v167_v53, %v171_v54  ;;  %v4523_v20 = vld [vmem:[#allocation9 + $0x64] ss:$16 sps:$4 sm:$0xff]   ;;  %5712 = vst [vmem:[#allocation39_spill] sm:$0xff] %v4557_v28  ;;  %v4562_v29 = vld [vmem:[#allocation9 + $0xa0] ss:$16 sps:$4 sm:$0xff]  }
  0x8b   :  { %579 = vmatpush1.bf16.msra.mxu0 %v3440_v59  ;;  %652 = vmatpush1.bf16.msra.mxu1 %v3442_v60  ;;  %v174_v59 = vld [vmem:[#allocation6 + $0x1d0] sm:$0xff]  ;;  %v3447_v60 = vcombine.high %v167_v53, %v171_v54  ;;  %5703 = vst [vmem:[#allocation30_spill] sm:$0xff] %v4523_v20  ;;  %v4554_v27 = vld [vmem:[#allocation9 + $0xa4] ss:$16 sps:$4 sm:$0xff]   ;;  %5713 = vst [vmem:[#allocation40_spill] sm:$0xff] %v4562_v29 }
  0x8c   :  { %580 = vmatprep.subr.bf16.mxu0 %v3449_v61  ;;  %653 = vmatprep.subr.bf16.mxu1 %v3451_v63  ;;  %v178_v61 = vld [vmem:[#allocation6 + $0x1f0] sm:$0xff]  ;;  %v179_v63 = vld [vmem:[#allocation6 + $0x1f8] sm:$0xff]  ;;  %5711 = vst [vmem:[#allocation38_spill] sm:$0xff] %v4554_v27 }
  0x8d   :  { %v3453_v3 = vcombine.high %v174_v59, %v178_v61  ;;  %v4576_v33 = vld [vmem:[#allocation9 + $0xc0] ss:$16 sps:$4 sm:$0xff]   ;;  %v4582_v35 = vld [vmem:[#allocation9 + $0xe4] ss:$16 sps:$4 sm:$0xff]   ;;  %v4585_v36 = vld [vmem:[#allocation9 + $0xec] ss:$16 sps:$4 sm:$0xff]  }
  0x8e   :  { %5717 = vst [vmem:[#allocation44_spill] sm:$0xff] %v4576_v33  ;;  %5719 = vst [vmem:[#allocation46_spill] sm:$0xff] %v4582_v35  ;;  %v4590_v37 = vld [vmem:[#allocation9 + $0xe0] ss:$16 sps:$4 sm:$0xff]   ;;  %v4608_v42 = vld [vmem:[#allocation11 + $0x8] ss:$16 sps:$4 sm:$0xff]  }
  0x8f   :  { %581 = vmatpush1.bf16.msra.mxu0 %v3448_v4  ;;  %654 = vmatpush1.bf16.msra.mxu1 %v3450_v5  ;;  %v3455_v4 = vcombine.high %v175_v62, %v179_v63  ;;  %v3452_v5 = vcombine.low %v174_v59, %v178_v61  ;;  %5720 = vst [vmem:[#allocation47_spill] sm:$0xff] %v4585_v36  ;;  %5721 = vst [vmem:[#allocation48_spill] sm:$0xff] %v4590_v37  ;;  %v4613_v44 = vld [vmem:[#allocation11 + $0x2c] ss:$16 sps:$4 sm:$0xff]   ;;  %v4618_v45 = vld [vmem:[#allocation11 + $0x20] ss:$16 sps:$4 sm:$0xff]  }
  0x90   :  { %712 = vmatprep.subr.bf16.mxu0 %v3397_v7  ;;  %785 = vmatprep.subr.bf16.mxu1 %v3399_v9  ;;  %v3454_v7 = vcombine.low %v175_v62, %v179_v63  ;;  %v4490_v9 = vld [vmem:[#allocation9 + $0xc] ss:$16 sps:$4 sm:$0xff]   ;;  %v4622_v46 = vld [vmem:[#allocation11 + $0x28] ss:$16 sps:$4 sm:$0xff]   ;;  %v4644_v53 = vld [vmem:[#allocation11 + $0x60] ss:$16 sps:$4 sm:$0xff]  }
  0x91   :  { %v4636_v50 = vld [vmem:[#allocation11 + $0x48] ss:$16 sps:$4 sm:$0xff]   ;;  %v4641_v52 = vld [vmem:[#allocation11 + $0x6c] ss:$16 sps:$4 sm:$0xff]   ;;  %v4662_v59 = vld [vmem:[#allocation11 + $0xa4] ss:$16 sps:$4 sm:$0xff]  }
  0x92   :  { %599 = vmatmul.mubr.bf16.vlgmr.msra.gmra.mrb[0].mxu0 %v4465_v6  ;;  %672 = vmatmul.mubr.bf16.vlgmr.msra.gmra.mrb[0].mxu1 %v4465_v6  ;;  %v4648_v54 = vld [vmem:[#allocation11 + $0x68] ss:$16 sps:$4 sm:$0xff]   ;;  %v4668_v61 = vld [vmem:[#allocation11 + $0xa0] ss:$16 sps:$4 sm:$0xff]   ;;  %v4674_v63 = vld [vmem:[#allocation11 + $0xc4] ss:$16 sps:$4 sm:$0xff]  }
  0x93   :  { %713 = vmatpush1.bf16.msra.mxu0 %v3396_v13  ;;  %786 = vmatpush1.bf16.msra.mxu1 %v3398_v14  ;;  %v4501_v13 = vld [vmem:[#allocation9 + $0x2c] ss:$16 sps:$4 sm:$0xff]   ;;  %v4504_v14 = vld [vmem:[#allocation9 + $0x20] ss:$16 sps:$4 sm:$0xff]   ;;  %v4672_v62 = vld [vmem:[#allocation11 + $0xa8] ss:$16 sps:$4 sm:$0xff]  }
  0x94   :  { %714 = vmatprep.subr.bf16.mxu0 %v3405_v15  ;;  %787 = vmatprep.subr.bf16.mxu1 %v3407_v17  ;;  %5696 = vst [vmem:[#allocation23_spill] sm:$0xff] %v4501_v13  ;;  %5697 = vst [vmem:[#allocation24_spill] sm:$0xff] %v4504_v14  ;;  %v4506_v15 = vld [vmem:[#allocation9 + $0x28] ss:$16 sps:$4 sm:$0xff]   ;;  %v4512_v17 = vld [vmem:[#allocation9 + $0x4c] ss:$16 sps:$4 sm:$0xff]  }
  0x95   :  { %608 = vmatprep.mubr.bf16.mxu0 %v5602_v0  ;;  %681 = vmatprep.mubr.bf16.mxu1 %v5602_v0  ;;  %5698 = vst [vmem:[#allocation25_spill] sm:$0xff] %v4506_v15  ;;  %5700 = vst [vmem:[#allocation27_spill] sm:$0xff] %v4512_v17 }
  0x97   :  { %715 = vmatpush1.bf16.msra.mxu0 %v3404_v21  ;;  %788 = vmatpush1.bf16.msra.mxu1 %v3406_v22  ;;  %v4531_v21 = vld [vmem:[#allocation9 + $0x60] ss:$16 sps:$4 sm:$0xff]   ;;  %v4534_v22 = vld [vmem:[#allocation9 + $0x68] ss:$16 sps:$4 sm:$0xff]  }
  0x98   :  { %716 = vmatprep.subr.bf16.mxu0 %v3413_v24  ;;  %789 = vmatprep.subr.bf16.mxu1 %v3415_v26  ;;  %5705 = vst [vmem:[#allocation32_spill] sm:$0xff] %v4531_v21  ;;  %5706 = vst [vmem:[#allocation33_spill] sm:$0xff] %v4534_v22  ;;  %v4536_v24 = vld [vmem:[#allocation9 + $0x84] ss:$16 sps:$4 sm:$0xff]   ;;  %v4548_v26 = vld [vmem:[#allocation9 + $0x80] ss:$16 sps:$4 sm:$0xff]  }
  0x99   :  { %5707 = vst [vmem:[#allocation34_spill] sm:$0xff] %v4536_v24  ;;  %5709 = vst [vmem:[#allocation36_spill] sm:$0xff] %v4548_v26 }
  0x9a   :  { %609 = vmatmul.mubr.bf16.gmra.mrb[4].mxu0 %v4469_v23  ;;  %682 = vmatmul.mubr.bf16.gmra.mrb[4].mxu1 %v4469_v23 }
  0x9b   :  { %717 = vmatpush1.bf16.msra.mxu0 %v3412_v30  ;;  %790 = vmatpush1.bf16.msra.mxu1 %v3414_v31  ;;  %v4566_v30 = vld [vmem:[#allocation9 + $0xa8] ss:$16 sps:$4 sm:$0xff]   ;;  %v4568_v31 = vld [vmem:[#allocation9 + $0xc4] ss:$16 sps:$4 sm:$0xff]  }
  0x9c   :  { %718 = vmatprep.subr.bf16.mxu0 %v3421_v32  ;;  %791 = vmatprep.subr.bf16.mxu1 %v3423_v34  ;;  %5714 = vst [vmem:[#allocation41_spill] sm:$0xff] %v4566_v30  ;;  %5715 = vst [vmem:[#allocation42_spill] sm:$0xff] %v4568_v31  ;;  %v4572_v32 = vld [vmem:[#allocation9 + $0xcc] ss:$16 sps:$4 sm:$0xff]   ;;  %v4580_v34 = vld [vmem:[#allocation9 + $0xc8] ss:$16 sps:$4 sm:$0xff]  }
  0x9d   :  { %618 = vmatprep.mubr.bf16.mxu0 %v5602_v0  ;;  %691 = vmatprep.mubr.bf16.mxu1 %v5602_v0  ;;  %5716 = vst [vmem:[#allocation43_spill] sm:$0xff] %v4572_v32  ;;  %5718 = vst [vmem:[#allocation45_spill] sm:$0xff] %v4580_v34 }
  0x9f   :  { %719 = vmatpush1.bf16.msra.mxu0 %v3420_v38  ;;  %792 = vmatpush1.bf16.msra.mxu1 %v3422_v39  ;;  %v4594_v38 = vld [vmem:[#allocation9 + $0xe8] ss:$16 sps:$4 sm:$0xff]   ;;  %v4596_v39 = vld [vmem:[#allocation11 + $0x4] ss:$16 sps:$4 sm:$0xff]  }
  0xa0   :  { %720 = vmatprep.subr.bf16.mxu0 %v3429_v41  ;;  %793 = vmatprep.subr.bf16.mxu1 %v3431_v43  ;;  %5722 = vst [vmem:[#allocation49_spill] sm:$0xff] %v4594_v38  ;;  %5723 = vst [vmem:[#allocation50_spill] sm:$0xff] %v4596_v39  ;;  %v4604_v41 = vld [vmem:[#allocation11] ss:$16 sps:$4 sm:$0xff]   ;;  %v4610_v43 = vld [vmem:[#allocation11 + $0x24] ss:$16 sps:$4 sm:$0xff]  }
  0xa2   :  { %619 = vmatmul.mubr.bf16.gmra.mrb[8].mxu0 %v4475_v40  ;;  %692 = vmatmul.mubr.bf16.gmra.mrb[8].mxu1 %v4475_v40 }
  0xa3   :  { %721 = vmatpush1.bf16.msra.mxu0 %v3428_v47  ;;  %794 = vmatpush1.bf16.msra.mxu1 %v3430_v48  ;;  %v4624_v47 = vld [vmem:[#allocation11 + $0x44] ss:$16 sps:$4 sm:$0xff]   ;;  %v4627_v48 = vld [vmem:[#allocation11 + $0x4c] ss:$16 sps:$4 sm:$0xff]  }
  0xa4   :  { %722 = vmatprep.subr.bf16.mxu0 %v3437_v49  ;;  %795 = vmatprep.subr.bf16.mxu1 %v3439_v51  ;;  %v4632_v49 = vld [vmem:[#allocation11 + $0x40] ss:$16 sps:$4 sm:$0xff]   ;;  %v4638_v51 = vld [vmem:[#allocation11 + $0x64] ss:$16 sps:$4 sm:$0xff]  }
  0xa5   :  { %628 = vmatprep.mubr.bf16.mxu0 %v5602_v0  ;;  %701 = vmatprep.mubr.bf16.mxu1 %v5602_v0 }
  0xa7   :  { %723 = vmatpush1.bf16.msra.mxu0 %v3436_v55  ;;  %796 = vmatpush1.bf16.msra.mxu1 %v3438_v56  ;;  %v4650_v55 = vld [vmem:[#allocation11 + $0x84] ss:$16 sps:$4 sm:$0xff]   ;;  %v4653_v56 = vld [vmem:[#allocation11 + $0x8c] ss:$16 sps:$4 sm:$0xff]  }
  0xa8   :  { %724 = vmatprep.subr.bf16.mxu0 %v3445_v58  ;;  %797 = vmatprep.subr.bf16.mxu1 %v3447_v60  ;;  %v4660_v58 = vld [vmem:[#allocation11 + $0x88] ss:$16 sps:$4 sm:$0xff]   ;;  %v4665_v60 = vld [vmem:[#allocation11 + $0xac] ss:$16 sps:$4 sm:$0xff]  }
  0xaa   :  { %629 = vmatmul.mubr.bf16.gmra.mrb[12].mxu0 %v4481_v57  ;;  %702 = vmatmul.mubr.bf16.gmra.mrb[12].mxu1 %v4481_v57 }
  0xab   :  { %725 = vmatpush1.bf16.msra.mxu0 %v3444_v1  ;;  %798 = vmatpush1.bf16.msra.mxu1 %v3446_v2  ;;  %v4677_v1 = vld [vmem:[#allocation11 + $0xcc] ss:$16 sps:$4 sm:$0xff]   ;;  %v4680_v2 = vld [vmem:[#allocation11 + $0xc0] ss:$16 sps:$4 sm:$0xff]  }
  0xac   :  { %726 = vmatprep.subr.bf16.mxu0 %v3453_v3  ;;  %799 = vmatprep.subr.bf16.mxu1 %v3455_v4  ;;  %5725 = vst [vmem:[#allocation52_spill] sm:$0xff] %v4677_v1  ;;  %v4684_v3 = vld [vmem:[#allocation11 + $0xc8] ss:$16 sps:$4 sm:$0xff]   ;;  %v4686_v4 = vld [vmem:[#allocation11 + $0xe4] ss:$16 sps:$4 sm:$0xff]  }
  0xad   :  { %744 = vmatprep.mubr.bf16.mxu0 %v5602_v0  ;;  %817 = vmatprep.mubr.bf16.mxu1 %v5602_v0 }
  0xaf   :  { %727 = vmatpush1.bf16.msra.mxu0 %v3452_v5  ;;  %800 = vmatpush1.bf16.msra.mxu1 %v3454_v7  ;;  %v4689_v5 = vld [vmem:[#allocation11 + $0xec] ss:$16 sps:$4 sm:$0xff]   ;;  %v4692_v7 = vld [vmem:[#allocation11 + $0xe0] ss:$16 sps:$4 sm:$0xff]  }
  0xb0   :  { %1163 = vmatprep.subr.bf16.mxu0 %v4487_v8  ;;  %1204 = vmatprep.subr.bf16.mxu1 %v4490_v9 }
  0xb2   :  { %745 = vmatmul.mubr.bf16.vlgmr.msra.gmra.mrb[16].mxu0 %v4465_v6  ;;  %818 = vmatmul.mubr.bf16.vlgmr.msra.gmra.mrb[16].mxu1 %v4465_v6  ;;  %v4526_v6 = vld [vmem:[#allocation9 + $0x6c] ss:$16 sps:$4 sm:$0xff]  }
  0xb3   :  { %1164 = vmatpush1.bf16.msra.mxu0 %v4493_v10  ;;  %1205 = vmatpush1.bf16.msra.mxu1 %v4495_v11  ;;  %5704 = vst [vmem:[#allocation31_spill] sm:$0xff] %v4526_v6 }
  0xb4   :  { %1165 = vmatprep.subr.bf16.mxu0 %v4498_v12  ;;  %1206 = vmatprep.subr.bf16.mxu1 %v4501_v13 }
  0xb5   :  { %754 = vmatprep.mubr.bf16.mxu0 %v5602_v0  ;;  %827 = vmatprep.mubr.bf16.mxu1 %v5602_v0 }
  0xb7   :  { %1166 = vmatpush1.bf16.msra.mxu0 %v4504_v14  ;;  %1207 = vmatpush1.bf16.msra.mxu1 %v4506_v15 }
  0xb8   :  { %1167 = vmatprep.subr.bf16.mxu0 %v4508_v16  ;;  %1208 = vmatprep.subr.bf16.mxu1 %v4512_v17 }
  0xba   :  { %755 = vmatmul.mubr.bf16.gmra.mrb[20].mxu0 %v4469_v23  ;;  %828 = vmatmul.mubr.bf16.gmra.mrb[20].mxu1 %v4469_v23  ;;  %v4552_v23 = vld [vmem:[#allocation9 + $0x88] ss:$16 sps:$4 sm:$0xff]  }
  0xbb   :  { %1168 = vmatpush1.bf16.msra.mxu0 %v4518_v18  ;;  %1209 = vmatpush1.bf16.msra.mxu1 %v4521_v19  ;;  %5710 = vst [vmem:[#allocation37_spill] sm:$0xff] %v4552_v23 }
  0xbc   :  { %1169 = vmatprep.subr.bf16.mxu0 %v4523_v20  ;;  %1210 = vmatprep.subr.bf16.mxu1 %v4526_v6 }
  0xbd   :  { %764 = vmatprep.mubr.bf16.mxu0 %v5602_v0  ;;  %837 = vmatprep.mubr.bf16.mxu1 %v5602_v0 }
  0xbf   :  { %1170 = vmatpush1.bf16.msra.mxu0 %v4531_v21  ;;  %1211 = vmatpush1.bf16.msra.mxu1 %v4534_v22 }
  0xc0   :  { %1171 = vmatprep.subr.bf16.mxu0 %v4536_v24  ;;  %1212 = vmatprep.subr.bf16.mxu1 %v4540_v25 }
  0xc2   :  { %765 = vmatmul.mubr.bf16.gmra.mrb[24].mxu0 %v4475_v40  ;;  %838 = vmatmul.mubr.bf16.gmra.mrb[24].mxu1 %v4475_v40  ;;  %v4600_v40 = vld [vmem:[#allocation11 + $0xc] ss:$16 sps:$4 sm:$0xff]  }
  0xc3   :  { %1172 = vmatpush1.bf16.msra.mxu0 %v4548_v26  ;;  %1213 = vmatpush1.bf16.msra.mxu1 %v4552_v23  ;;  %5724 = vst [vmem:[#allocation51_spill] sm:$0xff] %v4600_v40 }
  0xc4   :  { %1173 = vmatprep.subr.bf16.mxu0 %v4554_v27  ;;  %1214 = vmatprep.subr.bf16.mxu1 %v4557_v28 }
  0xc5   :  { %774 = vmatprep.mubr.bf16.mxu0 %v5602_v0  ;;  %847 = vmatprep.mubr.bf16.mxu1 %v5602_v0 }
  0xc7   :  { %1174 = vmatpush1.bf16.msra.mxu0 %v4562_v29  ;;  %1215 = vmatpush1.bf16.msra.mxu1 %v4566_v30 }
  0xc8   :  { %1175 = vmatprep.subr.bf16.mxu0 %v4568_v31  ;;  %1216 = vmatprep.subr.bf16.mxu1 %v4572_v32 }
  0xca   :  { %775 = vmatmul.mubr.bf16.gmra.mrb[28].mxu0 %v4481_v57  ;;  %848 = vmatmul.mubr.bf16.gmra.mrb[28].mxu1 %v4481_v57  ;;  %v4656_v57 = vld [vmem:[#allocation11 + $0x80] ss:$16 sps:$4 sm:$0xff]  }
  0xcb   :  { %1176 = vmatpush1.bf16.msra.mxu0 %v4576_v33  ;;  %1217 = vmatpush1.bf16.msra.mxu1 %v4580_v34 }
  0xcc   :  { %1177 = vmatprep.subr.bf16.mxu0 %v4582_v35  ;;  %1218 = vmatprep.subr.bf16.mxu1 %v4585_v36 }
  0xcd   :  { %1195 = vmatprep.mubr.bf16.mxu0 %v5602_v0  ;;  %1236 = vmatprep.mubr.bf16.mxu1 %v5602_v0 }
  0xcf   :  { %1178 = vmatpush1.bf16.msra.mxu0 %v4590_v37  ;;  %1219 = vmatpush1.bf16.msra.mxu1 %v4594_v38 }
  0xd0   :  { %1409 = vmatprep.subr.bf16.mxu0 %v4596_v39  ;;  %1450 = vmatprep.subr.bf16.mxu1 %v4600_v40 }
  0xd2   :  { %1196 = vmatmul.mubr.bf16.vlgmr.msra.gmra.mrb[32].mxu0 %v5602_v0  ;;  %1237 = vmatmul.mubr.bf16.vlgmr.msra.gmra.mrb[32].mxu1 %v5602_v0 }
  0xd3   :  { %1410 = vmatpush1.bf16.msra.mxu0 %v4604_v41  ;;  %1451 = vmatpush1.bf16.msra.mxu1 %v4608_v42 }
  0xd4   :  { %1411 = vmatprep.subr.bf16.mxu0 %v4610_v43  ;;  %1452 = vmatprep.subr.bf16.mxu1 %v4613_v44 }
  0xd5   :  { %1441 = vmatprep.mubr.bf16.mxu0 %v5602_v0  ;;  %1482 = vmatprep.mubr.bf16.mxu1 %v5602_v0  ;;  %v4696_v0 = vld [vmem:[#allocation11 + $0xe8] ss:$16 sps:$4 sm:$0xff]  }
  0xd7   :  { %1412 = vmatpush1.bf16.msra.mxu0 %v4618_v45  ;;  %1453 = vmatpush1.bf16.msra.mxu1 %v4622_v46 }
  0xd8   :  { %1413 = vmatprep.subr.bf16.mxu0 %v4624_v47  ;;  %1454 = vmatprep.subr.bf16.mxu1 %v4627_v48 }
  0xdb   :  { %1414 = vmatpush1.bf16.msra.mxu0 %v4632_v49  ;;  %1455 = vmatpush1.bf16.msra.mxu1 %v4636_v50 }
  0xdc   :  { %1415 = vmatprep.subr.bf16.mxu0 %v4638_v51  ;;  %1456 = vmatprep.subr.bf16.mxu1 %v4641_v52 }
  0xdf   :  { %1416 = vmatpush1.bf16.msra.mxu0 %v4644_v53  ;;  %1457 = vmatpush1.bf16.msra.mxu1 %v4648_v54 }
  0xe0   :  { %1417 = vmatprep.subr.bf16.mxu0 %v4650_v55  ;;  %1458 = vmatprep.subr.bf16.mxu1 %v4653_v56 }
  0xe3   :  { %1418 = vmatpush1.bf16.msra.mxu0 %v4656_v57  ;;  %1459 = vmatpush1.bf16.msra.mxu1 %v4660_v58 }
  0xe4   :  { %1419 = vmatprep.subr.bf16.mxu0 %v4662_v59  ;;  %1460 = vmatprep.subr.bf16.mxu1 %v4665_v60 }
  0xe7   :  { %1420 = vmatpush1.bf16.msra.mxu0 %v4668_v61  ;;  %1461 = vmatpush1.bf16.msra.mxu1 %v4672_v62 }
  0xe8   :  { %1421 = vmatprep.subr.bf16.mxu0 %v4674_v63  ;;  %1462 = vmatprep.subr.bf16.mxu1 %v4677_v1  ;;  %v5726_v1 = vmov 0  }
  0xeb   :  { %1422 = vmatpush1.bf16.msra.mxu0 %v4680_v2  ;;  %1463 = vmatpush1.bf16.msra.mxu1 %v4684_v3 }
  0xec   :  { %1423 = vmatprep.subr.bf16.mxu0 %v4686_v4  ;;  %1464 = vmatprep.subr.bf16.mxu1 %v4689_v5 }
  0xef   :  { %1424 = vmatpush1.bf16.msra.mxu0 %v4692_v7  ;;  %1465 = vmatpush1.bf16.msra.mxu1 %v4696_v0 }
  0xf0   :  { %1562 = vmatprep.subr.bf16.mxu0 %v4487_v8  ;;  %1603 = vmatprep.subr.bf16.mxu1 %v4490_v9 }
  0xf2   :  { %1442 = vmatmul.mubr.bf16.vlgmr.msra.gmra.mrb[36].mxu0 %v5726_v1  ;;  %1483 = vmatmul.mubr.bf16.vlgmr.msra.gmra.mrb[36].mxu1 %v5726_v1 }
  0xf3   :  { %1563 = vmatpush1.bf16.msra.mxu0 %v4493_v10  ;;  %1604 = vmatpush1.bf16.msra.mxu1 %v4495_v11 }
  0xf4   :  { %1564 = vmatprep.subr.bf16.mxu0 %v4498_v12  ;;  %1605 = vmatprep.subr.bf16.mxu1 %v4501_v13 }
  0xf5   :  { %1594 = vmatprep.mubr.bf16.mxu0 %v5726_v1  ;;  %1635 = vmatprep.mubr.bf16.mxu1 %v5726_v1 }
  0xf7   :  { %1565 = vmatpush1.bf16.msra.mxu0 %v4504_v14  ;;  %1606 = vmatpush1.bf16.msra.mxu1 %v4506_v15 }
  0xf8   :  { %1566 = vmatprep.subr.bf16.mxu0 %v4508_v16  ;;  %1607 = vmatprep.subr.bf16.mxu1 %v4512_v17 }
  0xfb   :  { %1567 = vmatpush1.bf16.msra.mxu0 %v4518_v18  ;;  %1608 = vmatpush1.bf16.msra.mxu1 %v4521_v19 }
  0xfc   :  { %1568 = vmatprep.subr.bf16.mxu0 %v4523_v20  ;;  %1609 = vmatprep.subr.bf16.mxu1 %v4526_v6 }
  0xff   :  { %1569 = vmatpush1.bf16.msra.mxu0 %v4531_v21  ;;  %1610 = vmatpush1.bf16.msra.mxu1 %v4534_v22 }
 0x100   :  { %1570 = vmatprep.subr.bf16.mxu0 %v4536_v24  ;;  %1611 = vmatprep.subr.bf16.mxu1 %v4540_v25 }
 0x103   :  { %1571 = vmatpush1.bf16.msra.mxu0 %v4548_v26  ;;  %1612 = vmatpush1.bf16.msra.mxu1 %v4552_v23 }
 0x104   :  { %1572 = vmatprep.subr.bf16.mxu0 %v4554_v27  ;;  %1613 = vmatprep.subr.bf16.mxu1 %v4557_v28 }
 0x107   :  { %1573 = vmatpush1.bf16.msra.mxu0 %v4562_v29  ;;  %1614 = vmatpush1.bf16.msra.mxu1 %v4566_v30  ;;  %v182_v30 = vlaneseq }
 0x108   :  { %1574 = vmatprep.subr.bf16.mxu0 %v4568_v31  ;;  %1615 = vmatprep.subr.bf16.mxu1 %v4572_v32 }
 0x109   :  { %v4739_v31 = vshrl.u32 %v182_v30, 7 }
 0x10b   :  { %1575 = vmatpush1.bf16.msra.mxu0 %v4576_v33  ;;  %1616 = vmatpush1.bf16.msra.mxu1 %v4580_v34  ;;  %v184_v32 = vsub.s32 0, %v4739_v31  ;;  %v4742_v33 = vld [vmem:[#allocation8] sm:$0xff]  ;;  %v192_v34 = vsub.s32 2, %v4739_v31 }
 0x10c   :  { %1576 = vmatprep.subr.bf16.mxu0 %v4582_v35  ;;  %1617 = vmatprep.subr.bf16.mxu1 %v4585_v36  ;;  %v196_v35 = vsub.s32 3, %v4739_v31  ;;  %v188_v36 = vsub.s32 1, %v4739_v31 }
 0x10e   :  { %v4760_v29 = vrot.slane %v4742_v33, %v196_v35  ;;  %v4763_v28 = vrot.slane %v4742_v33, %v188_v36 }
 0x10f   :  { %1577 = vmatpush1.bf16.msra.mxu0 %v4590_v37  ;;  %1618 = vmatpush1.bf16.msra.mxu1 %v4594_v38  ;;  %v4748_v37 = vrot.slane %v4742_v33, %v184_v32 }
 0x110   :  { %1649 = vmatprep.subr.bf16.mxu0 %v4596_v39  ;;  %1690 = vmatprep.subr.bf16.mxu1 %v4600_v40  ;;  %v4753_v40 = vrot.slane %v4742_v33, %v192_v34 }
 0x165   :  { %v4750_v38 = vpop.f32.mrb[0].mxu0  ;;  %v4757_v39 = vpop.f32.mrb[0].mxu1 }
 0x166   :  { %v4755_v30 = vpop.f32.mrb[1].mxu0  ;;  %v4765_v23 = vpop.f32.mrb[1].mxu1 }
 0x167   :  { %v604_v27 = vpop.f32.mrb[2].mxu0  ;;  %v677_v25 = vpop.f32.mrb[2].mxu1 }
 0x168   :  { %v4768_v32 = vadd.f32 %v604_v27, %v4748_v37  ;;  %v606_v26 = vpop.f32.mrb[3].mxu0  ;;  %v4774_v24 = vadd.f32 %v677_v25, %v4753_v40  ;;  %v679_v22 = vpop.f32.mrb[3].mxu1 }
 0x169   :  { %v4771_v34 = vadd.f32 %v606_v26, %v4763_v28  ;;  %v4777_v35 = vadd.f32 %v679_v22, %v4760_v29 }
 0x16a   :  { %5727 = vst [vmem:[#allocation53_spill] sm:$0xff] %v4768_v32  ;;  %5729 = vst [vmem:[#allocation55_spill] sm:$0xff] %v4774_v24 }
 0x16b   :  { %5728 = vst [vmem:[#allocation54_spill] sm:$0xff] %v4771_v34  ;;  %5730 = vst [vmem:[#allocation56_spill] sm:$0xff] %v4777_v35 }
 0x16d   :  { %v610_v36 = vpop.f32.mrb[4].mxu0  ;;  %v683_v20 = vpop.f32.mrb[4].mxu1 }
 0x16e   :  { %v4780_v21 = vadd.f32 %v610_v36, %v4748_v37  ;;  %v612_v6 = vpop.f32.mrb[5].mxu0  ;;  %v4786_v26 = vadd.f32 %v683_v20, %v4753_v40  ;;  %v685_v34 = vpop.f32.mrb[5].mxu1 }
 0x16f   :  { %v4783_v27 = vadd.f32 %v612_v6, %v4763_v28  ;;  %v614_v32 = vpop.f32.mrb[6].mxu0  ;;  %v4792_v22 = vadd.f32 %v685_v34, %v4760_v29  ;;  %v687_v35 = vpop.f32.mrb[6].mxu1 }
 0x170   :  { %5731 = vst [vmem:[#allocation57_spill] sm:$0xff] %v4780_v21  ;;  %5733 = vst [vmem:[#allocation59_spill] sm:$0xff] %v4786_v26  ;;  %v4789_v25 = vadd.f32 %v614_v32, %v4748_v37  ;;  %v616_v24 = vpop.f32.mrb[7].mxu0  ;;  %v4798_v21 = vadd.f32 %v687_v35, %v4753_v40  ;;  %v689_v6 = vpop.f32.mrb[7].mxu1 }
 0x171   :  { %5732 = vst [vmem:[#allocation58_spill] sm:$0xff] %v4783_v27  ;;  %5735 = vst [vmem:[#allocation61_spill] sm:$0xff] %v4792_v22  ;;  %v4795_v36 = vadd.f32 %v616_v24, %v4763_v28  ;;  %v4801_v27 = vadd.f32 %v689_v6, %v4760_v29 }
 0x172   :  { %5734 = vst [vmem:[#allocation60_spill] sm:$0xff] %v4789_v25  ;;  %5737 = vst [vmem:[#allocation63_spill] sm:$0xff] %v4798_v21 }
 0x173   :  { %5736 = vst [vmem:[#allocation62_spill] sm:$0xff] %v4795_v36  ;;  %5738 = vst [vmem:[#allocation64_spill] sm:$0xff] %v4801_v27 }
 0x175   :  { %v620_v20 = vpop.f32.mrb[8].mxu0  ;;  %v693_v25 = vpop.f32.mrb[8].mxu1 }
 0x176   :  { %v4804_v26 = vadd.f32 %v620_v20, %v4748_v37  ;;  %v622_v32 = vpop.f32.mrb[9].mxu0  ;;  %v4810_v24 = vadd.f32 %v693_v25, %v4753_v40  ;;  %v695_v36 = vpop.f32.mrb[9].mxu1 }
 0x177   :  { %v4807_v34 = vadd.f32 %v622_v32, %v4763_v28  ;;  %v624_v22 = vpop.f32.mrb[10].mxu0  ;;  %v4816_v6 = vadd.f32 %v695_v36, %v4760_v29  ;;  %v697_v27 = vpop.f32.mrb[10].mxu1 }
 0x178   :  { %5739 = vst [vmem:[#allocation65_spill] sm:$0xff] %v4804_v26  ;;  %5741 = vst [vmem:[#allocation67_spill] sm:$0xff] %v4810_v24  ;;  %v4813_v35 = vadd.f32 %v624_v22, %v4748_v37  ;;  %v626_v21 = vpop.f32.mrb[11].mxu0  ;;  %v4822_v26 = vadd.f32 %v697_v27, %v4753_v40  ;;  %v699_v32 = vpop.f32.mrb[11].mxu1 }
 0x179   :  { %5740 = vst [vmem:[#allocation66_spill] sm:$0xff] %v4807_v34  ;;  %5743 = vst [vmem:[#allocation69_spill] sm:$0xff] %v4816_v6  ;;  %v4819_v20 = vadd.f32 %v626_v21, %v4763_v28  ;;  %v4825_v34 = vadd.f32 %v699_v32, %v4760_v29  ;;  %v208_v32 = vsub.s32 6, %v4739_v31 }
 0x17a   :  { %5742 = vst [vmem:[#allocation68_spill] sm:$0xff] %v4813_v35  ;;  %5745 = vst [vmem:[#allocation71_spill] sm:$0xff] %v4822_v26  ;;  %v200_v35 = vsub.s32 4, %v4739_v31 }
 0x17b   :  { %5744 = vst [vmem:[#allocation70_spill] sm:$0xff] %v4819_v20  ;;  %5746 = vst [vmem:[#allocation72_spill] sm:$0xff] %v4825_v34  ;;  %v204_v20 = vsub.s32 5, %v4739_v31 }
 0x17d   :  { %v630_v25 = vpop.f32.mrb[12].mxu0  ;;  %v703_v36 = vpop.f32.mrb[12].mxu1 }
 0x17e   :  { %v4828_v24 = vadd.f32 %v630_v25, %v4748_v37  ;;  %v632_v22 = vpop.f32.mrb[13].mxu0  ;;  %v4836_v27 = vadd.f32 %v703_v36, %v4753_v40  ;;  %v705_v26 = vpop.f32.mrb[13].mxu1 }
 0x17f   :  { %v4832_v6 = vadd.f32 %v632_v22, %v4763_v28  ;;  %v634_v21 = vpop.f32.mrb[14].mxu0  ;;  %v707_v19 = vpop.f32.mrb[14].mxu1  ;;  %v212_v22 = vsub.s32 7, %v4739_v31 }
 0x180   :  { %5747 = vst [vmem:[#allocation73_spill] sm:$0xff] %v4828_v24  ;;  %5749 = vst [vmem:[#allocation75_spill] sm:$0xff] %v4836_v27  ;;  %v4840_v34 = vadd.f32 %v634_v21, %v4748_v37  ;;  %v636_v25 = vpop.f32.mrb[15].mxu0  ;;  %v4843_v24 = vadd.f32 %v705_v26, %v4760_v29  ;;  %v4850_v18 = vadd.f32 %v707_v19, %v4753_v40  ;;  %v709_v36 = vpop.f32.mrb[15].mxu1 }
 0x181   :  { %5748 = vst [vmem:[#allocation74_spill] sm:$0xff] %v4832_v6  ;;  %v4847_v6 = vadd.f32 %v636_v25, %v4763_v28  ;;  %v4853_v27 = vrot.slane %v4742_v33, %v200_v35  ;;  %v4856_v21 = vadd.f32 %v709_v36, %v4760_v29  ;;  %v4862_v26 = vrot.slane %v4742_v33, %v208_v32 }
 0x182   :  { %5750 = vst [vmem:[#allocation76_spill] sm:$0xff] %v4840_v34  ;;  %5751 = vst [vmem:[#allocation77_spill] sm:$0xff] %v4843_v24  ;;  %v4859_v34 = vrot.slane %v4742_v33, %v204_v20  ;;  %v4865_v31 = vrot.slane %v4742_v33, %v212_v22 }
 0x183   :  { %5752 = vst [vmem:[#allocation78_spill] sm:$0xff] %v4847_v6  ;;  %5753 = vst [vmem:[#allocation79_spill] sm:$0xff] %v4850_v18 }
 0x184   :  { %5754 = vst [vmem:[#allocation80_spill] sm:$0xff] %v4856_v21 }
 0x185   :  { %v746_v25 = vpop.f32.mrb[16].mxu0  ;;  %v819_v18 = vpop.f32.mrb[16].mxu1 }
 0x186   :  { %v4868_v19 = vadd.f32 %v746_v25, %v4853_v27  ;;  %v748_v6 = vpop.f32.mrb[17].mxu0  ;;  %v4874_v21 = vadd.f32 %v819_v18, %v4862_v26  ;;  %v821_v20 = vpop.f32.mrb[17].mxu1 }
 0x187   :  { %v4871_v35 = vadd.f32 %v748_v6, %v4859_v34  ;;  %v750_v36 = vpop.f32.mrb[18].mxu0  ;;  %v4880_v33 = vadd.f32 %v821_v20, %v4865_v31  ;;  %v823_v22 = vpop.f32.mrb[18].mxu1 }
 0x188   :  { %5755 = vst [vmem:[#allocation81_spill] sm:$0xff] %v4868_v19  ;;  %5757 = vst [vmem:[#allocation83_spill] sm:$0xff] %v4874_v21  ;;  %v4877_v32 = vadd.f32 %v750_v36, %v4853_v27  ;;  %v752_v24 = vpop.f32.mrb[19].mxu0  ;;  %v4886_v19 = vadd.f32 %v823_v22, %v4862_v26  ;;  %v825_v6 = vpop.f32.mrb[19].mxu1 }
 0x189   :  { %5756 = vst [vmem:[#allocation82_spill] sm:$0xff] %v4871_v35  ;;  %5759 = vst [vmem:[#allocation85_spill] sm:$0xff] %v4880_v33  ;;  %v4883_v25 = vadd.f32 %v752_v24, %v4859_v34  ;;  %v4889_v35 = vadd.f32 %v825_v6, %v4865_v31 }
 0x18a   :  { %5758 = vst [vmem:[#allocation84_spill] sm:$0xff] %v4877_v32  ;;  %5761 = vst [vmem:[#allocation87_spill] sm:$0xff] %v4886_v19 }
 0x18b   :  { %5760 = vst [vmem:[#allocation86_spill] sm:$0xff] %v4883_v25  ;;  %5762 = vst [vmem:[#allocation88_spill] sm:$0xff] %v4889_v35 }
 0x18d   :  { %v756_v18 = vpop.f32.mrb[20].mxu0  ;;  %v829_v32 = vpop.f32.mrb[20].mxu1 }
 0x18e   :  { %v4892_v21 = vadd.f32 %v756_v18, %v4853_v27  ;;  %v758_v36 = vpop.f32.mrb[21].mxu0  ;;  %v4898_v24 = vadd.f32 %v829_v32, %v4862_v26  ;;  %v831_v25 = vpop.f32.mrb[21].mxu1 }
 0x18f   :  { %v4895_v20 = vadd.f32 %v758_v36, %v4859_v34  ;;  %v760_v33 = vpop.f32.mrb[22].mxu0  ;;  %v4904_v6 = vadd.f32 %v831_v25, %v4865_v31  ;;  %v833_v35 = vpop.f32.mrb[22].mxu1 }
 0x190   :  { %5763 = vst [vmem:[#allocation89_spill] sm:$0xff] %v4892_v21  ;;  %5765 = vst [vmem:[#allocation91_spill] sm:$0xff] %v4898_v24  ;;  %v4901_v22 = vadd.f32 %v760_v33, %v4853_v27  ;;  %v762_v19 = vpop.f32.mrb[23].mxu0  ;;  %v4910_v21 = vadd.f32 %v833_v35, %v4862_v26  ;;  %v835_v36 = vpop.f32.mrb[23].mxu1 }
 0x191   :  { %5764 = vst [vmem:[#allocation90_spill] sm:$0xff] %v4895_v20  ;;  %5767 = vst [vmem:[#allocation93_spill] sm:$0xff] %v4904_v6  ;;  %v4907_v18 = vadd.f32 %v762_v19, %v4859_v34  ;;  %v4913_v20 = vadd.f32 %v835_v36, %v4865_v31 }
 0x192   :  { %5766 = vst [vmem:[#allocation92_spill] sm:$0xff] %v4901_v22  ;;  %5769 = vst [vmem:[#allocation95_spill] sm:$0xff] %v4910_v21 }
 0x193   :  { %5768 = vst [vmem:[#allocation94_spill] sm:$0xff] %v4907_v18  ;;  %5770 = vst [vmem:[#allocation96_spill] sm:$0xff] %v4913_v20 }
 0x195   :  { %v766_v32 = vpop.f32.mrb[24].mxu0  ;;  %v839_v22 = vpop.f32.mrb[24].mxu1 }
 0x196   :  { %v4916_v24 = vadd.f32 %v766_v32, %v4853_v27  ;;  %v768_v33 = vpop.f32.mrb[25].mxu0  ;;  %v4922_v19 = vadd.f32 %v839_v22, %v4862_v26  ;;  %v841_v18 = vpop.f32.mrb[25].mxu1 }
 0x197   :  { %v4919_v25 = vadd.f32 %v768_v33, %v4859_v34  ;;  %v770_v6 = vpop.f32.mrb[26].mxu0  ;;  %v4928_v36 = vadd.f32 %v841_v18, %v4865_v31  ;;  %v843_v20 = vpop.f32.mrb[26].mxu1 }
 0x198   :  { %5771 = vst [vmem:[#allocation97_spill] sm:$0xff] %v4916_v24  ;;  %5773 = vst [vmem:[#allocation99_spill] sm:$0xff] %v4922_v19  ;;  %v4925_v35 = vadd.f32 %v770_v6, %v4853_v27  ;;  %v772_v21 = vpop.f32.mrb[27].mxu0  ;;  %v4934_v24 = vadd.f32 %v843_v20, %v4862_v26  ;;  %v845_v33 = vpop.f32.mrb[27].mxu1 }
 0x199   :  { %5772 = vst [vmem:[#allocation98_spill] sm:$0xff] %v4919_v25  ;;  %5775 = vst [vmem:[#allocation101_spill] sm:$0xff] %v4928_v36  ;;  %v4931_v32 = vadd.f32 %v772_v21, %v4859_v34  ;;  %v4937_v25 = vadd.f32 %v845_v33, %v4865_v31 }
 0x19a   :  { %5774 = vst [vmem:[#allocation100_spill] sm:$0xff] %v4925_v35  ;;  %5777 = vst [vmem:[#allocation103_spill] sm:$0xff] %v4934_v24 }
 0x19b   :  { %5776 = vst [vmem:[#allocation102_spill] sm:$0xff] %v4931_v32  ;;  %5778 = vst [vmem:[#allocation104_spill] sm:$0xff] %v4937_v25 }
 0x19d   :  { %v776_v22 = vpop.f32.mrb[28].mxu0  ;;  %v849_v35 = vpop.f32.mrb[28].mxu1 }
 0x19e   :  { %v4940_v19 = vadd.f32 %v776_v22, %v4853_v27  ;;  %v778_v6 = vpop.f32.mrb[29].mxu0  ;;  %v4946_v21 = vadd.f32 %v849_v35, %v4862_v26  ;;  %v851_v32 = vpop.f32.mrb[29].mxu1  ;;  %v601_v22 = vadd.f32 %v4750_v38, %v4748_v37  ;;  %v676_v35 = vadd.f32 %v4765_v23, %v4760_v29 }
 0x19f   :  { %v4943_v18 = vadd.f32 %v778_v6, %v4859_v34  ;;  %v780_v36 = vpop.f32.mrb[30].mxu0  ;;  %v4949_v24 = vadd.f32 %v851_v32, %v4865_v31  ;;  %v853_v33 = vpop.f32.mrb[30].mxu1  ;;  %v674_v6 = vadd.f32 %v4757_v39, %v4753_v40 }
 0x1a0   :  { %5779 = vst [vmem:[#allocation105_spill] sm:$0xff] %v4940_v19  ;;  %5781 = vst [vmem:[#allocation107_spill] sm:$0xff] %v4946_v21  ;;  %v782_v20 = vpop.f32.mrb[31].mxu0  ;;  %v855_v25 = vpop.f32.mrb[31].mxu1  ;;  %v603_v19 = vadd.f32 %v4755_v30, %v4763_v28 }
 0x1a1   :  { %5780 = vst [vmem:[#allocation106_spill] sm:$0xff] %v4943_v18  ;;  %5782 = vst [vmem:[#allocation108_spill] sm:$0xff] %v4949_v24 }
 0x1a5   :  { %v1197_v18 = vpop.f32.mrb[32].mxu0  ;;  %v1238_v17 = vpop.f32.mrb[32].mxu1 }
 0x1a6   :  { %v1245_v21 = vadd.f32 %v1197_v18, %v601_v22  ;;  %v1199_v16 = vpop.f32.mrb[33].mxu0  ;;  %v1247_v32 = vadd.f32 %v1238_v17, %v674_v6  ;;  %v1240_v15 = vpop.f32.mrb[33].mxu1  ;;  %v856_v22 = vadd.f32 %v855_v25, %v4865_v31 }
 0x1a7   :  { %v1246_v24 = vadd.f32 %v1199_v16, %v603_v19  ;;  %v1201_v14 = vpop.f32.mrb[34].mxu0  ;;  %v1248_v12 = vadd.f32 %v1240_v15, %v676_v35  ;;  %v1242_v38 = vpop.f32.mrb[34].mxu1 }
 0x1a8   :  { %v3520_v13 = vmul.f32 -1.442695, %v1245_v21  ;;  %v1202_v37 = vpop.f32.mrb[35].mxu0  ;;  %v1243_v28 = vpop.f32.mrb[35].mxu1 }
 0x1a9   :  { %v3521_v11 = vmul.f32 -1.442695, %v1246_v24  ;;  %v3522_v39 = vmul.f32 -1.442695, %v1248_v12  ;;  %v781_v24 = vadd.f32 %v780_v36, %v4853_v27  ;;  %v854_v12 = vadd.f32 %v853_v33, %v4862_v26 }
 0x1aa   :  { %3775 = vpow2.f32 %v3520_v13 }
 0x1ab   :  { %3777 = vpow2.f32 %v3521_v11  ;;  %v783_v11 = vadd.f32 %v782_v20, %v4859_v34 }
 0x1ac   :  { %3779 = vpow2.f32 %v3522_v39 }
 0x1ad   :  { %3781 = vtanh.f32 %v1247_v32 }
 0x1b4   :  { %v3776_v40 = vpop.eup %3775 }
 0x1b5   :  { %v3778_v30 = vpop.eup %3777  ;;  %v1498_v10 = vadd.f32 1.0, %v3776_v40 }
 0x1b6   :  { %v1504_v23 = vadd.f32 1.0, %v3778_v30  ;;  %v3780_v16 = vpop.eup %3779 }
 0x1b7   :  { %3783 = vrcp.f32 %v1498_v10  ;;  %v3782_v17 = vpop.eup %3781  ;;  %v1511_v19 = vadd.f32 1.0, %v3780_v16 }
 0x1b8   :  { %3785 = vrcp.f32 %v1504_v23 }
 0x1b9   :  { %3787 = vrcp.f32 %v1511_v19 }
 0x1c1   :  { %v3784_v14 = vpop.eup %3783 }
 0x1c2   :  { %v3786_v29 = vpop.eup %3785  ;;  %v1515_v15 = vmul.f32 %v3784_v14, %v3782_v17 }
 0x1c3   :  { %v1514_v18 = vmul.f32 0.0, %v3786_v29  ;;  %v3788_v39 = vpop.eup %3787 }
 0x1c5   :  { %v4962_v13 = vadd.f32 %v1515_v15, %v1514_v18  ;;  %v1443_v21 = vpop.f32.mrb[36].mxu0  ;;  %v1484_v6 = vpop.f32.mrb[36].mxu1 }
 0x1c6   :  { %v1491_v10 = vadd.f32 %v1443_v21, %v781_v24  ;;  %v1445_v35 = vpop.f32.mrb[37].mxu0  ;;  %v1493_v32 = vadd.f32 %v1484_v6, %v854_v12  ;;  %v1486_v38 = vpop.f32.mrb[37].mxu1 }
 0x1c7   :  { %3789 = vtanh.f32 %v4962_v13  ;;  %v1492_v37 = vadd.f32 %v1445_v35, %v783_v11  ;;  %v1447_v28 = vpop.f32.mrb[38].mxu0  ;;  %v1494_v36 = vadd.f32 %v1486_v38, %v856_v22  ;;  %v1488_v20 = vpop.f32.mrb[38].mxu1  ;;  %v5783_v22 = vld [vmem:[#allocation52_spill] sm:$0xff]  ;;  %v5785_v38 = vld [vmem:[#allocation21_spill] sm:$0xff] }
 0x1c8   :  { %v3523_v27 = vmul.f32 -1.442695, %v1491_v10  ;;  %v1448_v34 = vpop.f32.mrb[39].mxu0  ;;  %v1489_v33 = vpop.f32.mrb[39].mxu1  ;;  %v5786_v28 = vld [vmem:[#allocation22_spill] sm:$0xff]  ;;  %v5792_v20 = vld [vmem:[#allocation28_spill] sm:$0xff] }
 0x1c9   :  { %v3524_v26 = vmul.f32 -1.442695, %v1492_v37  ;;  %v3525_v25 = vmul.f32 -1.442695, %v1494_v36  ;;  %v5784_v37 = vld [vmem:[#allocation20_spill] sm:$0xff]  ;;  %v5789_v34 = vld [vmem:[#allocation25_spill] sm:$0xff] }
 0x1ca   :  { %3791 = vpow2.f32 %v3523_v27  ;;  %v5787_v27 = vld [vmem:[#allocation23_spill] sm:$0xff]  ;;  %v5788_v36 = vld [vmem:[#allocation24_spill] sm:$0xff]  ;;  %v5794_v33 = vld [vmem:[#allocation30_spill] sm:$0xff] }
 0x1cb   :  { %3793 = vpow2.f32 %v3524_v26  ;;  %v5793_v26 = vld [vmem:[#allocation29_spill] sm:$0xff] }
 0x1cc   :  { %3795 = vpow2.f32 %v3525_v25  ;;  %v5797_v25 = vld [vmem:[#allocation33_spill] sm:$0xff] }
 0x1cd   :  { %3797 = vtanh.f32 %v1493_v32 }
 0x1d1   :  { %v3790_v31 = vpop.eup %3789 }
 0x1d2   :  { %v1518_v40 = vmul.f32 %v3790_v31, %v3788_v39  ;;  %v5795_v39 = vld [vmem:[#allocation31_spill] sm:$0xff]  ;;  %v5796_v31 = vld [vmem:[#allocation32_spill] sm:$0xff] }
 0x1d4   :  { %v3792_v30 = vpop.eup %3791  ;;  %v1561_v23 = vpack.c.bf16 %v1518_v40, %v1518_v40  ;;  %v5798_v40 = vld [vmem:[#allocation34_spill] sm:$0xff] }
 0x1d5   :  { %v3794_v16 = vpop.eup %3793  ;;  %v1522_v17 = vadd.f32 1.0, %v3792_v30  ;;  %v5799_v30 = vld [vmem:[#allocation35_spill] sm:$0xff] }
 0x1d6   :  { %v1528_v14 = vadd.f32 1.0, %v3794_v16  ;;  %1595 = vmatmul.mubr.bf16.vlgmr.msra.gmra.mrb[40].mxu0 %v1561_v23  ;;  %1636 = vmatmul.mubr.bf16.vlgmr.msra.gmra.mrb[40].mxu1 %v1561_v23  ;;  %v3796_v29 = vpop.eup %3795  ;;  %v5800_v23 = vld [vmem:[#allocation36_spill] sm:$0xff]  ;;  %v5801_v16 = vld [vmem:[#allocation37_spill] sm:$0xff] }
 0x1d7   :  { %3799 = vrcp.f32 %v1522_v17  ;;  %1650 = vmatpush1.bf16.msra.mxu0 %v4604_v41  ;;  %1691 = vmatpush1.bf16.msra.mxu1 %v4608_v42  ;;  %v3798_v15 = vpop.eup %3797  ;;  %v1535_v11 = vadd.f32 1.0, %v3796_v29  ;;  %v5802_v17 = vld [vmem:[#allocation38_spill] sm:$0xff]  ;;  %v5804_v29 = vld [vmem:[#allocation40_spill] sm:$0xff] }
 0x1d8   :  { %3801 = vrcp.f32 %v1528_v14  ;;  %1651 = vmatprep.subr.bf16.mxu0 %v4610_v43  ;;  %1692 = vmatprep.subr.bf16.mxu1 %v4613_v44  ;;  %v5803_v14 = vld [vmem:[#allocation39_spill] sm:$0xff] }
 0x1d9   :  { %1681 = vmatprep.mubr.bf16.mxu0 %v5726_v1  ;;  %1722 = vmatprep.mubr.bf16.mxu1 %v5726_v1  ;;  %3803 = vrcp.f32 %v1535_v11  ;;  %v5809_v11 = vld [vmem:[#allocation45_spill] sm:$0xff] }
 0x1db   :  { %1652 = vmatpush1.bf16.msra.mxu0 %v4618_v45  ;;  %1693 = vmatpush1.bf16.msra.mxu1 %v4622_v46 }
 0x1dc   :  { %1653 = vmatprep.subr.bf16.mxu0 %v4624_v47  ;;  %1694 = vmatprep.subr.bf16.mxu1 %v4627_v48 }
 0x1df   :  { %1654 = vmatpush1.bf16.msra.mxu0 %v4632_v49  ;;  %1695 = vmatpush1.bf16.msra.mxu1 %v4636_v50 }
 0x1e0   :  { %1655 = vmatprep.subr.bf16.mxu0 %v4638_v51  ;;  %1696 = vmatprep.subr.bf16.mxu1 %v4641_v52 }
 0x1e1   :  { %v3800_v19 = vpop.eup %3799 }
 0x1e2   :  { %v3802_v18 = vpop.eup %3801  ;;  %v1539_v24 = vmul.f32 %v3800_v19, %v3798_v15  ;;  %v5805_v15 = vld [vmem:[#allocation41_spill] sm:$0xff]  ;;  %v5806_v19 = vld [vmem:[#allocation42_spill] sm:$0xff] }
 0x1e3   :  { %v1538_v12 = vmul.f32 0.0, %v3802_v18  ;;  %1656 = vmatpush1.bf16.msra.mxu0 %v4644_v53  ;;  %1697 = vmatpush1.bf16.msra.mxu1 %v4648_v54  ;;  %v3804_v10 = vpop.eup %3803  ;;  %v5807_v18 = vld [vmem:[#allocation43_spill] sm:$0xff] }
 0x1e4   :  { %1657 = vmatprep.subr.bf16.mxu0 %v4650_v55  ;;  %1698 = vmatprep.subr.bf16.mxu1 %v4653_v56 }
 0x1e5   :  { %v4984_v21 = vadd.f32 %v1539_v24, %v1538_v12  ;;  %v5808_v24 = vld [vmem:[#allocation44_spill] sm:$0xff]  ;;  %v5810_v12 = vld [vmem:[#allocation46_spill] sm:$0xff] }
 0x1e7   :  { %3805 = vtanh.f32 %v4984_v21  ;;  %1658 = vmatpush1.bf16.msra.mxu0 %v4656_v57  ;;  %1699 = vmatpush1.bf16.msra.mxu1 %v4660_v58 }
 0x1e8   :  { %1659 = vmatprep.subr.bf16.mxu0 %v4662_v59  ;;  %1700 = vmatprep.subr.bf16.mxu1 %v4665_v60 }
 0x1eb   :  { %1660 = vmatpush1.bf16.msra.mxu0 %v4668_v61  ;;  %1701 = vmatpush1.bf16.msra.mxu1 %v4672_v62 }
 0x1ec   :  { %1661 = vmatprep.subr.bf16.mxu0 %v4674_v63  ;;  %1702 = vmatprep.subr.bf16.mxu1 %v5783_v22 }
 0x1ef   :  { %1662 = vmatpush1.bf16.msra.mxu0 %v4680_v2  ;;  %1703 = vmatpush1.bf16.msra.mxu1 %v4684_v3 }
 0x1f0   :  { %1663 = vmatprep.subr.bf16.mxu0 %v4686_v4  ;;  %1704 = vmatprep.subr.bf16.mxu1 %v4689_v5 }
 0x1f1   :  { %v3806_v6 = vpop.eup %3805 }
 0x1f2   :  { %v1542_v35 = vmul.f32 %v3806_v6, %v3804_v10  ;;  %v5811_v10 = vld [vmem:[#allocation47_spill] sm:$0xff]  ;;  %v5812_v6 = vld [vmem:[#allocation48_spill] sm:$0xff] }
 0x1f3   :  { %1664 = vmatpush1.bf16.msra.mxu0 %v4692_v7  ;;  %1705 = vmatpush1.bf16.msra.mxu1 %v4696_v0 }
 0x1f4   :  { %v1648_v32 = vpack.c.bf16 %v1542_v35, %v1542_v35  ;;  %1802 = vmatprep.subr.bf16.mxu0 %v4487_v8  ;;  %1843 = vmatprep.subr.bf16.mxu1 %v4490_v9  ;;  %v5790_v8 = vld [vmem:[#allocation26_spill] sm:$0xff]  ;;  %v5791_v9 = vld [vmem:[#allocation27_spill] sm:$0xff]  ;;  %v5813_v35 = vld [vmem:[#allocation49_spill] sm:$0xff] }
 0x1f6   :  { %1682 = vmatmul.mubr.bf16.vlgmr.msra.gmra.mrb[44].mxu0 %v1648_v32  ;;  %1723 = vmatmul.mubr.bf16.vlgmr.msra.gmra.mrb[44].mxu1 %v1648_v32  ;;  %v5814_v32 = vld [vmem:[#allocation50_spill] sm:$0xff] }
 0x1f7   :  { %1803 = vmatpush1.bf16.msra.mxu0 %v5784_v37  ;;  %1844 = vmatpush1.bf16.msra.mxu1 %v5785_v38  ;;  %v5815_v37 = vld [vmem:[#allocation51_spill] sm:$0xff] }
 0x1f8   :  { %1804 = vmatprep.subr.bf16.mxu0 %v5786_v28  ;;  %1845 = vmatprep.subr.bf16.mxu1 %v5787_v27  ;;  %v5816_v27 = vld [vmem:[#allocation53_spill] sm:$0xff] }
 0x1f9   :  { %1834 = vmatprep.mubr.bf16.mxu0 %v5726_v1  ;;  %1875 = vmatprep.mubr.bf16.mxu1 %v5726_v1 }
 0x1fb   :  { %1805 = vmatpush1.bf16.msra.mxu0 %v5788_v36  ;;  %1846 = vmatpush1.bf16.msra.mxu1 %v5789_v34  ;;  %v5817_v34 = vld [vmem:[#allocation55_spill] sm:$0xff] }
 0x1fc   :  { %1806 = vmatprep.subr.bf16.mxu0 %v5790_v8  ;;  %1847 = vmatprep.subr.bf16.mxu1 %v5791_v9 }
 0x1ff   :  { %1807 = vmatpush1.bf16.msra.mxu0 %v5792_v20  ;;  %1848 = vmatpush1.bf16.msra.mxu1 %v5793_v26  ;;  %v5818_v26 = vld [vmem:[#allocation54_spill] sm:$0xff] }
 0x200   :  { %1808 = vmatprep.subr.bf16.mxu0 %v5794_v33  ;;  %1849 = vmatprep.subr.bf16.mxu1 %v5795_v39  ;;  %v5819_v39 = vld [vmem:[#allocation56_spill] sm:$0xff] }
 0x203   :  { %1809 = vmatpush1.bf16.msra.mxu0 %v5796_v31  ;;  %1850 = vmatpush1.bf16.msra.mxu1 %v5797_v25 }
 0x204   :  { %1810 = vmatprep.subr.bf16.mxu0 %v5798_v40  ;;  %1851 = vmatprep.subr.bf16.mxu1 %v5799_v30 }
 0x207   :  { %1811 = vmatpush1.bf16.msra.mxu0 %v5800_v23  ;;  %1852 = vmatpush1.bf16.msra.mxu1 %v5801_v16 }
 0x208   :  { %1812 = vmatprep.subr.bf16.mxu0 %v5802_v17  ;;  %1853 = vmatprep.subr.bf16.mxu1 %v5803_v14 }
 0x20b   :  { %1813 = vmatpush1.bf16.msra.mxu0 %v5804_v29  ;;  %1854 = vmatpush1.bf16.msra.mxu1 %v5805_v15 }
 0x20c   :  { %1814 = vmatprep.subr.bf16.mxu0 %v5806_v19  ;;  %1855 = vmatprep.subr.bf16.mxu1 %v5807_v18 }
 0x20f   :  { %1815 = vmatpush1.bf16.msra.mxu0 %v5808_v24  ;;  %1856 = vmatpush1.bf16.msra.mxu1 %v5809_v11 }
 0x210   :  { %1816 = vmatprep.subr.bf16.mxu0 %v5810_v12  ;;  %1857 = vmatprep.subr.bf16.mxu1 %v5811_v10 }
 0x213   :  { %1817 = vmatpush1.bf16.msra.mxu0 %v5812_v6  ;;  %1858 = vmatpush1.bf16.msra.mxu1 %v5813_v35 }
 0x214   :  { %1889 = vmatprep.subr.bf16.mxu0 %v5814_v32  ;;  %1930 = vmatprep.subr.bf16.mxu1 %v5815_v37 }
 0x2a9   :  { %v1596_v38 = vpop.f32.mrb[40].mxu0  ;;  %v1637_v28 = vpop.f32.mrb[40].mxu1 }
 0x2aa   :  { %v1644_v36 = vadd.f32 %v1596_v38, %v5816_v27  ;;  %v1646_v8 = vadd.f32 %v1637_v28, %v5817_v34  ;;  %v1598_v9 = vpop.f32.mrb[41].mxu0  ;;  %v1639_v20 = vpop.f32.mrb[41].mxu1  ;;  %v5820_v27 = vld [vmem:[#allocation105_spill] sm:$0xff]  ;;  %v5821_v34 = vld [vmem:[#allocation107_spill] sm:$0xff] }
 0x2ab   :  { %v1645_v33 = vadd.f32 %v1598_v9, %v5818_v26  ;;  %v1647_v31 = vadd.f32 %v1639_v20, %v5819_v39  ;;  %v1600_v25 = vpop.f32.mrb[42].mxu0  ;;  %v1641_v40 = vpop.f32.mrb[42].mxu1  ;;  %v5822_v26 = vld [vmem:[#allocation106_spill] sm:$0xff]  ;;  %v5823_v39 = vld [vmem:[#allocation108_spill] sm:$0xff] }
 0x2ac   :  { %v3526_v30 = vmul.f32 -1.442695, %v1644_v36  ;;  %v1601_v23 = vpop.f32.mrb[43].mxu0  ;;  %v1642_v16 = vpop.f32.mrb[43].mxu1 }
 0x2ad   :  { %v3527_v17 = vmul.f32 -1.442695, %v1645_v33  ;;  %v3528_v14 = vmul.f32 -1.442695, %v1647_v31 }
 0x2ae   :  { %3807 = vpow2.f32 %v3526_v30 }
 0x2af   :  { %3809 = vpow2.f32 %v3527_v17 }
 0x2b0   :  { %3811 = vpow2.f32 %v3528_v14 }
 0x2b1   :  { %3813 = vtanh.f32 %v1646_v8 }
 0x2b8   :  { %v3808_v29 = vpop.eup %3807 }
 0x2b9   :  { %v3810_v15 = vpop.eup %3809  ;;  %v1738_v19 = vadd.f32 1.0, %v3808_v29 }
 0x2ba   :  { %v1744_v18 = vadd.f32 1.0, %v3810_v15  ;;  %v3812_v24 = vpop.eup %3811 }
 0x2bb   :  { %3815 = vrcp.f32 %v1738_v19  ;;  %v3814_v11 = vpop.eup %3813  ;;  %v1751_v35 = vadd.f32 1.0, %v3812_v24 }
 0x2bc   :  { %3817 = vrcp.f32 %v1744_v18 }
 0x2bd   :  { %3819 = vrcp.f32 %v1751_v35  ;;  %v5150_v35 = vld [vmem:[#allocation9 + $0xac] ss:$16 sps:$4 sm:$0xff]  }
 0x2be   :  { %5835 = vst [vmem:[#allocation30_spill] sm:$0xff] %v5150_v35 }
 0x2c5   :  { %v3816_v12 = vpop.eup %3815 }
 0x2c6   :  { %v3818_v10 = vpop.eup %3817  ;;  %v1755_v6 = vmul.f32 %v3816_v12, %v3814_v11 }
 0x2c7   :  { %v1754_v32 = vmul.f32 %v3818_v10, %v4962_v13  ;;  %v3820_v17 = vpop.eup %3819 }
 0x2c9   :  { %v5042_v37 = vadd.f32 %v1755_v6, %v1754_v32  ;;  %v1683_v38 = vpop.f32.mrb[44].mxu0  ;;  %v1724_v28 = vpop.f32.mrb[44].mxu1  ;;  %v5147_v6 = vld [vmem:[#allocation9 + $0xa4] ss:$16 sps:$4 sm:$0xff]   ;;  %v5153_v32 = vld [vmem:[#allocation9 + $0xa0] ss:$16 sps:$4 sm:$0xff]  }
 0x2ca   :  { %v1731_v36 = vadd.f32 %v1683_v38, %v5820_v27  ;;  %v1733_v8 = vadd.f32 %v1724_v28, %v5821_v34  ;;  %v1685_v9 = vpop.f32.mrb[45].mxu0  ;;  %v1726_v20 = vpop.f32.mrb[45].mxu1  ;;  %5834 = vst [vmem:[#allocation29_spill] sm:$0xff] %v5147_v6  ;;  %5836 = vst [vmem:[#allocation31_spill] sm:$0xff] %v5153_v32  ;;  %v5156_v38 = vld [vmem:[#allocation9 + $0xa8] ss:$16 sps:$4 sm:$0xff]  }
 0x2cb   :  { %v1732_v33 = vadd.f32 %v1685_v9, %v5822_v26  ;;  %v1734_v31 = vadd.f32 %v1726_v20, %v5823_v39  ;;  %v1687_v25 = vpop.f32.mrb[46].mxu0  ;;  %v1728_v40 = vpop.f32.mrb[46].mxu1  ;;  %3821 = vtanh.f32 %v5042_v37  ;;  %5837 = vst [vmem:[#allocation32_spill] sm:$0xff] %v5156_v38  ;;  %v5159_v28 = vld [vmem:[#allocation9 + $0xc4] ss:$16 sps:$4 sm:$0xff]  }
 0x2cc   :  { %v3529_v13 = vmul.f32 -1.442695, %v1731_v36  ;;  %v1688_v30 = vpop.f32.mrb[47].mxu0  ;;  %v1729_v23 = vpop.f32.mrb[47].mxu1  ;;  %5838 = vst [vmem:[#allocation33_spill] sm:$0xff] %v5159_v28  ;;  %v5848_v40 = vld [vmem:[#allocation57_spill] sm:$0xff] }
 0x2cd   :  { %v3530_v16 = vmul.f32 -1.442695, %v1732_v33  ;;  %v3531_v29 = vmul.f32 -1.442695, %v1734_v31  ;;  %v5162_v27 = vld [vmem:[#allocation9 + $0xcc] ss:$16 sps:$4 sm:$0xff]  }
 0x2ce   :  { %3823 = vpow2.f32 %v3529_v13  ;;  %5839 = vst [vmem:[#allocation34_spill] sm:$0xff] %v5162_v27  ;;  %v5165_v36 = vld [vmem:[#allocation9 + $0xc0] ss:$16 sps:$4 sm:$0xff]   ;;  %v5168_v34 = vld [vmem:[#allocation9 + $0xc8] ss:$16 sps:$4 sm:$0xff]  }
 0x2cf   :  { %3825 = vpow2.f32 %v3530_v16  ;;  %5840 = vst [vmem:[#allocation35_spill] sm:$0xff] %v5165_v36  ;;  %5841 = vst [vmem:[#allocation36_spill] sm:$0xff] %v5168_v34  ;;  %v5174_v9 = vld [vmem:[#allocation9 + $0xec] ss:$16 sps:$4 sm:$0xff]   ;;  %v5177_v20 = vld [vmem:[#allocation9 + $0xe0] ss:$16 sps:$4 sm:$0xff]  }
 0x2d0   :  { %3827 = vpow2.f32 %v3531_v29  ;;  %5843 = vst [vmem:[#allocation38_spill] sm:$0xff] %v5174_v9  ;;  %5844 = vst [vmem:[#allocation39_spill] sm:$0xff] %v5177_v20  ;;  %v5180_v26 = vld [vmem:[#allocation9 + $0xe8] ss:$16 sps:$4 sm:$0xff]   ;;  %v5183_v33 = vld [vmem:[#allocation11 + $0x4] ss:$16 sps:$4 sm:$0xff]  }
 0x2d1   :  { %3829 = vtanh.f32 %v1733_v8  ;;  %v5171_v8 = vld [vmem:[#allocation9 + $0xe4] ss:$16 sps:$4 sm:$0xff]   ;;  %5845 = vst [vmem:[#allocation40_spill] sm:$0xff] %v5180_v26  ;;  %5846 = vst [vmem:[#allocation41_spill] sm:$0xff] %v5183_v33  ;;  %v5186_v39 = vld [vmem:[#allocation11 + $0xc] ss:$16 sps:$4 sm:$0xff]  }
 0x2d2   :  { %5842 = vst [vmem:[#allocation37_spill] sm:$0xff] %v5171_v8  ;;  %5847 = vst [vmem:[#allocation42_spill] sm:$0xff] %v5186_v39  ;;  %v5849_v30 = vld [vmem:[#allocation59_spill] sm:$0xff] }
 0x2d5   :  { %v3822_v14 = vpop.eup %3821 }
 0x2d6   :  { %v1758_v15 = vmul.f32 %v3822_v14, %v3820_v17  ;;  %v5850_v14 = vld [vmem:[#allocation58_spill] sm:$0xff] }
 0x2d8   :  { %v3824_v19 = vpop.eup %3823  ;;  %v1801_v18 = vpack.c.bf16 %v1758_v15, %v1758_v15  ;;  %v5851_v15 = vld [vmem:[#allocation61_spill] sm:$0xff] }
 0x2d9   :  { %v3826_v24 = vpop.eup %3825  ;;  %v1762_v11 = vadd.f32 1.0, %v3824_v19 }
 0x2da   :  { %v1768_v12 = vadd.f32 1.0, %v3826_v24  ;;  %1835 = vmatmul.mubr.bf16.vlgmr.msra.gmra.mrb[48].mxu0 %v1801_v18  ;;  %1876 = vmatmul.mubr.bf16.vlgmr.msra.gmra.mrb[48].mxu1 %v1801_v18 }
 0x2db   :  { %3831 = vrcp.f32 %v1762_v11  ;;  %1890 = vmatpush1.bf16.msra.mxu0 %v4604_v41  ;;  %1931 = vmatpush1.bf16.msra.mxu1 %v4608_v42  ;;  %v3828_v41 = vpop.eup %3827 }
 0x2dc   :  { %3833 = vrcp.f32 %v1768_v12  ;;  %1891 = vmatprep.subr.bf16.mxu0 %v4610_v43  ;;  %1932 = vmatprep.subr.bf16.mxu1 %v4613_v44  ;;  %v3830_v42 = vpop.eup %3829 }
 0x2dd   :  { %1921 = vmatprep.mubr.bf16.mxu0 %v5726_v1  ;;  %1962 = vmatprep.mubr.bf16.mxu1 %v5726_v1 }
 0x2df   :  { %1892 = vmatpush1.bf16.msra.mxu0 %v4618_v45  ;;  %1933 = vmatpush1.bf16.msra.mxu1 %v4622_v46  ;;  %v1775_v45 = vadd.f32 1.0, %v3828_v41 }
 0x2e0   :  { %1893 = vmatprep.subr.bf16.mxu0 %v4624_v47  ;;  %1934 = vmatprep.subr.bf16.mxu1 %v4627_v48 }
 0x2e1   :  { %3835 = vrcp.f32 %v1775_v45 }
 0x2e3   :  { %1894 = vmatpush1.bf16.msra.mxu0 %v4632_v49  ;;  %1935 = vmatpush1.bf16.msra.mxu1 %v4636_v50 }
 0x2e4   :  { %1895 = vmatprep.subr.bf16.mxu0 %v4638_v51  ;;  %1936 = vmatprep.subr.bf16.mxu1 %v4641_v52  ;;  %v5085_v52 = vld [vmem:[#allocation9 + $0x4] ss:$16 sps:$4 sm:$0xff]  }
 0x2e5   :  { %v3832_v43 = vpop.eup %3831 }
 0x2e6   :  { %v3834_v44 = vpop.eup %3833  ;;  %v1779_v10 = vmul.f32 %v3832_v43, %v3830_v42 }
 0x2e7   :  { %v1778_v46 = vmul.f32 %v3834_v44, %v4984_v21  ;;  %1896 = vmatpush1.bf16.msra.mxu0 %v4644_v53  ;;  %1937 = vmatpush1.bf16.msra.mxu1 %v4648_v54  ;;  %v5088_v53 = vld [vmem:[#allocation9 + $0xc] ss:$16 sps:$4 sm:$0xff]   ;;  %v5091_v54 = vld [vmem:[#allocation9] ss:$16 sps:$4 sm:$0xff]  }
 0x2e8   :  { %1897 = vmatprep.subr.bf16.mxu0 %v4650_v55  ;;  %1938 = vmatprep.subr.bf16.mxu1 %v4653_v56  ;;  %v5094_v55 = vld [vmem:[#allocation9 + $0x8] ss:$16 sps:$4 sm:$0xff]   ;;  %v5100_v56 = vld [vmem:[#allocation9 + $0x2c] ss:$16 sps:$4 sm:$0xff]   ;;  %v5141_v21 = vld [vmem:[#allocation9 + $0x80] ss:$16 sps:$4 sm:$0xff]  }
 0x2e9   :  { %v5068_v47 = vadd.f32 %v1779_v10, %v1778_v46  ;;  %5832 = vst [vmem:[#allocation27_spill] sm:$0xff] %v5141_v21 }
 0x2eb   :  { %1898 = vmatpush1.bf16.msra.mxu0 %v4656_v57  ;;  %1939 = vmatpush1.bf16.msra.mxu1 %v4660_v58  ;;  %3837 = vtanh.f32 %v5068_v47  ;;  %v3836_v48 = vpop.eup %3835  ;;  %v5105_v57 = vld [vmem:[#allocation9 + $0x20] ss:$16 sps:$4 sm:$0xff]   ;;  %v5108_v58 = vld [vmem:[#allocation9 + $0x28] ss:$16 sps:$4 sm:$0xff]  }
 0x2ec   :  { %1899 = vmatprep.subr.bf16.mxu0 %v4662_v59  ;;  %1940 = vmatprep.subr.bf16.mxu1 %v4665_v60  ;;  %v5111_v59 = vld [vmem:[#allocation9 + $0x44] ss:$16 sps:$4 sm:$0xff]   ;;  %v5114_v60 = vld [vmem:[#allocation9 + $0x4c] ss:$16 sps:$4 sm:$0xff]  }
 0x2ef   :  { %1900 = vmatpush1.bf16.msra.mxu0 %v4668_v61  ;;  %1941 = vmatpush1.bf16.msra.mxu1 %v4672_v62  ;;  %v5117_v61 = vld [vmem:[#allocation9 + $0x40] ss:$16 sps:$4 sm:$0xff]   ;;  %v5120_v62 = vld [vmem:[#allocation9 + $0x48] ss:$16 sps:$4 sm:$0xff]  }
 0x2f0   :  { %1901 = vmatprep.subr.bf16.mxu0 %v4674_v63  ;;  %1942 = vmatprep.subr.bf16.mxu1 %v5783_v22  ;;  %5824 = vst [vmem:[#allocation52_spill] sm:$0xff] %v5117_v61  ;;  %5825 = vst [vmem:[#allocation20_spill] sm:$0xff] %v5120_v62  ;;  %v5123_v63 = vld [vmem:[#allocation9 + $0x64] ss:$16 sps:$4 sm:$0xff]   ;;  %v5144_v22 = vld [vmem:[#allocation9 + $0x88] ss:$16 sps:$4 sm:$0xff]  }
 0x2f1   :  { %5826 = vst [vmem:[#allocation21_spill] sm:$0xff] %v5123_v63  ;;  %5833 = vst [vmem:[#allocation28_spill] sm:$0xff] %v5144_v22 }
 0x2f3   :  { %1902 = vmatpush1.bf16.msra.mxu0 %v4680_v2  ;;  %1943 = vmatpush1.bf16.msra.mxu1 %v4684_v3  ;;  %v5126_v2 = vld [vmem:[#allocation9 + $0x6c] ss:$16 sps:$4 sm:$0xff]   ;;  %v5129_v3 = vld [vmem:[#allocation9 + $0x60] ss:$16 sps:$4 sm:$0xff]  }
 0x2f4   :  { %1903 = vmatprep.subr.bf16.mxu0 %v4686_v4  ;;  %1944 = vmatprep.subr.bf16.mxu1 %v4689_v5  ;;  %5827 = vst [vmem:[#allocation22_spill] sm:$0xff] %v5126_v2  ;;  %5828 = vst [vmem:[#allocation23_spill] sm:$0xff] %v5129_v3  ;;  %v5132_v4 = vld [vmem:[#allocation9 + $0x68] ss:$16 sps:$4 sm:$0xff]   ;;  %v5135_v5 = vld [vmem:[#allocation9 + $0x84] ss:$16 sps:$4 sm:$0xff]  }
 0x2f5   :  { %v3838_v49 = vpop.eup %3837  ;;  %5829 = vst [vmem:[#allocation24_spill] sm:$0xff] %v5132_v4  ;;  %5830 = vst [vmem:[#allocation25_spill] sm:$0xff] %v5135_v5 }
 0x2f6   :  { %v1782_v50 = vmul.f32 %v3838_v49, %v3836_v48 }
 0x2f7   :  { %1904 = vmatpush1.bf16.msra.mxu0 %v4692_v7  ;;  %1945 = vmatpush1.bf16.msra.mxu1 %v4696_v0  ;;  %v5097_v0 = vld [vmem:[#allocation9 + $0x24] ss:$16 sps:$4 sm:$0xff]   ;;  %v5138_v7 = vld [vmem:[#allocation9 + $0x8c] ss:$16 sps:$4 sm:$0xff]  }
 0x2f8   :  { %v1888_v51 = vpack.c.bf16 %v1782_v50, %v1782_v50  ;;  %2042 = vmatprep.subr.bf16.mxu0 %v5085_v52  ;;  %2083 = vmatprep.subr.bf16.mxu1 %v5088_v53  ;;  %5831 = vst [vmem:[#allocation26_spill] sm:$0xff] %v5138_v7 }
 0x2fa   :  { %1922 = vmatmul.mubr.bf16.vlgmr.msra.gmra.mrb[52].mxu0 %v1888_v51  ;;  %1963 = vmatmul.mubr.bf16.vlgmr.msra.gmra.mrb[52].mxu1 %v1888_v51 }
 0x2fb   :  { %2043 = vmatpush1.bf16.msra.mxu0 %v5091_v54  ;;  %2084 = vmatpush1.bf16.msra.mxu1 %v5094_v55 }
 0x2fc   :  { %2044 = vmatprep.subr.bf16.mxu0 %v5097_v0  ;;  %2085 = vmatprep.subr.bf16.mxu1 %v5100_v56 }
 0x2fd   :  { %2074 = vmatprep.mubr.bf16.mxu0 %v5726_v1  ;;  %2115 = vmatprep.mubr.bf16.mxu1 %v5726_v1 }
 0x2ff   :  { %2045 = vmatpush1.bf16.msra.mxu0 %v5105_v57  ;;  %2086 = vmatpush1.bf16.msra.mxu1 %v5108_v58 }
 0x300   :  { %2046 = vmatprep.subr.bf16.mxu0 %v5111_v59  ;;  %2087 = vmatprep.subr.bf16.mxu1 %v5114_v60 }
 0x303   :  { %2047 = vmatpush1.bf16.msra.mxu0 %v5117_v61  ;;  %2088 = vmatpush1.bf16.msra.mxu1 %v5120_v62 }
 0x304   :  { %2048 = vmatprep.subr.bf16.mxu0 %v5123_v63  ;;  %2089 = vmatprep.subr.bf16.mxu1 %v5126_v2 }
 0x307   :  { %2049 = vmatpush1.bf16.msra.mxu0 %v5129_v3  ;;  %2090 = vmatpush1.bf16.msra.mxu1 %v5132_v4 }
 0x308   :  { %2050 = vmatprep.subr.bf16.mxu0 %v5135_v5  ;;  %2091 = vmatprep.subr.bf16.mxu1 %v5138_v7 }
 0x30b   :  { %2051 = vmatpush1.bf16.msra.mxu0 %v5141_v21  ;;  %2092 = vmatpush1.bf16.msra.mxu1 %v5144_v22 }
 0x30c   :  { %2052 = vmatprep.subr.bf16.mxu0 %v5147_v6  ;;  %2093 = vmatprep.subr.bf16.mxu1 %v5150_v35 }
 0x30f   :  { %2053 = vmatpush1.bf16.msra.mxu0 %v5153_v32  ;;  %2094 = vmatpush1.bf16.msra.mxu1 %v5156_v38 }
 0x310   :  { %2054 = vmatprep.subr.bf16.mxu0 %v5159_v28  ;;  %2095 = vmatprep.subr.bf16.mxu1 %v5162_v27 }
 0x313   :  { %2055 = vmatpush1.bf16.msra.mxu0 %v5165_v36  ;;  %2096 = vmatpush1.bf16.msra.mxu1 %v5168_v34 }
 0x314   :  { %2056 = vmatprep.subr.bf16.mxu0 %v5171_v8  ;;  %2097 = vmatprep.subr.bf16.mxu1 %v5174_v9 }
 0x317   :  { %2057 = vmatpush1.bf16.msra.mxu0 %v5177_v20  ;;  %2098 = vmatpush1.bf16.msra.mxu1 %v5180_v26 }
 0x318   :  { %2129 = vmatprep.subr.bf16.mxu0 %v5183_v33  ;;  %2170 = vmatprep.subr.bf16.mxu1 %v5186_v39 }
 0x3ad   :  { %v1836_v31 = vpop.f32.mrb[48].mxu0  ;;  %v1877_v25 = vpop.f32.mrb[48].mxu1 }
 0x3ae   :  { %v1884_v13 = vadd.f32 %v1836_v31, %v5848_v40  ;;  %v1886_v23 = vadd.f32 %v1877_v25, %v5849_v30  ;;  %v1838_v16 = vpop.f32.mrb[49].mxu0  ;;  %v1879_v17 = vpop.f32.mrb[49].mxu1 }
 0x3af   :  { %v1885_v29 = vadd.f32 %v1838_v16, %v5850_v14  ;;  %v1887_v19 = vadd.f32 %v1879_v17, %v5851_v15  ;;  %v1840_v18 = vpop.f32.mrb[50].mxu0  ;;  %v1881_v24 = vpop.f32.mrb[50].mxu1  ;;  %v5852_v17 = vld [vmem:[#allocation100_spill] sm:$0xff] }
 0x3b0   :  { %v3532_v11 = vmul.f32 -1.442695, %v1884_v13  ;;  %v1841_v12 = vpop.f32.mrb[51].mxu0  ;;  %v1882_v41 = vpop.f32.mrb[51].mxu1  ;;  %v5854_v18 = vld [vmem:[#allocation102_spill] sm:$0xff] }
 0x3b1   :  { %v3533_v42 = vmul.f32 -1.442695, %v1885_v29  ;;  %v3534_v43 = vmul.f32 -1.442695, %v1887_v19  ;;  %v5853_v29 = vld [vmem:[#allocation103_spill] sm:$0xff] }
 0x3b2   :  { %3839 = vpow2.f32 %v3532_v11  ;;  %v5855_v11 = vld [vmem:[#allocation104_spill] sm:$0xff] }
 0x3b3   :  { %3841 = vpow2.f32 %v3533_v42 }
 0x3b4   :  { %3843 = vpow2.f32 %v3534_v43 }
 0x3b5   :  { %3845 = vtanh.f32 %v1886_v23 }
 0x3bc   :  { %v3840_v44 = vpop.eup %3839 }
 0x3bd   :  { %v3842_v10 = vpop.eup %3841  ;;  %v1978_v45 = vadd.f32 1.0, %v3840_v44 }
 0x3be   :  { %v1984_v46 = vadd.f32 1.0, %v3842_v10  ;;  %v3844_v48 = vpop.eup %3843 }
 0x3bf   :  { %3847 = vrcp.f32 %v1978_v45  ;;  %v3846_v49 = vpop.eup %3845  ;;  %v1991_v25 = vadd.f32 1.0, %v3844_v48 }
 0x3c0   :  { %3849 = vrcp.f32 %v1984_v46 }
 0x3c1   :  { %3851 = vrcp.f32 %v1991_v25 }
 0x3c9   :  { %v3848_v50 = vpop.eup %3847 }
 0x3ca   :  { %v3850_v51 = vpop.eup %3849  ;;  %v1995_v31 = vmul.f32 %v3848_v50, %v3846_v49 }
 0x3cb   :  { %v1994_v40 = vmul.f32 %v3850_v51, %v5042_v37  ;;  %v3852_v45 = vpop.eup %3851 }
 0x3cd   :  { %v5194_v13 = vadd.f32 %v1995_v31, %v1994_v40  ;;  %v1923_v30 = vpop.f32.mrb[52].mxu0  ;;  %v1964_v16 = vpop.f32.mrb[52].mxu1 }
 0x3ce   :  { %v1971_v14 = vadd.f32 %v1923_v30, %v5852_v17  ;;  %v1973_v23 = vadd.f32 %v1964_v16, %v5853_v29  ;;  %v1925_v15 = vpop.f32.mrb[53].mxu0  ;;  %v1966_v19 = vpop.f32.mrb[53].mxu1  ;;  %v5201_v30 = vld [vmem:[#allocation11] ss:$16 sps:$4 sm:$0xff]   ;;  %v5204_v16 = vld [vmem:[#allocation11 + $0x8] ss:$16 sps:$4 sm:$0xff]  }
 0x3cf   :  { %v1972_v24 = vadd.f32 %v1925_v15, %v5854_v18  ;;  %v1974_v12 = vadd.f32 %v1966_v19, %v5855_v11  ;;  %v1927_v41 = vpop.f32.mrb[54].mxu0  ;;  %v1968_v42 = vpop.f32.mrb[54].mxu1  ;;  %3853 = vtanh.f32 %v5194_v13  ;;  %v5207_v17 = vld [vmem:[#allocation11 + $0x24] ss:$16 sps:$4 sm:$0xff]   ;;  %v5215_v29 = vld [vmem:[#allocation11 + $0x20] ss:$16 sps:$4 sm:$0xff]  }
 0x3d0   :  { %v3535_v37 = vmul.f32 -1.442695, %v1971_v14  ;;  %v1928_v43 = vpop.f32.mrb[55].mxu0  ;;  %v1969_v44 = vpop.f32.mrb[55].mxu1  ;;  %v5210_v14 = vld [vmem:[#allocation11 + $0x2c] ss:$16 sps:$4 sm:$0xff]  }
 0x3d1   :  { %v3536_v10 = vmul.f32 -1.442695, %v1972_v24  ;;  %v3537_v48 = vmul.f32 -1.442695, %v1974_v12  ;;  %v5221_v15 = vld [vmem:[#allocation11 + $0x44] ss:$16 sps:$4 sm:$0xff]  }
 0x3d2   :  { %3855 = vpow2.f32 %v3535_v37  ;;  %v5224_v19 = vld [vmem:[#allocation11 + $0x4c] ss:$16 sps:$4 sm:$0xff]   ;;  %v5227_v24 = vld [vmem:[#allocation11 + $0x40] ss:$16 sps:$4 sm:$0xff]   ;;  %v5230_v11 = vld [vmem:[#allocation11 + $0x48] ss:$16 sps:$4 sm:$0xff]  }
 0x3d3   :  { %3857 = vpow2.f32 %v3536_v10  ;;  %v5233_v41 = vld [vmem:[#allocation11 + $0x64] ss:$16 sps:$4 sm:$0xff]   ;;  %v5236_v42 = vld [vmem:[#allocation11 + $0x6c] ss:$16 sps:$4 sm:$0xff]  }
 0x3d4   :  { %3859 = vpow2.f32 %v3537_v48  ;;  %v5243_v48 = vld [vmem:[#allocation11 + $0x68] ss:$16 sps:$4 sm:$0xff]  }
 0x3d5   :  { %3861 = vtanh.f32 %v1973_v23  ;;  %v5218_v23 = vld [vmem:[#allocation11 + $0x28] ss:$16 sps:$4 sm:$0xff]  }
 0x3d9   :  { %v3854_v46 = vpop.eup %3853 }
 0x3da   :  { %v1998_v49 = vmul.f32 %v3854_v46, %v3852_v45  ;;  %v5240_v46 = vld [vmem:[#allocation11 + $0x60] ss:$16 sps:$4 sm:$0xff]  }
 0x3dc   :  { %v3856_v50 = vpop.eup %3855  ;;  %v2041_v51 = vpack.c.bf16 %v1998_v49, %v1998_v49  ;;  %v5246_v49 = vld [vmem:[#allocation11 + $0x84] ss:$16 sps:$4 sm:$0xff]  }
 0x3dd   :  { %v3858_v31 = vpop.eup %3857  ;;  %v2002_v25 = vadd.f32 1.0, %v3856_v50  ;;  %v5249_v50 = vld [vmem:[#allocation11 + $0x8c] ss:$16 sps:$4 sm:$0xff]  }
 0x3de   :  { %v2008_v40 = vadd.f32 1.0, %v3858_v31  ;;  %2075 = vmatmul.mubr.bf16.vlgmr.msra.gmra.mrb[56].mxu0 %v2041_v51  ;;  %2116 = vmatmul.mubr.bf16.vlgmr.msra.gmra.mrb[56].mxu1 %v2041_v51  ;;  %v3860_v18 = vpop.eup %3859  ;;  %v5257_v31 = vld [vmem:[#allocation11 + $0x88] ss:$16 sps:$4 sm:$0xff]  }
 0x3df   :  { %3863 = vrcp.f32 %v2002_v25  ;;  %2130 = vmatpush1.bf16.msra.mxu0 %v5201_v30  ;;  %2171 = vmatpush1.bf16.msra.mxu1 %v5204_v16  ;;  %v3862_v12 = vpop.eup %3861  ;;  %v2015_v10 = vadd.f32 1.0, %v3860_v18  ;;  %v5261_v25 = vld [vmem:[#allocation11 + $0xa4] ss:$16 sps:$4 sm:$0xff]   ;;  %v5267_v18 = vld [vmem:[#allocation11 + $0xa0] ss:$16 sps:$4 sm:$0xff]  }
 0x3e0   :  { %3865 = vrcp.f32 %v2008_v40  ;;  %2131 = vmatprep.subr.bf16.mxu0 %v5207_v17  ;;  %2172 = vmatprep.subr.bf16.mxu1 %v5210_v14  ;;  %v5264_v40 = vld [vmem:[#allocation11 + $0xac] ss:$16 sps:$4 sm:$0xff]   ;;  %5857 = vst [vmem:[#allocation44_spill] sm:$0xff] %v5267_v18 }
 0x3e1   :  { %2161 = vmatprep.mubr.bf16.mxu0 %v5726_v1  ;;  %2202 = vmatprep.mubr.bf16.mxu1 %v5726_v1  ;;  %3867 = vrcp.f32 %v2015_v10  ;;  %5856 = vst [vmem:[#allocation43_spill] sm:$0xff] %v5264_v40  ;;  %v5282_v10 = vld [vmem:[#allocation11 + $0xc8] ss:$16 sps:$4 sm:$0xff]  }
 0x3e2   :  { %5862 = vst [vmem:[#allocation49_spill] sm:$0xff] %v5282_v10 }
 0x3e3   :  { %2132 = vmatpush1.bf16.msra.mxu0 %v5215_v29  ;;  %2173 = vmatpush1.bf16.msra.mxu1 %v5218_v23 }
 0x3e4   :  { %2133 = vmatprep.subr.bf16.mxu0 %v5221_v15  ;;  %2174 = vmatprep.subr.bf16.mxu1 %v5224_v19 }
 0x3e7   :  { %2134 = vmatpush1.bf16.msra.mxu0 %v5227_v24  ;;  %2175 = vmatpush1.bf16.msra.mxu1 %v5230_v11 }
 0x3e8   :  { %2135 = vmatprep.subr.bf16.mxu0 %v5233_v41  ;;  %2176 = vmatprep.subr.bf16.mxu1 %v5236_v42 }
 0x3e9   :  { %v3864_v37 = vpop.eup %3863 }
 0x3ea   :  { %v3866_v43 = vpop.eup %3865  ;;  %v2019_v44 = vmul.f32 %v3864_v37, %v3862_v12  ;;  %v5270_v12 = vld [vmem:[#allocation11 + $0xa8] ss:$16 sps:$4 sm:$0xff]   ;;  %v5273_v37 = vld [vmem:[#allocation11 + $0xc4] ss:$16 sps:$4 sm:$0xff]  }
 0x3eb   :  { %v2018_v45 = vmul.f32 %v3866_v43, %v5068_v47  ;;  %2136 = vmatpush1.bf16.msra.mxu0 %v5240_v46  ;;  %2177 = vmatpush1.bf16.msra.mxu1 %v5243_v48  ;;  %v5254_v47 = vld [vmem:[#allocation11 + $0x80] ss:$16 sps:$4 sm:$0xff]   ;;  %5858 = vst [vmem:[#allocation45_spill] sm:$0xff] %v5270_v12  ;;  %5859 = vst [vmem:[#allocation46_spill] sm:$0xff] %v5273_v37  ;;  %v5276_v43 = vld [vmem:[#allocation11 + $0xcc] ss:$16 sps:$4 sm:$0xff]  }
 0x3ec   :  { %2137 = vmatprep.subr.bf16.mxu0 %v5246_v49  ;;  %2178 = vmatprep.subr.bf16.mxu1 %v5249_v50  ;;  %5860 = vst [vmem:[#allocation47_spill] sm:$0xff] %v5276_v43 }
 0x3ed   :  { %v5252_v51 = vadd.f32 %v2019_v44, %v2018_v45  ;;  %v5279_v44 = vld [vmem:[#allocation11 + $0xc0] ss:$16 sps:$4 sm:$0xff]   ;;  %v3868_v45 = vpop.eup %3867 }
 0x3ee   :  { %5861 = vst [vmem:[#allocation48_spill] sm:$0xff] %v5279_v44 }
 0x3ef   :  { %2138 = vmatpush1.bf16.msra.mxu0 %v5254_v47  ;;  %2179 = vmatpush1.bf16.msra.mxu1 %v5257_v31  ;;  %3869 = vtanh.f32 %v5252_v51 }
 0x3f0   :  { %2139 = vmatprep.subr.bf16.mxu0 %v5261_v25  ;;  %2180 = vmatprep.subr.bf16.mxu1 %v5264_v40 }
 0x3f3   :  { %2140 = vmatpush1.bf16.msra.mxu0 %v5267_v18  ;;  %2181 = vmatpush1.bf16.msra.mxu1 %v5270_v12  ;;  %v5285_v18 = vld [vmem:[#allocation11 + $0xe4] ss:$16 sps:$4 sm:$0xff]   ;;  %v5288_v12 = vld [vmem:[#allocation11 + $0xec] ss:$16 sps:$4 sm:$0xff]  }
 0x3f4   :  { %2141 = vmatprep.subr.bf16.mxu0 %v5273_v37  ;;  %2182 = vmatprep.subr.bf16.mxu1 %v5276_v43  ;;  %v5291_v43 = vld [vmem:[#allocation11 + $0xe0] ss:$16 sps:$4 sm:$0xff]  }
 0x3f7   :  { %2142 = vmatpush1.bf16.msra.mxu0 %v5279_v44  ;;  %2183 = vmatpush1.bf16.msra.mxu1 %v5282_v10  ;;  %v5294_v44 = vld [vmem:[#allocation11 + $0xe8] ss:$16 sps:$4 sm:$0xff]  }
 0x3f8   :  { %2143 = vmatprep.subr.bf16.mxu0 %v5285_v18  ;;  %2184 = vmatprep.subr.bf16.mxu1 %v5288_v12 }
 0x3f9   :  { %v3870_v37 = vpop.eup %3869 }
 0x3fa   :  { %v2022_v40 = vmul.f32 %v3870_v37, %v3868_v45 }
 0x3fb   :  { %2144 = vmatpush1.bf16.msra.mxu0 %v5291_v43  ;;  %2185 = vmatpush1.bf16.msra.mxu1 %v5294_v44 }
 0x3fc   :  { %v2128_v10 = vpack.c.bf16 %v2022_v40, %v2022_v40  ;;  %2264 = vmatprep.subr.bf16.mxu0 %v5085_v52  ;;  %2305 = vmatprep.subr.bf16.mxu1 %v5088_v53 }
 0x3fe   :  { %2162 = vmatmul.mubr.bf16.vlgmr.msra.gmra.mrb[60].mxu0 %v2128_v10  ;;  %2203 = vmatmul.mubr.bf16.vlgmr.msra.gmra.mrb[60].mxu1 %v2128_v10  ;;  %v5863_v10 = vld [vmem:[#allocation60_spill] sm:$0xff] }
 0x3ff   :  { %2265 = vmatpush1.bf16.msra.mxu0 %v5091_v54  ;;  %2306 = vmatpush1.bf16.msra.mxu1 %v5094_v55 }
 0x400   :  { %2266 = vmatprep.subr.bf16.mxu0 %v5097_v0  ;;  %2307 = vmatprep.subr.bf16.mxu1 %v5100_v56 }
 0x401   :  { %2296 = vmatprep.mubr.bf16.mxu0 %v5726_v1  ;;  %2337 = vmatprep.mubr.bf16.mxu1 %v5726_v1 }
 0x403   :  { %2267 = vmatpush1.bf16.msra.mxu0 %v5105_v57  ;;  %2308 = vmatpush1.bf16.msra.mxu1 %v5108_v58 }
 0x404   :  { %2268 = vmatprep.subr.bf16.mxu0 %v5111_v59  ;;  %2309 = vmatprep.subr.bf16.mxu1 %v5114_v60 }
 0x407   :  { %2269 = vmatpush1.bf16.msra.mxu0 %v5117_v61  ;;  %2310 = vmatpush1.bf16.msra.mxu1 %v5120_v62 }
 0x408   :  { %2270 = vmatprep.subr.bf16.mxu0 %v5123_v63  ;;  %2311 = vmatprep.subr.bf16.mxu1 %v5126_v2 }
 0x40b   :  { %2271 = vmatpush1.bf16.msra.mxu0 %v5129_v3  ;;  %2312 = vmatpush1.bf16.msra.mxu1 %v5132_v4 }
 0x40c   :  { %2272 = vmatprep.subr.bf16.mxu0 %v5135_v5  ;;  %2313 = vmatprep.subr.bf16.mxu1 %v5138_v7 }
 0x40f   :  { %2273 = vmatpush1.bf16.msra.mxu0 %v5141_v21  ;;  %2314 = vmatpush1.bf16.msra.mxu1 %v5144_v22 }
 0x410   :  { %2274 = vmatprep.subr.bf16.mxu0 %v5147_v6  ;;  %2315 = vmatprep.subr.bf16.mxu1 %v5150_v35 }
 0x413   :  { %2275 = vmatpush1.bf16.msra.mxu0 %v5153_v32  ;;  %2316 = vmatpush1.bf16.msra.mxu1 %v5156_v38  ;;  %v5865_v38 = vld [vmem:[#allocation62_spill] sm:$0xff]  ;;  %v5866_v32 = vld [vmem:[#allocation64_spill] sm:$0xff] }
 0x414   :  { %2276 = vmatprep.subr.bf16.mxu0 %v5159_v28  ;;  %2317 = vmatprep.subr.bf16.mxu1 %v5162_v27  ;;  %v5864_v27 = vld [vmem:[#allocation63_spill] sm:$0xff] }
 0x417   :  { %2277 = vmatpush1.bf16.msra.mxu0 %v5165_v36  ;;  %2318 = vmatpush1.bf16.msra.mxu1 %v5168_v34 }
 0x418   :  { %2278 = vmatprep.subr.bf16.mxu0 %v5171_v8  ;;  %2319 = vmatprep.subr.bf16.mxu1 %v5174_v9 }
 0x41b   :  { %2279 = vmatpush1.bf16.msra.mxu0 %v5177_v20  ;;  %2320 = vmatpush1.bf16.msra.mxu1 %v5180_v26 }
 0x41c   :  { %2351 = vmatprep.subr.bf16.mxu0 %v5183_v33  ;;  %2392 = vmatprep.subr.bf16.mxu1 %v5186_v39 }
 0x4b1   :  { %v2076_v40 = vpop.f32.mrb[56].mxu0  ;;  %v2117_v37 = vpop.f32.mrb[56].mxu1 }
 0x4b2   :  { %v2124_v45 = vadd.f32 %v2076_v40, %v5863_v10  ;;  %v2126_v36 = vadd.f32 %v2117_v37, %v5864_v27  ;;  %v2078_v28 = vpop.f32.mrb[57].mxu0  ;;  %v2119_v34 = vpop.f32.mrb[57].mxu1  ;;  %v5869_v37 = vld [vmem:[#allocation98_spill] sm:$0xff] }
 0x4b3   :  { %v2125_v8 = vadd.f32 %v2078_v28, %v5865_v38  ;;  %v2127_v9 = vadd.f32 %v2119_v34, %v5866_v32  ;;  %v2080_v35 = vpop.f32.mrb[58].mxu0  ;;  %v2121_v20 = vpop.f32.mrb[58].mxu1 }
 0x4b4   :  { %v3538_v6 = vmul.f32 -1.442695, %v2124_v45  ;;  %v2081_v26 = vpop.f32.mrb[59].mxu0  ;;  %v2122_v22 = vpop.f32.mrb[59].mxu1  ;;  %v5870_v45 = vld [vmem:[#allocation101_spill] sm:$0xff] }
 0x4b5   :  { %v3539_v33 = vmul.f32 -1.442695, %v2125_v8  ;;  %v3540_v39 = vmul.f32 -1.442695, %v2127_v9  ;;  %v5867_v26 = vld [vmem:[#allocation97_spill] sm:$0xff] }
 0x4b6   :  { %3871 = vpow2.f32 %v3538_v6 }
 0x4b7   :  { %3873 = vpow2.f32 %v3539_v33  ;;  %v5868_v33 = vld [vmem:[#allocation99_spill] sm:$0xff] }
 0x4b8   :  { %3875 = vpow2.f32 %v3540_v39 }
 0x4b9   :  { %3877 = vtanh.f32 %v2126_v36 }
 0x4c0   :  { %v3872_v21 = vpop.eup %3871 }
 0x4c1   :  { %v3874_v7 = vpop.eup %3873  ;;  %v2218_v40 = vadd.f32 1.0, %v3872_v21 }
 0x4c2   :  { %v2224_v27 = vadd.f32 1.0, %v3874_v7  ;;  %v3876_v38 = vpop.eup %3875 }
 0x4c3   :  { %3879 = vrcp.f32 %v2218_v40  ;;  %v3878_v28 = vpop.eup %3877  ;;  %v2231_v20 = vadd.f32 1.0, %v3876_v38 }
 0x4c4   :  { %3881 = vrcp.f32 %v2224_v27 }
 0x4c5   :  { %3883 = vrcp.f32 %v2231_v20 }
 0x4cd   :  { %v3880_v32 = vpop.eup %3879 }
 0x4ce   :  { %v3882_v35 = vpop.eup %3881  ;;  %v2235_v34 = vmul.f32 %v3880_v32, %v3878_v28 }
 0x4cf   :  { %v2234_v22 = vmul.f32 %v3882_v35, %v5194_v13 }
 0x4d1   :  { %v5338_v8 = vadd.f32 %v2235_v34, %v2234_v22  ;;  %v2163_v6 = vpop.f32.mrb[60].mxu0  ;;  %v2204_v9 = vpop.f32.mrb[60].mxu1 }
 0x4d2   :  { %v2211_v21 = vadd.f32 %v2163_v6, %v5867_v26  ;;  %v2213_v36 = vadd.f32 %v2204_v9, %v5868_v33  ;;  %v2165_v7 = vpop.f32.mrb[61].mxu0  ;;  %v2206_v39 = vpop.f32.mrb[61].mxu1 }
 0x4d3   :  { %v2212_v10 = vadd.f32 %v2165_v7, %v5869_v37  ;;  %v2214_v40 = vadd.f32 %v2206_v39, %v5870_v45  ;;  %v2167_v27 = vpop.f32.mrb[62].mxu0  ;;  %v2208_v28 = vpop.f32.mrb[62].mxu1  ;;  %3885 = vtanh.f32 %v5338_v8 }
 0x4d4   :  { %v3541_v13 = vmul.f32 -1.442695, %v2211_v21  ;;  %v2168_v38 = vpop.f32.mrb[63].mxu0  ;;  %v2209_v32 = vpop.f32.mrb[63].mxu1 }
 0x4d5   :  { %v3542_v35 = vmul.f32 -1.442695, %v2212_v10  ;;  %v3884_v34 = vpop.eup %3883  ;;  %v3543_v22 = vmul.f32 -1.442695, %v2214_v40  ;;  %v5873_v38 = vld [vmem:[#allocation45_spill] sm:$0xff]  ;;  %v5874_v32 = vld [vmem:[#allocation46_spill] sm:$0xff] }
 0x4d6   :  { %3887 = vpow2.f32 %v3541_v13  ;;  %v5872_v13 = vld [vmem:[#allocation44_spill] sm:$0xff] }
 0x4d7   :  { %3889 = vpow2.f32 %v3542_v35  ;;  %v5875_v35 = vld [vmem:[#allocation47_spill] sm:$0xff] }
 0x4d8   :  { %3891 = vpow2.f32 %v3543_v22 }
 0x4d9   :  { %3893 = vtanh.f32 %v2213_v36 }
 0x4dd   :  { %v3886_v20 = vpop.eup %3885 }
 0x4de   :  { %v2238_v6 = vmul.f32 %v3886_v20, %v3884_v34  ;;  %v5876_v34 = vld [vmem:[#allocation48_spill] sm:$0xff]  ;;  %v5877_v20 = vld [vmem:[#allocation49_spill] sm:$0xff] }
 0x4e0   :  { %v3888_v9 = vpop.eup %3887  ;;  %v2263_v26 = vpack.c.bf16 %v2238_v6, %v2238_v6 }
 0x4e1   :  { %v3890_v33 = vpop.eup %3889  ;;  %v2242_v7 = vadd.f32 1.0, %v3888_v9 }
 0x4e2   :  { %v2248_v39 = vadd.f32 1.0, %v3890_v33  ;;  %2297 = vmatmul.mubr.bf16.vlgmr.msra.gmra.mrb[64].mxu0 %v2263_v26  ;;  %2338 = vmatmul.mubr.bf16.vlgmr.msra.gmra.mrb[64].mxu1 %v2263_v26  ;;  %v3892_v21 = vpop.eup %3891  ;;  %v5878_v33 = vld [vmem:[#allocation26_spill] sm:$0xff] }
 0x4e3   :  { %3895 = vrcp.f32 %v2242_v7  ;;  %2352 = vmatpush1.bf16.msra.mxu0 %v5201_v30  ;;  %2393 = vmatpush1.bf16.msra.mxu1 %v5204_v16  ;;  %v3894_v36 = vpop.eup %3893  ;;  %v2255_v40 = vadd.f32 1.0, %v3892_v21  ;;  %v5879_v7 = vld [vmem:[#allocation27_spill] sm:$0xff]  ;;  %v5881_v21 = vld [vmem:[#allocation29_spill] sm:$0xff] }
 0x4e4   :  { %3897 = vrcp.f32 %v2248_v39  ;;  %2353 = vmatprep.subr.bf16.mxu0 %v5207_v17  ;;  %2394 = vmatprep.subr.bf16.mxu1 %v5210_v14  ;;  %v5880_v39 = vld [vmem:[#allocation28_spill] sm:$0xff] }
 0x4e5   :  { %2383 = vmatprep.mubr.bf16.mxu0 %v5726_v1  ;;  %2424 = vmatprep.mubr.bf16.mxu1 %v5726_v1  ;;  %3899 = vrcp.f32 %v2255_v40  ;;  %v5886_v40 = vld [vmem:[#allocation34_spill] sm:$0xff] }
 0x4e7   :  { %2354 = vmatpush1.bf16.msra.mxu0 %v5215_v29  ;;  %2395 = vmatpush1.bf16.msra.mxu1 %v5218_v23 }
 0x4e8   :  { %2355 = vmatprep.subr.bf16.mxu0 %v5221_v15  ;;  %2396 = vmatprep.subr.bf16.mxu1 %v5224_v19 }
 0x4eb   :  { %2356 = vmatpush1.bf16.msra.mxu0 %v5227_v24  ;;  %2397 = vmatpush1.bf16.msra.mxu1 %v5230_v11 }
 0x4ec   :  { %2357 = vmatprep.subr.bf16.mxu0 %v5233_v41  ;;  %2398 = vmatprep.subr.bf16.mxu1 %v5236_v42 }
 0x4ed   :  { %v3896_v37 = vpop.eup %3895 }
 0x4ee   :  { %v3898_v10 = vpop.eup %3897  ;;  %v2259_v45 = vmul.f32 %v3896_v37, %v3894_v36  ;;  %v5882_v36 = vld [vmem:[#allocation30_spill] sm:$0xff]  ;;  %v5883_v37 = vld [vmem:[#allocation31_spill] sm:$0xff] }
 0x4ef   :  { %v2258_v27 = vmul.f32 %v3898_v10, %v5252_v51  ;;  %2358 = vmatpush1.bf16.msra.mxu0 %v5240_v46  ;;  %2399 = vmatpush1.bf16.msra.mxu1 %v5243_v48  ;;  %v5871_v51 = vld [vmem:[#allocation43_spill] sm:$0xff]  ;;  %v3900_v22 = vpop.eup %3899  ;;  %v5884_v10 = vld [vmem:[#allocation32_spill] sm:$0xff] }
 0x4f0   :  { %2359 = vmatprep.subr.bf16.mxu0 %v5246_v49  ;;  %2400 = vmatprep.subr.bf16.mxu1 %v5249_v50 }
 0x4f1   :  { %v5364_v28 = vadd.f32 %v2259_v45, %v2258_v27  ;;  %v5885_v45 = vld [vmem:[#allocation33_spill] sm:$0xff]  ;;  %v5887_v27 = vld [vmem:[#allocation35_spill] sm:$0xff] }
 0x4f3   :  { %2360 = vmatpush1.bf16.msra.mxu0 %v5254_v47  ;;  %2401 = vmatpush1.bf16.msra.mxu1 %v5257_v31  ;;  %3901 = vtanh.f32 %v5364_v28 }
 0x4f4   :  { %2361 = vmatprep.subr.bf16.mxu0 %v5261_v25  ;;  %2402 = vmatprep.subr.bf16.mxu1 %v5871_v51 }
 0x4f7   :  { %2362 = vmatpush1.bf16.msra.mxu0 %v5872_v13  ;;  %2403 = vmatpush1.bf16.msra.mxu1 %v5873_v38 }
 0x4f8   :  { %2363 = vmatprep.subr.bf16.mxu0 %v5874_v32  ;;  %2404 = vmatprep.subr.bf16.mxu1 %v5875_v35 }
 0x4fb   :  { %2364 = vmatpush1.bf16.msra.mxu0 %v5876_v34  ;;  %2405 = vmatpush1.bf16.msra.mxu1 %v5877_v20 }
 0x4fc   :  { %2365 = vmatprep.subr.bf16.mxu0 %v5285_v18  ;;  %2406 = vmatprep.subr.bf16.mxu1 %v5288_v12 }
 0x4fd   :  { %v3902_v6 = vpop.eup %3901 }
 0x4fe   :  { %v2262_v9 = vmul.f32 %v3902_v6, %v3900_v22  ;;  %v5888_v22 = vld [vmem:[#allocation36_spill] sm:$0xff]  ;;  %v5889_v6 = vld [vmem:[#allocation37_spill] sm:$0xff] }
 0x4ff   :  { %2366 = vmatpush1.bf16.msra.mxu0 %v5291_v43  ;;  %2407 = vmatpush1.bf16.msra.mxu1 %v5294_v44 }
 0x500   :  { %v2350_v26 = vpack.c.bf16 %v2262_v9, %v2262_v9  ;;  %2486 = vmatprep.subr.bf16.mxu0 %v5085_v52  ;;  %2527 = vmatprep.subr.bf16.mxu1 %v5088_v53  ;;  %v5890_v9 = vld [vmem:[#allocation38_spill] sm:$0xff] }
 0x502   :  { %2384 = vmatmul.mubr.bf16.vlgmr.msra.gmra.mrb[68].mxu0 %v2350_v26  ;;  %2425 = vmatmul.mubr.bf16.vlgmr.msra.gmra.mrb[68].mxu1 %v2350_v26  ;;  %v5891_v26 = vld [vmem:[#allocation39_spill] sm:$0xff] }
 0x503   :  { %2487 = vmatpush1.bf16.msra.mxu0 %v5091_v54  ;;  %2528 = vmatpush1.bf16.msra.mxu1 %v5094_v55 }
 0x504   :  { %2488 = vmatprep.subr.bf16.mxu0 %v5097_v0  ;;  %2529 = vmatprep.subr.bf16.mxu1 %v5100_v56 }
 0x505   :  { %2518 = vmatprep.mubr.bf16.mxu0 %v5726_v1  ;;  %2559 = vmatprep.mubr.bf16.mxu1 %v5726_v1 }
 0x507   :  { %2489 = vmatpush1.bf16.msra.mxu0 %v5105_v57  ;;  %2530 = vmatpush1.bf16.msra.mxu1 %v5108_v58 }
 0x508   :  { %2490 = vmatprep.subr.bf16.mxu0 %v5111_v59  ;;  %2531 = vmatprep.subr.bf16.mxu1 %v5114_v60 }
 0x50b   :  { %2491 = vmatpush1.bf16.msra.mxu0 %v5117_v61  ;;  %2532 = vmatpush1.bf16.msra.mxu1 %v5120_v62 }
 0x50c   :  { %2492 = vmatprep.subr.bf16.mxu0 %v5123_v63  ;;  %2533 = vmatprep.subr.bf16.mxu1 %v5126_v2 }
 0x50f   :  { %2493 = vmatpush1.bf16.msra.mxu0 %v5129_v3  ;;  %2534 = vmatpush1.bf16.msra.mxu1 %v5132_v4  ;;  %v5898_v4 = vld [vmem:[#allocation69_spill] sm:$0xff] }
 0x510   :  { %2494 = vmatprep.subr.bf16.mxu0 %v5135_v5  ;;  %2535 = vmatprep.subr.bf16.mxu1 %v5878_v33  ;;  %v5897_v5 = vld [vmem:[#allocation66_spill] sm:$0xff] }
 0x513   :  { %2495 = vmatpush1.bf16.msra.mxu0 %v5879_v7  ;;  %2536 = vmatpush1.bf16.msra.mxu1 %v5880_v39  ;;  %v5895_v39 = vld [vmem:[#allocation65_spill] sm:$0xff]  ;;  %v5896_v7 = vld [vmem:[#allocation67_spill] sm:$0xff] }
 0x514   :  { %2496 = vmatprep.subr.bf16.mxu0 %v5881_v21  ;;  %2537 = vmatprep.subr.bf16.mxu1 %v5882_v36  ;;  %v5892_v21 = vld [vmem:[#allocation40_spill] sm:$0xff]  ;;  %v5893_v36 = vld [vmem:[#allocation41_spill] sm:$0xff] }
 0x517   :  { %2497 = vmatpush1.bf16.msra.mxu0 %v5883_v37  ;;  %2538 = vmatpush1.bf16.msra.mxu1 %v5884_v10  ;;  %v5894_v37 = vld [vmem:[#allocation42_spill] sm:$0xff] }
 0x518   :  { %2498 = vmatprep.subr.bf16.mxu0 %v5885_v45  ;;  %2539 = vmatprep.subr.bf16.mxu1 %v5886_v40 }
 0x51b   :  { %2499 = vmatpush1.bf16.msra.mxu0 %v5887_v27  ;;  %2540 = vmatpush1.bf16.msra.mxu1 %v5888_v22 }
 0x51c   :  { %2500 = vmatprep.subr.bf16.mxu0 %v5889_v6  ;;  %2541 = vmatprep.subr.bf16.mxu1 %v5890_v9 }
 0x51f   :  { %2501 = vmatpush1.bf16.msra.mxu0 %v5891_v26  ;;  %2542 = vmatpush1.bf16.msra.mxu1 %v5892_v21 }
 0x520   :  { %2573 = vmatprep.subr.bf16.mxu0 %v5893_v36  ;;  %2614 = vmatprep.subr.bf16.mxu1 %v5894_v37 }
 0x5b5   :  { %v2298_v10 = vpop.f32.mrb[64].mxu0  ;;  %v2339_v45 = vpop.f32.mrb[64].mxu1 }
 0x5b6   :  { %v2346_v40 = vadd.f32 %v2298_v10, %v5895_v39  ;;  %v2348_v27 = vadd.f32 %v2339_v45, %v5896_v7  ;;  %v2300_v33 = vpop.f32.mrb[65].mxu0  ;;  %v2341_v22 = vpop.f32.mrb[65].mxu1 }
 0x5b7   :  { %v2347_v6 = vadd.f32 %v2300_v33, %v5897_v5  ;;  %v2349_v9 = vadd.f32 %v2341_v22, %v5898_v4  ;;  %v2302_v3 = vpop.f32.mrb[66].mxu0  ;;  %v2343_v26 = vpop.f32.mrb[66].mxu1 }
 0x5b8   :  { %v3544_v2 = vmul.f32 -1.442695, %v2346_v40  ;;  %v2303_v21 = vpop.f32.mrb[67].mxu0  ;;  %v2344_v63 = vpop.f32.mrb[67].mxu1  ;;  %v5899_v40 = vld [vmem:[#allocation92_spill] sm:$0xff] }
 0x5b9   :  { %v3545_v36 = vmul.f32 -1.442695, %v2347_v6  ;;  %v3546_v37 = vmul.f32 -1.442695, %v2349_v9  ;;  %v5901_v6 = vld [vmem:[#allocation94_spill] sm:$0xff]  ;;  %v5902_v26 = vld [vmem:[#allocation96_spill] sm:$0xff] }
 0x5ba   :  { %3903 = vpow2.f32 %v3544_v2 }
 0x5bb   :  { %3905 = vpow2.f32 %v3545_v36 }
 0x5bc   :  { %3907 = vpow2.f32 %v3546_v37  ;;  %v5900_v37 = vld [vmem:[#allocation95_spill] sm:$0xff] }
 0x5bd   :  { %3909 = vtanh.f32 %v2348_v27 }
 0x5c4   :  { %v3904_v62 = vpop.eup %3903 }
 0x5c5   :  { %v3906_v61 = vpop.eup %3905  ;;  %v2440_v39 = vadd.f32 1.0, %v3904_v62 }
 0x5c6   :  { %v2446_v7 = vadd.f32 1.0, %v3906_v61  ;;  %v3908_v5 = vpop.eup %3907 }
 0x5c7   :  { %3911 = vrcp.f32 %v2440_v39  ;;  %v3910_v33 = vpop.eup %3909  ;;  %v2453_v45 = vadd.f32 1.0, %v3908_v5 }
 0x5c8   :  { %3913 = vrcp.f32 %v2446_v7 }
 0x5c9   :  { %3915 = vrcp.f32 %v2453_v45 }
 0x5d1   :  { %v3912_v4 = vpop.eup %3911 }
 0x5d2   :  { %v3914_v3 = vpop.eup %3913  ;;  %v2457_v10 = vmul.f32 %v3912_v4, %v3910_v33 }
 0x5d3   :  { %v2456_v63 = vmul.f32 %v3914_v3, %v5338_v8 }
 0x5d5   :  { %v5422_v21 = vadd.f32 %v2457_v10, %v2456_v63  ;;  %v2385_v2 = vpop.f32.mrb[68].mxu0  ;;  %v2426_v36 = vpop.f32.mrb[68].mxu1 }
 0x5d6   :  { %v2433_v62 = vadd.f32 %v2385_v2, %v5899_v40  ;;  %v2435_v27 = vadd.f32 %v2426_v36, %v5900_v37  ;;  %v2387_v61 = vpop.f32.mrb[69].mxu0  ;;  %v2428_v22 = vpop.f32.mrb[69].mxu1 }
 0x5d7   :  { %v2434_v9 = vadd.f32 %v2387_v61, %v5901_v6  ;;  %v2436_v39 = vadd.f32 %v2428_v22, %v5902_v26  ;;  %v2389_v7 = vpop.f32.mrb[70].mxu0  ;;  %v2430_v33 = vpop.f32.mrb[70].mxu1  ;;  %3917 = vtanh.f32 %v5422_v21 }
 0x5d8   :  { %v3547_v8 = vmul.f32 -1.442695, %v2433_v62  ;;  %v2390_v5 = vpop.f32.mrb[71].mxu0  ;;  %v2431_v4 = vpop.f32.mrb[71].mxu1 }
 0x5d9   :  { %v3548_v3 = vmul.f32 -1.442695, %v2434_v9  ;;  %v3916_v10 = vpop.eup %3915  ;;  %v3549_v63 = vmul.f32 -1.442695, %v2436_v39 }
 0x5da   :  { %3919 = vpow2.f32 %v3547_v8 }
 0x5db   :  { %3921 = vpow2.f32 %v3548_v3  ;;  %v5909_v3 = vld [vmem:[#allocation25_spill] sm:$0xff] }
 0x5dc   :  { %3923 = vpow2.f32 %v3549_v63  ;;  %v5916_v63 = vld [vmem:[#allocation32_spill] sm:$0xff] }
 0x5dd   :  { %3925 = vtanh.f32 %v2435_v27 }
 0x5e1   :  { %v3918_v45 = vpop.eup %3917 }
 0x5e2   :  { %v2460_v2 = vmul.f32 %v3918_v45, %v3916_v10  ;;  %v5914_v10 = vld [vmem:[#allocation30_spill] sm:$0xff]  ;;  %v5915_v45 = vld [vmem:[#allocation31_spill] sm:$0xff] }
 0x5e4   :  { %v3920_v36 = vpop.eup %3919  ;;  %v2485_v40 = vpack.c.bf16 %v2460_v2, %v2460_v2  ;;  %v5917_v2 = vld [vmem:[#allocation33_spill] sm:$0xff] }
 0x5e5   :  { %v3922_v37 = vpop.eup %3921  ;;  %v2464_v61 = vadd.f32 1.0, %v3920_v36  ;;  %v5918_v36 = vld [vmem:[#allocation34_spill] sm:$0xff] }
 0x5e6   :  { %v2470_v22 = vadd.f32 1.0, %v3922_v37  ;;  %2519 = vmatmul.mubr.bf16.vlgmr.msra.gmra.mrb[72].mxu0 %v2485_v40  ;;  %2560 = vmatmul.mubr.bf16.vlgmr.msra.gmra.mrb[72].mxu1 %v2485_v40  ;;  %v3924_v62 = vpop.eup %3923  ;;  %v5919_v40 = vld [vmem:[#allocation35_spill] sm:$0xff]  ;;  %v5920_v37 = vld [vmem:[#allocation36_spill] sm:$0xff] }
 0x5e7   :  { %3927 = vrcp.f32 %v2464_v61  ;;  %2574 = vmatpush1.bf16.msra.mxu0 %v5201_v30  ;;  %2615 = vmatpush1.bf16.msra.mxu1 %v5204_v16  ;;  %v3926_v27 = vpop.eup %3925  ;;  %v2477_v39 = vadd.f32 1.0, %v3924_v62  ;;  %v5921_v61 = vld [vmem:[#allocation37_spill] sm:$0xff]  ;;  %v5923_v62 = vld [vmem:[#allocation39_spill] sm:$0xff] }
 0x5e8   :  { %3929 = vrcp.f32 %v2470_v22  ;;  %2575 = vmatprep.subr.bf16.mxu0 %v5207_v17  ;;  %2616 = vmatprep.subr.bf16.mxu1 %v5210_v14  ;;  %v5922_v22 = vld [vmem:[#allocation38_spill] sm:$0xff] }
 0x5e9   :  { %2605 = vmatprep.mubr.bf16.mxu0 %v5726_v1  ;;  %2646 = vmatprep.mubr.bf16.mxu1 %v5726_v1  ;;  %3931 = vrcp.f32 %v2477_v39 }
 0x5eb   :  { %2576 = vmatpush1.bf16.msra.mxu0 %v5215_v29  ;;  %2617 = vmatpush1.bf16.msra.mxu1 %v5218_v23 }
 0x5ec   :  { %2577 = vmatprep.subr.bf16.mxu0 %v5221_v15  ;;  %2618 = vmatprep.subr.bf16.mxu1 %v5224_v19 }
 0x5ef   :  { %2578 = vmatpush1.bf16.msra.mxu0 %v5227_v24  ;;  %2619 = vmatpush1.bf16.msra.mxu1 %v5230_v11 }
 0x5f0   :  { %2579 = vmatprep.subr.bf16.mxu0 %v5233_v41  ;;  %2620 = vmatprep.subr.bf16.mxu1 %v5236_v42 }
 0x5f1   :  { %v3928_v6 = vpop.eup %3927 }
 0x5f2   :  { %v3930_v9 = vpop.eup %3929  ;;  %v2481_v26 = vmul.f32 %v3928_v6, %v3926_v27  ;;  %v5924_v27 = vld [vmem:[#allocation40_spill] sm:$0xff]  ;;  %v5925_v6 = vld [vmem:[#allocation41_spill] sm:$0xff] }
 0x5f3   :  { %v2480_v7 = vmul.f32 %v3930_v9, %v5364_v28  ;;  %2580 = vmatpush1.bf16.msra.mxu0 %v5240_v46  ;;  %2621 = vmatpush1.bf16.msra.mxu1 %v5243_v48  ;;  %v3932_v28 = vpop.eup %3931  ;;  %v5926_v9 = vld [vmem:[#allocation42_spill] sm:$0xff] }
 0x5f4   :  { %2581 = vmatprep.subr.bf16.mxu0 %v5246_v49  ;;  %2622 = vmatprep.subr.bf16.mxu1 %v5249_v50 }
 0x5f5   :  { %v5448_v33 = vadd.f32 %v2481_v26, %v2480_v7  ;;  %v5927_v7 = vld [vmem:[#allocation68_spill] sm:$0xff] }
 0x5f7   :  { %2582 = vmatpush1.bf16.msra.mxu0 %v5254_v47  ;;  %2623 = vmatpush1.bf16.msra.mxu1 %v5257_v31  ;;  %3933 = vtanh.f32 %v5448_v33 }
 0x5f8   :  { %2583 = vmatprep.subr.bf16.mxu0 %v5261_v25  ;;  %2624 = vmatprep.subr.bf16.mxu1 %v5871_v51 }
 0x5fb   :  { %2584 = vmatpush1.bf16.msra.mxu0 %v5872_v13  ;;  %2625 = vmatpush1.bf16.msra.mxu1 %v5873_v38 }
 0x5fc   :  { %2585 = vmatprep.subr.bf16.mxu0 %v5874_v32  ;;  %2626 = vmatprep.subr.bf16.mxu1 %v5875_v35 }
 0x5ff   :  { %2586 = vmatpush1.bf16.msra.mxu0 %v5876_v34  ;;  %2627 = vmatpush1.bf16.msra.mxu1 %v5877_v20 }
 0x600   :  { %2587 = vmatprep.subr.bf16.mxu0 %v5285_v18  ;;  %2628 = vmatprep.subr.bf16.mxu1 %v5288_v12 }
 0x601   :  { %v3934_v8 = vpop.eup %3933 }
 0x602   :  { %v2484_v5 = vmul.f32 %v3934_v8, %v3932_v28  ;;  %v5928_v8 = vld [vmem:[#allocation71_spill] sm:$0xff] }
 0x603   :  { %2588 = vmatpush1.bf16.msra.mxu0 %v5291_v43  ;;  %2629 = vmatpush1.bf16.msra.mxu1 %v5294_v44 }
 0x604   :  { %v2572_v4 = vpack.c.bf16 %v2484_v5, %v2484_v5  ;;  %2708 = vmatprep.subr.bf16.mxu0 %v5085_v52  ;;  %2749 = vmatprep.subr.bf16.mxu1 %v5088_v53  ;;  %v5903_v52 = vld [vmem:[#allocation52_spill] sm:$0xff] }
 0x605   :  { %v5904_v53 = vld [vmem:[#allocation20_spill] sm:$0xff] }
 0x606   :  { %2606 = vmatmul.mubr.bf16.vlgmr.msra.gmra.mrb[76].mxu0 %v2572_v4  ;;  %2647 = vmatmul.mubr.bf16.vlgmr.msra.gmra.mrb[76].mxu1 %v2572_v4 }
 0x607   :  { %2709 = vmatpush1.bf16.msra.mxu0 %v5091_v54  ;;  %2750 = vmatpush1.bf16.msra.mxu1 %v5094_v55  ;;  %v5905_v54 = vld [vmem:[#allocation21_spill] sm:$0xff]  ;;  %v5906_v55 = vld [vmem:[#allocation22_spill] sm:$0xff] }
 0x608   :  { %2710 = vmatprep.subr.bf16.mxu0 %v5097_v0  ;;  %2751 = vmatprep.subr.bf16.mxu1 %v5100_v56  ;;  %v5907_v0 = vld [vmem:[#allocation23_spill] sm:$0xff]  ;;  %v5908_v56 = vld [vmem:[#allocation24_spill] sm:$0xff] }
 0x609   :  { %2740 = vmatprep.mubr.bf16.mxu0 %v5726_v1  ;;  %2781 = vmatprep.mubr.bf16.mxu1 %v5726_v1 }
 0x60b   :  { %2711 = vmatpush1.bf16.msra.mxu0 %v5105_v57  ;;  %2752 = vmatpush1.bf16.msra.mxu1 %v5108_v58  ;;  %v5910_v57 = vld [vmem:[#allocation26_spill] sm:$0xff]  ;;  %v5911_v58 = vld [vmem:[#allocation27_spill] sm:$0xff] }
 0x60c   :  { %2712 = vmatprep.subr.bf16.mxu0 %v5111_v59  ;;  %2753 = vmatprep.subr.bf16.mxu1 %v5114_v60  ;;  %v5912_v59 = vld [vmem:[#allocation28_spill] sm:$0xff]  ;;  %v5913_v60 = vld [vmem:[#allocation29_spill] sm:$0xff] }
 0x60f   :  { %2713 = vmatpush1.bf16.msra.mxu0 %v5903_v52  ;;  %2754 = vmatpush1.bf16.msra.mxu1 %v5904_v53  ;;  %v5929_v53 = vld [vmem:[#allocation70_spill] sm:$0xff] }
 0x610   :  { %2714 = vmatprep.subr.bf16.mxu0 %v5905_v54  ;;  %2755 = vmatprep.subr.bf16.mxu1 %v5906_v55  ;;  %v5930_v55 = vld [vmem:[#allocation72_spill] sm:$0xff] }
 0x613   :  { %2715 = vmatpush1.bf16.msra.mxu0 %v5907_v0  ;;  %2756 = vmatpush1.bf16.msra.mxu1 %v5908_v56 }
 0x614   :  { %2716 = vmatprep.subr.bf16.mxu0 %v5909_v3  ;;  %2757 = vmatprep.subr.bf16.mxu1 %v5910_v57 }
 0x617   :  { %2717 = vmatpush1.bf16.msra.mxu0 %v5911_v58  ;;  %2758 = vmatpush1.bf16.msra.mxu1 %v5912_v59 }
 0x618   :  { %2718 = vmatprep.subr.bf16.mxu0 %v5913_v60  ;;  %2759 = vmatprep.subr.bf16.mxu1 %v5914_v10 }
 0x61b   :  { %2719 = vmatpush1.bf16.msra.mxu0 %v5915_v45  ;;  %2760 = vmatpush1.bf16.msra.mxu1 %v5916_v63 }
 0x61c   :  { %2720 = vmatprep.subr.bf16.mxu0 %v5917_v2  ;;  %2761 = vmatprep.subr.bf16.mxu1 %v5918_v36 }
 0x61f   :  { %2721 = vmatpush1.bf16.msra.mxu0 %v5919_v40  ;;  %2762 = vmatpush1.bf16.msra.mxu1 %v5920_v37 }
 0x620   :  { %2722 = vmatprep.subr.bf16.mxu0 %v5921_v61  ;;  %2763 = vmatprep.subr.bf16.mxu1 %v5922_v22 }
 0x623   :  { %2723 = vmatpush1.bf16.msra.mxu0 %v5923_v62  ;;  %2764 = vmatpush1.bf16.msra.mxu1 %v5924_v27 }
 0x624   :  { %2795 = vmatprep.subr.bf16.mxu0 %v5925_v6  ;;  %2836 = vmatprep.subr.bf16.mxu1 %v5926_v9 }
 0x6b9   :  { %v2520_v26 = vpop.f32.mrb[72].mxu0  ;;  %v2561_v39 = vpop.f32.mrb[72].mxu1 }
 0x6ba   :  { %v2568_v28 = vadd.f32 %v2520_v26, %v5927_v7  ;;  %v2570_v5 = vadd.f32 %v2561_v39, %v5928_v8  ;;  %v2522_v4 = vpop.f32.mrb[73].mxu0  ;;  %v2563_v52 = vpop.f32.mrb[73].mxu1  ;;  %v5931_v7 = vld [vmem:[#allocation89_spill] sm:$0xff]  ;;  %v5932_v8 = vld [vmem:[#allocation91_spill] sm:$0xff] }
 0x6bb   :  { %v2569_v54 = vadd.f32 %v2522_v4, %v5929_v53  ;;  %v2571_v0 = vadd.f32 %v2563_v52, %v5930_v55  ;;  %v2524_v56 = vpop.f32.mrb[74].mxu0  ;;  %v2565_v3 = vpop.f32.mrb[74].mxu1  ;;  %v5933_v53 = vld [vmem:[#allocation90_spill] sm:$0xff]  ;;  %v5934_v55 = vld [vmem:[#allocation93_spill] sm:$0xff] }
 0x6bc   :  { %v3550_v57 = vmul.f32 -1.442695, %v2568_v28  ;;  %v2525_v58 = vpop.f32.mrb[75].mxu0  ;;  %v2566_v59 = vpop.f32.mrb[75].mxu1 }
 0x6bd   :  { %v3551_v60 = vmul.f32 -1.442695, %v2569_v54  ;;  %v3552_v10 = vmul.f32 -1.442695, %v2571_v0 }
 0x6be   :  { %3935 = vpow2.f32 %v3550_v57 }
 0x6bf   :  { %3937 = vpow2.f32 %v3551_v60 }
 0x6c0   :  { %3939 = vpow2.f32 %v3552_v10 }
 0x6c1   :  { %3941 = vtanh.f32 %v2570_v5 }
 0x6c8   :  { %v3936_v45 = vpop.eup %3935 }
 0x6c9   :  { %v3938_v63 = vpop.eup %3937  ;;  %v2662_v2 = vadd.f32 1.0, %v3936_v45 }
 0x6ca   :  { %v2668_v36 = vadd.f32 1.0, %v3938_v63  ;;  %v3940_v40 = vpop.eup %3939 }
 0x6cb   :  { %3943 = vrcp.f32 %v2662_v2  ;;  %v3942_v37 = vpop.eup %3941  ;;  %v2675_v27 = vadd.f32 1.0, %v3940_v40 }
 0x6cc   :  { %3945 = vrcp.f32 %v2668_v36 }
 0x6cd   :  { %3947 = vrcp.f32 %v2675_v27  ;;  %v4116_v27 = vld [vmem:[#allocation9 + $0xac] ss:$16 sps:$4 sm:$0xff]  }
 0x6d5   :  { %v3944_v61 = vpop.eup %3943 }
 0x6d6   :  { %v3946_v22 = vpop.eup %3945  ;;  %v2679_v62 = vmul.f32 %v3944_v61, %v3942_v37 }
 0x6d7   :  { %v2678_v6 = vmul.f32 %v3946_v22, %v5422_v21  ;;  %v3948_v60 = vpop.eup %3947 }
 0x6d9   :  { %v5506_v9 = vadd.f32 %v2679_v62, %v2678_v6  ;;  %v2607_v26 = vpop.f32.mrb[76].mxu0  ;;  %v2648_v39 = vpop.f32.mrb[76].mxu1  ;;  %v4115_v62 = vld [vmem:[#allocation9 + $0xa4] ss:$16 sps:$4 sm:$0xff]   ;;  %v4117_v6 = vld [vmem:[#allocation9 + $0xa0] ss:$16 sps:$4 sm:$0xff]  }
 0x6da   :  { %v2655_v28 = vadd.f32 %v2607_v26, %v5931_v7  ;;  %v2657_v5 = vadd.f32 %v2648_v39, %v5932_v8  ;;  %v2609_v4 = vpop.f32.mrb[77].mxu0  ;;  %v2650_v52 = vpop.f32.mrb[77].mxu1  ;;  %v4118_v26 = vld [vmem:[#allocation9 + $0xa8] ss:$16 sps:$4 sm:$0xff]   ;;  %v4119_v39 = vld [vmem:[#allocation9 + $0xc4] ss:$16 sps:$4 sm:$0xff]  }
 0x6db   :  { %v2656_v54 = vadd.f32 %v2609_v4, %v5933_v53  ;;  %v2658_v0 = vadd.f32 %v2650_v52, %v5934_v55  ;;  %v2611_v56 = vpop.f32.mrb[78].mxu0  ;;  %v2652_v3 = vpop.f32.mrb[78].mxu1  ;;  %3949 = vtanh.f32 %v5506_v9  ;;  %v4120_v7 = vld [vmem:[#allocation9 + $0xcc] ss:$16 sps:$4 sm:$0xff]   ;;  %v4122_v8 = vld [vmem:[#allocation9 + $0xc8] ss:$16 sps:$4 sm:$0xff]  }
 0x6dc   :  { %v3553_v21 = vmul.f32 -1.442695, %v2655_v28  ;;  %v2612_v57 = vpop.f32.mrb[79].mxu0  ;;  %v2653_v58 = vpop.f32.mrb[79].mxu1  ;;  %v4121_v28 = vld [vmem:[#allocation9 + $0xc0] ss:$16 sps:$4 sm:$0xff]  }
 0x6dd   :  { %v3554_v59 = vmul.f32 -1.442695, %v2656_v54  ;;  %v3555_v45 = vmul.f32 -1.442695, %v2658_v0  ;;  %v4124_v4 = vld [vmem:[#allocation9 + $0xec] ss:$16 sps:$4 sm:$0xff]  }
 0x6de   :  { %3951 = vpow2.f32 %v3553_v21  ;;  %v4125_v52 = vld [vmem:[#allocation9 + $0xe0] ss:$16 sps:$4 sm:$0xff]   ;;  %v4126_v53 = vld [vmem:[#allocation9 + $0xe8] ss:$16 sps:$4 sm:$0xff]   ;;  %v4127_v54 = vld [vmem:[#allocation11 + $0x4] ss:$16 sps:$4 sm:$0xff]  }
 0x6df   :  { %3953 = vpow2.f32 %v3554_v59  ;;  %v4128_v55 = vld [vmem:[#allocation11 + $0xc] ss:$16 sps:$4 sm:$0xff]   ;;  %v5935_v3 = vld [vmem:[#allocation73_spill] sm:$0xff]  ;;  %v5936_v57 = vld [vmem:[#allocation75_spill] sm:$0xff] }
 0x6e0   :  { %3955 = vpow2.f32 %v3555_v45 }
 0x6e1   :  { %3957 = vtanh.f32 %v2657_v5  ;;  %v4123_v5 = vld [vmem:[#allocation9 + $0xe4] ss:$16 sps:$4 sm:$0xff]  }
 0x6e5   :  { %v3950_v10 = vpop.eup %3949 }
 0x6e6   :  { %v2682_v63 = vmul.f32 %v3950_v10, %v3948_v60  ;;  %v5937_v10 = vld [vmem:[#allocation74_spill] sm:$0xff] }
 0x6e8   :  { %v3952_v2 = vpop.eup %3951  ;;  %v2707_v36 = vpack.c.bf16 %v2682_v63, %v2682_v63  ;;  %v5938_v63 = vld [vmem:[#allocation77_spill] sm:$0xff] }
 0x6e9   :  { %v3954_v40 = vpop.eup %3953  ;;  %v2686_v37 = vadd.f32 1.0, %v3952_v2 }
 0x6ea   :  { %v2692_v61 = vadd.f32 1.0, %v3954_v40  ;;  %2741 = vmatmul.mubr.bf16.vlgmr.msra.gmra.mrb[80].mxu0 %v2707_v36  ;;  %2782 = vmatmul.mubr.bf16.vlgmr.msra.gmra.mrb[80].mxu1 %v2707_v36 }
 0x6eb   :  { %3959 = vrcp.f32 %v2686_v37  ;;  %2796 = vmatpush1.bf16.msra.mxu0 %v5201_v30  ;;  %2837 = vmatpush1.bf16.msra.mxu1 %v5204_v16  ;;  %v3956_v30 = vpop.eup %3955 }
 0x6ec   :  { %3961 = vrcp.f32 %v2692_v61  ;;  %2797 = vmatprep.subr.bf16.mxu0 %v5207_v17  ;;  %2838 = vmatprep.subr.bf16.mxu1 %v5210_v14  ;;  %v3958_v16 = vpop.eup %3957 }
 0x6ed   :  { %2827 = vmatprep.mubr.bf16.mxu0 %v5726_v1  ;;  %2868 = vmatprep.mubr.bf16.mxu1 %v5726_v1 }
 0x6ef   :  { %2798 = vmatpush1.bf16.msra.mxu0 %v5215_v29  ;;  %2839 = vmatpush1.bf16.msra.mxu1 %v5218_v23  ;;  %v2699_v29 = vadd.f32 1.0, %v3956_v30 }
 0x6f0   :  { %2799 = vmatprep.subr.bf16.mxu0 %v5221_v15  ;;  %2840 = vmatprep.subr.bf16.mxu1 %v5224_v19 }
 0x6f1   :  { %3963 = vrcp.f32 %v2699_v29 }
 0x6f3   :  { %2800 = vmatpush1.bf16.msra.mxu0 %v5227_v24  ;;  %2841 = vmatpush1.bf16.msra.mxu1 %v5230_v11 }
 0x6f4   :  { %2801 = vmatprep.subr.bf16.mxu0 %v5233_v41  ;;  %2842 = vmatprep.subr.bf16.mxu1 %v5236_v42  ;;  %v4095_v42 = vld [vmem:[#allocation9 + $0x4] ss:$16 sps:$4 sm:$0xff]  }
 0x6f5   :  { %v3960_v17 = vpop.eup %3959 }
 0x6f6   :  { %v3962_v14 = vpop.eup %3961  ;;  %v2703_v22 = vmul.f32 %v3960_v17, %v3958_v16 }
 0x6f7   :  { %v2702_v23 = vmul.f32 %v3962_v14, %v5448_v33  ;;  %2802 = vmatpush1.bf16.msra.mxu0 %v5240_v46  ;;  %2843 = vmatpush1.bf16.msra.mxu1 %v5243_v48  ;;  %v4096_v46 = vld [vmem:[#allocation9 + $0xc] ss:$16 sps:$4 sm:$0xff]   ;;  %v4097_v48 = vld [vmem:[#allocation9] ss:$16 sps:$4 sm:$0xff]   ;;  %v4114_v33 = vld [vmem:[#allocation9 + $0x88] ss:$16 sps:$4 sm:$0xff]  }
 0x6f8   :  { %2803 = vmatprep.subr.bf16.mxu0 %v5246_v49  ;;  %2844 = vmatprep.subr.bf16.mxu1 %v5249_v50  ;;  %v4098_v49 = vld [vmem:[#allocation9 + $0x8] ss:$16 sps:$4 sm:$0xff]   ;;  %v4099_v50 = vld [vmem:[#allocation9 + $0x24] ss:$16 sps:$4 sm:$0xff]  }
 0x6f9   :  { %v5532_v15 = vadd.f32 %v2703_v22, %v2702_v23 }
 0x6fb   :  { %2804 = vmatpush1.bf16.msra.mxu0 %v5254_v47  ;;  %2845 = vmatpush1.bf16.msra.mxu1 %v5257_v31  ;;  %3965 = vtanh.f32 %v5532_v15  ;;  %v3964_v19 = vpop.eup %3963  ;;  %v4100_v47 = vld [vmem:[#allocation9 + $0x2c] ss:$16 sps:$4 sm:$0xff]   ;;  %v4101_v31 = vld [vmem:[#allocation9 + $0x20] ss:$16 sps:$4 sm:$0xff]  }
 0x6fc   :  { %2805 = vmatprep.subr.bf16.mxu0 %v5261_v25  ;;  %2846 = vmatprep.subr.bf16.mxu1 %v5871_v51  ;;  %v4102_v25 = vld [vmem:[#allocation9 + $0x28] ss:$16 sps:$4 sm:$0xff]   ;;  %v4107_v51 = vld [vmem:[#allocation9 + $0x64] ss:$16 sps:$4 sm:$0xff]  }
 0x6ff   :  { %2806 = vmatpush1.bf16.msra.mxu0 %v5872_v13  ;;  %2847 = vmatpush1.bf16.msra.mxu1 %v5873_v38  ;;  %v4108_v13 = vld [vmem:[#allocation9 + $0x6c] ss:$16 sps:$4 sm:$0xff]   ;;  %v4109_v38 = vld [vmem:[#allocation9 + $0x60] ss:$16 sps:$4 sm:$0xff]  }
 0x700   :  { %2807 = vmatprep.subr.bf16.mxu0 %v5874_v32  ;;  %2848 = vmatprep.subr.bf16.mxu1 %v5875_v35  ;;  %v4110_v32 = vld [vmem:[#allocation9 + $0x68] ss:$16 sps:$4 sm:$0xff]   ;;  %v4111_v35 = vld [vmem:[#allocation9 + $0x84] ss:$16 sps:$4 sm:$0xff]  }
 0x703   :  { %2808 = vmatpush1.bf16.msra.mxu0 %v5876_v34  ;;  %2849 = vmatpush1.bf16.msra.mxu1 %v5877_v20  ;;  %v4112_v34 = vld [vmem:[#allocation9 + $0x8c] ss:$16 sps:$4 sm:$0xff]   ;;  %v4113_v20 = vld [vmem:[#allocation9 + $0x80] ss:$16 sps:$4 sm:$0xff]  }
 0x704   :  { %2809 = vmatprep.subr.bf16.mxu0 %v5285_v18  ;;  %2850 = vmatprep.subr.bf16.mxu1 %v5288_v12  ;;  %v4103_v18 = vld [vmem:[#allocation9 + $0x44] ss:$16 sps:$4 sm:$0xff]   ;;  %v4104_v12 = vld [vmem:[#allocation9 + $0x4c] ss:$16 sps:$4 sm:$0xff]  }
 0x705   :  { %v3966_v24 = vpop.eup %3965 }
 0x706   :  { %v2706_v11 = vmul.f32 %v3966_v24, %v3964_v19 }
 0x707   :  { %2810 = vmatpush1.bf16.msra.mxu0 %v5291_v43  ;;  %2851 = vmatpush1.bf16.msra.mxu1 %v5294_v44  ;;  %v4105_v43 = vld [vmem:[#allocation9 + $0x40] ss:$16 sps:$4 sm:$0xff]   ;;  %v4106_v44 = vld [vmem:[#allocation9 + $0x48] ss:$16 sps:$4 sm:$0xff]  }
 0x708   :  { %v2794_v41 = vpack.c.bf16 %v2706_v11, %v2706_v11  ;;  %2930 = vmatprep.subr.bf16.mxu0 %v4095_v42  ;;  %2971 = vmatprep.subr.bf16.mxu1 %v4096_v46 }
 0x70a   :  { %2828 = vmatmul.mubr.bf16.vlgmr.msra.gmra.mrb[84].mxu0 %v2794_v41  ;;  %2869 = vmatmul.mubr.bf16.vlgmr.msra.gmra.mrb[84].mxu1 %v2794_v41 }
 0x70b   :  { %2931 = vmatpush1.bf16.msra.mxu0 %v4097_v48  ;;  %2972 = vmatpush1.bf16.msra.mxu1 %v4098_v49 }
 0x70c   :  { %2932 = vmatprep.subr.bf16.mxu0 %v4099_v50  ;;  %2973 = vmatprep.subr.bf16.mxu1 %v4100_v47 }
 0x70d   :  { %2962 = vmatprep.mubr.bf16.mxu0 %v5726_v1  ;;  %3003 = vmatprep.mubr.bf16.mxu1 %v5726_v1 }
 0x70f   :  { %2933 = vmatpush1.bf16.msra.mxu0 %v4101_v31  ;;  %2974 = vmatpush1.bf16.msra.mxu1 %v4102_v25  ;;  %v5939_v31 = vld [vmem:[#allocation84_spill] sm:$0xff] }
 0x710   :  { %2934 = vmatprep.subr.bf16.mxu0 %v4103_v18  ;;  %2975 = vmatprep.subr.bf16.mxu1 %v4104_v12  ;;  %v5940_v18 = vld [vmem:[#allocation87_spill] sm:$0xff] }
 0x713   :  { %2935 = vmatpush1.bf16.msra.mxu0 %v4105_v43  ;;  %2976 = vmatpush1.bf16.msra.mxu1 %v4106_v44 }
 0x714   :  { %2936 = vmatprep.subr.bf16.mxu0 %v4107_v51  ;;  %2977 = vmatprep.subr.bf16.mxu1 %v4108_v13  ;;  %v5941_v51 = vld [vmem:[#allocation86_spill] sm:$0xff] }
 0x717   :  { %2937 = vmatpush1.bf16.msra.mxu0 %v4109_v38  ;;  %2978 = vmatpush1.bf16.msra.mxu1 %v4110_v32  ;;  %v5942_v38 = vld [vmem:[#allocation88_spill] sm:$0xff] }
 0x718   :  { %2938 = vmatprep.subr.bf16.mxu0 %v4111_v35  ;;  %2979 = vmatprep.subr.bf16.mxu1 %v4112_v34 }
 0x71b   :  { %2939 = vmatpush1.bf16.msra.mxu0 %v4113_v20  ;;  %2980 = vmatpush1.bf16.msra.mxu1 %v4114_v33 }
 0x71c   :  { %2940 = vmatprep.subr.bf16.mxu0 %v4115_v62  ;;  %2981 = vmatprep.subr.bf16.mxu1 %v4116_v27 }
 0x71f   :  { %2941 = vmatpush1.bf16.msra.mxu0 %v4117_v6  ;;  %2982 = vmatpush1.bf16.msra.mxu1 %v4118_v26 }
 0x720   :  { %2942 = vmatprep.subr.bf16.mxu0 %v4119_v39  ;;  %2983 = vmatprep.subr.bf16.mxu1 %v4120_v7 }
 0x723   :  { %2943 = vmatpush1.bf16.msra.mxu0 %v4121_v28  ;;  %2984 = vmatpush1.bf16.msra.mxu1 %v4122_v8 }
 0x724   :  { %2944 = vmatprep.subr.bf16.mxu0 %v4123_v5  ;;  %2985 = vmatprep.subr.bf16.mxu1 %v4124_v4 }
 0x727   :  { %2945 = vmatpush1.bf16.msra.mxu0 %v4125_v52  ;;  %2986 = vmatpush1.bf16.msra.mxu1 %v4126_v53  ;;  %v4129_v52 = vld [vmem:[#allocation11] ss:$16 sps:$4 sm:$0xff]   ;;  %v4130_v53 = vld [vmem:[#allocation11 + $0x8] ss:$16 sps:$4 sm:$0xff]  }
 0x728   :  { %3017 = vmatprep.subr.bf16.mxu0 %v4127_v54  ;;  %3058 = vmatprep.subr.bf16.mxu1 %v4128_v55  ;;  %v4131_v54 = vld [vmem:[#allocation11 + $0x24] ss:$16 sps:$4 sm:$0xff]   ;;  %v4132_v55 = vld [vmem:[#allocation11 + $0x2c] ss:$16 sps:$4 sm:$0xff]  }
 0x7bd   :  { %v2742_v0 = vpop.f32.mrb[80].mxu0  ;;  %v2783_v56 = vpop.f32.mrb[80].mxu1 }
 0x7be   :  { %v2790_v21 = vadd.f32 %v2742_v0, %v5935_v3  ;;  %v2792_v58 = vadd.f32 %v2783_v56, %v5936_v57  ;;  %v2744_v59 = vpop.f32.mrb[81].mxu0  ;;  %v2785_v60 = vpop.f32.mrb[81].mxu1  ;;  %v4133_v0 = vld [vmem:[#allocation11 + $0x20] ss:$16 sps:$4 sm:$0xff]   ;;  %v4134_v56 = vld [vmem:[#allocation11 + $0x28] ss:$16 sps:$4 sm:$0xff]  }
 0x7bf   :  { %v2791_v45 = vadd.f32 %v2744_v59, %v5937_v10  ;;  %v2793_v2 = vadd.f32 %v2785_v60, %v5938_v63  ;;  %v2746_v36 = vpop.f32.mrb[82].mxu0  ;;  %v2787_v40 = vpop.f32.mrb[82].mxu1  ;;  %v4135_v3 = vld [vmem:[#allocation11 + $0x44] ss:$16 sps:$4 sm:$0xff]   ;;  %v4138_v59 = vld [vmem:[#allocation11 + $0x48] ss:$16 sps:$4 sm:$0xff]  }
 0x7c0   :  { %v3556_v37 = vmul.f32 -1.442695, %v2790_v21  ;;  %v2747_v61 = vpop.f32.mrb[83].mxu0  ;;  %v2788_v30 = vpop.f32.mrb[83].mxu1  ;;  %v4136_v21 = vld [vmem:[#allocation11 + $0x4c] ss:$16 sps:$4 sm:$0xff]  }
 0x7c1   :  { %v3557_v16 = vmul.f32 -1.442695, %v2791_v45  ;;  %v3558_v17 = vmul.f32 -1.442695, %v2793_v2  ;;  %v4139_v10 = vld [vmem:[#allocation11 + $0x64] ss:$16 sps:$4 sm:$0xff]  }
 0x7c2   :  { %3967 = vpow2.f32 %v3556_v37  ;;  %v4140_v45 = vld [vmem:[#allocation11 + $0x6c] ss:$16 sps:$4 sm:$0xff]   ;;  %v4141_v37 = vld [vmem:[#allocation11 + $0x60] ss:$16 sps:$4 sm:$0xff]   ;;  %v4142_v61 = vld [vmem:[#allocation11 + $0x68] ss:$16 sps:$4 sm:$0xff]  }
 0x7c3   :  { %3969 = vpow2.f32 %v3557_v16  ;;  %v4143_v30 = vld [vmem:[#allocation11 + $0x84] ss:$16 sps:$4 sm:$0xff]   ;;  %v4144_v16 = vld [vmem:[#allocation11 + $0x8c] ss:$16 sps:$4 sm:$0xff]  }
 0x7c4   :  { %3971 = vpow2.f32 %v3558_v17 }
 0x7c5   :  { %3973 = vtanh.f32 %v2792_v58  ;;  %v4137_v58 = vld [vmem:[#allocation11 + $0x40] ss:$16 sps:$4 sm:$0xff]  }
 0x7cc   :  { %v3968_v14 = vpop.eup %3967 }
 0x7cd   :  { %v3970_v22 = vpop.eup %3969  ;;  %v2884_v29 = vadd.f32 1.0, %v3968_v14  ;;  %v4145_v14 = vld [vmem:[#allocation11 + $0x80] ss:$16 sps:$4 sm:$0xff]  }
 0x7ce   :  { %v2890_v23 = vadd.f32 1.0, %v3970_v22  ;;  %v3972_v19 = vpop.eup %3971  ;;  %v4146_v22 = vld [vmem:[#allocation11 + $0x88] ss:$16 sps:$4 sm:$0xff]  }
 0x7cf   :  { %3975 = vrcp.f32 %v2884_v29  ;;  %v3974_v24 = vpop.eup %3973  ;;  %v2897_v46 = vadd.f32 1.0, %v3972_v19  ;;  %v4147_v29 = vld [vmem:[#allocation11 + $0xa4] ss:$16 sps:$4 sm:$0xff]   ;;  %v4150_v19 = vld [vmem:[#allocation11 + $0xa8] ss:$16 sps:$4 sm:$0xff]  }
 0x7d0   :  { %3977 = vrcp.f32 %v2890_v23  ;;  %v4149_v23 = vld [vmem:[#allocation11 + $0xa0] ss:$16 sps:$4 sm:$0xff]  }
 0x7d1   :  { %3979 = vrcp.f32 %v2897_v46 }
 0x7d9   :  { %v3976_v11 = vpop.eup %3975 }
 0x7da   :  { %v3978_v41 = vpop.eup %3977  ;;  %v2901_v42 = vmul.f32 %v3976_v11, %v3974_v24  ;;  %v4151_v24 = vld [vmem:[#allocation11 + $0xc4] ss:$16 sps:$4 sm:$0xff]   ;;  %v4152_v11 = vld [vmem:[#allocation11 + $0xcc] ss:$16 sps:$4 sm:$0xff]  }
 0x7db   :  { %v2900_v48 = vmul.f32 %v3978_v41, %v5506_v9  ;;  %v3980_v27 = vpop.eup %3979  ;;  %v4153_v41 = vld [vmem:[#allocation11 + $0xc0] ss:$16 sps:$4 sm:$0xff]  }
 0x7dd   :  { %v5556_v49 = vadd.f32 %v2901_v42, %v2900_v48  ;;  %v2829_v50 = vpop.f32.mrb[84].mxu0  ;;  %v2870_v47 = vpop.f32.mrb[84].mxu1  ;;  %v4154_v42 = vld [vmem:[#allocation11 + $0xc8] ss:$16 sps:$4 sm:$0xff]   ;;  %v4155_v48 = vld [vmem:[#allocation11 + $0xe4] ss:$16 sps:$4 sm:$0xff]  }
 0x7de   :  { %v2877_v25 = vadd.f32 %v2829_v50, %v5939_v31  ;;  %v2879_v12 = vadd.f32 %v2870_v47, %v5940_v18  ;;  %v2831_v43 = vpop.f32.mrb[85].mxu0  ;;  %v2872_v44 = vpop.f32.mrb[85].mxu1  ;;  %v4156_v50 = vld [vmem:[#allocation11 + $0xec] ss:$16 sps:$4 sm:$0xff]   ;;  %v4158_v18 = vld [vmem:[#allocation11 + $0xe8] ss:$16 sps:$4 sm:$0xff]  }
 0x7df   :  { %v2878_v13 = vadd.f32 %v2831_v43, %v5941_v51  ;;  %v2880_v32 = vadd.f32 %v2872_v44, %v5942_v38  ;;  %v2833_v35 = vpop.f32.mrb[86].mxu0  ;;  %v2874_v34 = vpop.f32.mrb[86].mxu1  ;;  %3981 = vtanh.f32 %v5556_v49  ;;  %v3759_v43 = vld [vmem:[#allocation12] sm:$0xff]   ;;  %v4336_v44 = vmov 0.0   ;;  %v3760_v51 = vld [vmem:[#allocation12 + $0x8] sm:$0xff]   ;;  %v3762_v38 = vld [vmem:[#allocation12 + $0x18] sm:$0xff]  }
 0x7e0   :  { %v3559_v9 = vmul.f32 -1.442695, %v2877_v25  ;;  %v2834_v20 = vpop.f32.mrb[87].mxu0  ;;  %v2875_v33 = vpop.f32.mrb[87].mxu1  ;;  %v4157_v25 = vld [vmem:[#allocation11 + $0xe0] ss:$16 sps:$4 sm:$0xff]  }
 0x7e1   :  { %v3560_v62 = vmul.f32 -1.442695, %v2878_v13  ;;  %v3561_v26 = vmul.f32 -1.442695, %v2880_v32  ;;  %v3761_v13 = vld [vmem:[#allocation12 + $0x10] sm:$0xff]   ;;  %v3763_v32 = vld [vmem:[#allocation12 + $0x20] sm:$0xff]  }
 0x7e2   :  { %3983 = vpow2.f32 %v3559_v9  ;;  %v3764_v35 = vld [vmem:[#allocation12 + $0x28] sm:$0xff]   ;;  %v3765_v34 = vld [vmem:[#allocation12 + $0x30] sm:$0xff]   ;;  %v3766_v9 = vld [vmem:[#allocation12 + $0x38] sm:$0xff]  }
 0x7e3   :  { %3985 = vpow2.f32 %v3560_v62  ;;  %v3767_v20 = vld [vmem:[#allocation12 + $0x40] sm:$0xff]   ;;  %v3768_v33 = vld [vmem:[#allocation12 + $0x48] sm:$0xff]   ;;  %v3769_v62 = vld [vmem:[#allocation12 + $0x50] sm:$0xff]  }
 0x7e4   :  { %3987 = vpow2.f32 %v3561_v26  ;;  %v3772_v26 = vld [vmem:[#allocation12 + $0x68] sm:$0xff]  }
 0x7e5   :  { %3989 = vtanh.f32 %v2879_v12 }
 0x7e9   :  { %v3982_v6 = vpop.eup %3981 }
 0x7ea   :  { %v2904_v39 = vmul.f32 %v3982_v6, %v3980_v27  ;;  %v3770_v27 = vld [vmem:[#allocation12 + $0x58] sm:$0xff]   ;;  %v3771_v6 = vld [vmem:[#allocation12 + $0x60] sm:$0xff]  }
 0x7ec   :  { %v3984_v7 = vpop.eup %3983  ;;  %v2929_v28 = vpack.c.bf16 %v2904_v39, %v2904_v39  ;;  %v3773_v39 = vld [vmem:[#allocation12 + $0x70] sm:$0xff]  }
 0x7ed   :  { %v3986_v8 = vpop.eup %3985  ;;  %v2908_v5 = vadd.f32 1.0, %v3984_v7  ;;  %v3774_v7 = vld [vmem:[#allocation12 + $0x78] sm:$0xff]  }
 0x7ee   :  { %v2914_v4 = vadd.f32 1.0, %v3986_v8  ;;  %2963 = vmatmul.mubr.bf16.vlgmr.msra.gmra.mrb[88].mxu0 %v2929_v28  ;;  %3004 = vmatmul.mubr.bf16.vlgmr.msra.gmra.mrb[88].mxu1 %v2929_v28  ;;  %v3988_v57 = vpop.eup %3987 }
 0x7ef   :  { %3991 = vrcp.f32 %v2908_v5  ;;  %3018 = vmatpush1.bf16.msra.mxu0 %v4129_v52  ;;  %3059 = vmatpush1.bf16.msra.mxu1 %v4130_v53  ;;  %v3990_v60 = vpop.eup %3989  ;;  %v2921_v36 = vadd.f32 1.0, %v3988_v57  ;;  %v5943_v5 = vld [vmem:[#allocation76_spill] sm:$0xff]  ;;  %v5944_v52 = vld [vmem:[#allocation79_spill] sm:$0xff] }
 0x7f0   :  { %3993 = vrcp.f32 %v2914_v4  ;;  %3019 = vmatprep.subr.bf16.mxu0 %v4131_v54  ;;  %3060 = vmatprep.subr.bf16.mxu1 %v4132_v55 }
 0x7f1   :  { %3049 = vmatprep.mubr.bf16.mxu0 %v5726_v1  ;;  %3090 = vmatprep.mubr.bf16.mxu1 %v5726_v1  ;;  %3995 = vrcp.f32 %v2921_v36 }
 0x7f3   :  { %3020 = vmatpush1.bf16.msra.mxu0 %v4133_v0  ;;  %3061 = vmatpush1.bf16.msra.mxu1 %v4134_v56  ;;  %v5945_v0 = vld [vmem:[#allocation78_spill] sm:$0xff] }
 0x7f4   :  { %3021 = vmatprep.subr.bf16.mxu0 %v4135_v3  ;;  %3062 = vmatprep.subr.bf16.mxu1 %v4136_v21  ;;  %v5946_v3 = vld [vmem:[#allocation80_spill] sm:$0xff] }
 0x7f7   :  { %3022 = vmatpush1.bf16.msra.mxu0 %v4137_v58  ;;  %3063 = vmatpush1.bf16.msra.mxu1 %v4138_v59 }
 0x7f8   :  { %3023 = vmatprep.subr.bf16.mxu0 %v4139_v10  ;;  %3064 = vmatprep.subr.bf16.mxu1 %v4140_v45 }
 0x7f9   :  { %v3992_v63 = vpop.eup %3991 }
 0x7fa   :  { %v3994_v1 = vpop.eup %3993  ;;  %v2925_v2 = vmul.f32 %v3992_v63, %v3990_v60 }
 0x7fb   :  { %v2924_v40 = vmul.f32 %v3994_v1, %v5532_v15  ;;  %3024 = vmatpush1.bf16.msra.mxu0 %v4141_v37  ;;  %3065 = vmatpush1.bf16.msra.mxu1 %v4142_v61  ;;  %v4148_v15 = vld [vmem:[#allocation11 + $0xac] ss:$16 sps:$4 sm:$0xff]   ;;  %v3996_v46 = vpop.eup %3995 }
 0x7fc   :  { %3025 = vmatprep.subr.bf16.mxu0 %v4143_v30  ;;  %3066 = vmatprep.subr.bf16.mxu1 %v4144_v16 }
 0x7fd   :  { %v5566_v17 = vadd.f32 %v2925_v2, %v2924_v40 }
 0x7ff   :  { %3026 = vmatpush1.bf16.msra.mxu0 %v4145_v14  ;;  %3067 = vmatpush1.bf16.msra.mxu1 %v4146_v22  ;;  %3997 = vtanh.f32 %v5566_v17 }
 0x800   :  { %3027 = vmatprep.subr.bf16.mxu0 %v4147_v29  ;;  %3068 = vmatprep.subr.bf16.mxu1 %v4148_v15 }
 0x803   :  { %3028 = vmatpush1.bf16.msra.mxu0 %v4149_v23  ;;  %3069 = vmatpush1.bf16.msra.mxu1 %v4150_v19 }
 0x804   :  { %3029 = vmatprep.subr.bf16.mxu0 %v4151_v24  ;;  %3070 = vmatprep.subr.bf16.mxu1 %v4152_v11  ;;  %v5947_v24 = vld [vmem:[#allocation81_spill] sm:$0xff] }
 0x807   :  { %3030 = vmatpush1.bf16.msra.mxu0 %v4153_v41  ;;  %3071 = vmatpush1.bf16.msra.mxu1 %v4154_v42  ;;  %v5948_v41 = vld [vmem:[#allocation83_spill] sm:$0xff] }
 0x808   :  { %3031 = vmatprep.subr.bf16.mxu0 %v4155_v48  ;;  %3072 = vmatprep.subr.bf16.mxu1 %v4156_v50  ;;  %v5949_v50 = vld [vmem:[#allocation82_spill] sm:$0xff] }
 0x809   :  { %v3998_v47 = vpop.eup %3997 }
 0x80a   :  { %v2928_v31 = vmul.f32 %v3998_v47, %v3996_v46 }
 0x80b   :  { %3032 = vmatpush1.bf16.msra.mxu0 %v4157_v25  ;;  %3073 = vmatpush1.bf16.msra.mxu1 %v4158_v18 }
 0x80c   :  { %v3016_v12 = vpack.c.bf16 %v2928_v31, %v2928_v31  ;;  %3623 = vmatprep.subr.bf16.mxu1 %v4336_v44  ;;  %3603 = vmatprep.subr.bf16.mxu0 %v4336_v44  ;;  %v5950_v31 = vld [vmem:[#allocation85_spill] sm:$0xff] }
 0x80e   :  { %3050 = vmatmul.mubr.bf16.vlgmr.msra.gmra.mrb[92].mxu0 %v3016_v12  ;;  %3091 = vmatmul.mubr.bf16.vlgmr.msra.gmra.mrb[92].mxu1 %v3016_v12 }
 0x80f   :  { %3624 = vmatpush3.bf16.msra.mxu1 %v3759_v43  ;;  %3639 = vmatprep.mubr.msk.bf16.mxu1 %vm4337_vm0, %v4336_v44 }
 0x810   :  { %3625 = vmatprep.subr.bf16.mxu1 %v4336_v44  ;;  %3619 = vmatprep.mubr.msk.bf16.mxu0 %vm4337_vm0, %v4336_v44 }
 0x811   :  { %3604 = vmatpush3.bf16.msra.mxu0 %v3767_v20 }
 0x812   :  { %3605 = vmatprep.subr.bf16.mxu0 %v4336_v44 }
 0x813   :  { %3626 = vmatpush3.bf16.msra.mxu1 %v3760_v51 }
 0x814   :  { %3627 = vmatprep.subr.bf16.mxu1 %v4336_v44 }
 0x815   :  { %3606 = vmatpush3.bf16.msra.mxu0 %v3768_v33 }
 0x816   :  { %3607 = vmatprep.subr.bf16.mxu0 %v4336_v44 }
 0x817   :  { %3628 = vmatpush3.bf16.msra.mxu1 %v3761_v13 }
 0x818   :  { %3629 = vmatprep.subr.bf16.mxu1 %v4336_v44 }
 0x819   :  { %3608 = vmatpush3.bf16.msra.mxu0 %v3769_v62 }
 0x81a   :  { %3609 = vmatprep.subr.bf16.mxu0 %v4336_v44 }
 0x81b   :  { %3630 = vmatpush3.bf16.msra.mxu1 %v3762_v38 }
 0x81c   :  { %3631 = vmatprep.subr.bf16.mxu1 %v4336_v44 }
 0x81d   :  { %3610 = vmatpush3.bf16.msra.mxu0 %v3770_v27 }
 0x81e   :  { %3611 = vmatprep.subr.bf16.mxu0 %v4336_v44 }
 0x81f   :  { %3632 = vmatpush3.bf16.msra.mxu1 %v3763_v32 }
 0x820   :  { %3633 = vmatprep.subr.bf16.mxu1 %v4336_v44 }
 0x821   :  { %3612 = vmatpush3.bf16.msra.mxu0 %v3771_v6 }
 0x822   :  { %3613 = vmatprep.subr.bf16.mxu0 %v4336_v44 }
 0x823   :  { %3634 = vmatpush3.bf16.msra.mxu1 %v3764_v35 }
 0x824   :  { %3635 = vmatprep.subr.bf16.mxu1 %v4336_v44 }
 0x825   :  { %3614 = vmatpush3.bf16.msra.mxu0 %v3772_v26 }
 0x826   :  { %3615 = vmatprep.subr.bf16.mxu0 %v4336_v44 }
 0x827   :  { %3636 = vmatpush3.bf16.msra.mxu1 %v3765_v34 }
 0x828   :  { %3637 = vmatprep.subr.bf16.mxu1 %v4336_v44 }
 0x829   :  { %3616 = vmatpush3.bf16.msra.mxu0 %v3773_v39 }
 0x82a   :  { %3617 = vmatprep.subr.bf16.mxu0 %v4336_v44 }
 0x82b   :  { %3638 = vmatpush3.bf16.msra.mxu1 %v3766_v9 }
 0x82d   :  { %3618 = vmatpush3.bf16.msra.mxu0 %v3774_v7 }
 0x8c1   :  { %v2964_v28 = vpop.f32.mrb[88].mxu0  ;;  %v3005_v8 = vpop.f32.mrb[88].mxu1 }
 0x8c2   :  { %v3012_v4 = vadd.f32 %v2964_v28, %v5943_v5  ;;  %v3014_v53 = vadd.f32 %v3005_v8, %v5944_v52  ;;  %v2966_v54 = vpop.f32.mrb[89].mxu0  ;;  %v3007_v55 = vpop.f32.mrb[89].mxu1 }
 0x8c3   :  { %v3013_v56 = vadd.f32 %v2966_v54, %v5945_v0  ;;  %v3015_v21 = vadd.f32 %v3007_v55, %v5946_v3  ;;  %v2968_v57 = vpop.f32.mrb[90].mxu0  ;;  %v3009_v58 = vpop.f32.mrb[90].mxu1 }
 0x8c4   :  { %v3562_v59 = vmul.f32 -1.442695, %v3012_v4  ;;  %v2969_v60 = vpop.f32.mrb[91].mxu0  ;;  %v3010_v10 = vpop.f32.mrb[91].mxu1  ;;  %v3584_v57 = vld [vmem:[%s5600_s6] ss:$0 sm:$0xff] }
 0x8c5   :  { %v3563_v45 = vmul.f32 -1.442695, %v3013_v56  ;;  %v3564_v63 = vmul.f32 -1.442695, %v3015_v21 }
 0x8c6   :  { %3999 = vpow2.f32 %v3562_v59 }
 0x8c7   :  { %4001 = vpow2.f32 %v3563_v45 }
 0x8c8   :  { %4003 = vpow2.f32 %v3564_v63 }
 0x8c9   :  { %4005 = vtanh.f32 %v3014_v53 }
 0x8d0   :  { %v4000_v1 = vpop.eup %3999 }
 0x8d1   :  { %v4002_v2 = vpop.eup %4001  ;;  %v3106_v36 = vadd.f32 1.0, %v4000_v1 }
 0x8d2   :  { %v3112_v40 = vadd.f32 1.0, %v4002_v2  ;;  %v4004_v37 = vpop.eup %4003 }
 0x8d3   :  { %4007 = vrcp.f32 %v3106_v36  ;;  %v4006_v61 = vpop.eup %4005  ;;  %v3119_v22 = vadd.f32 1.0, %v4004_v37 }
 0x8d4   :  { %4009 = vrcp.f32 %v3112_v40 }
 0x8d5   :  { %4011 = vrcp.f32 %v3119_v22 }
 0x8dd   :  { %v4008_v30 = vpop.eup %4007 }
 0x8de   :  { %v4010_v16 = vpop.eup %4009  ;;  %v3123_v14 = vmul.f32 %v4008_v30, %v4006_v61 }
 0x8df   :  { %v3122_v29 = vmul.f32 %v4010_v16, %v5556_v49  ;;  %v4012_v13 = vpop.eup %4011 }
 0x8e1   :  { %v3124_v15 = vadd.f32 %v3123_v14, %v3122_v29  ;;  %v3051_v23 = vpop.f32.mrb[92].mxu0  ;;  %v3092_v19 = vpop.f32.mrb[92].mxu1 }
 0x8e2   :  { %v3099_v11 = vadd.f32 %v3051_v23, %v5947_v24  ;;  %v3101_v42 = vadd.f32 %v3092_v19, %v5948_v41  ;;  %v3053_v46 = vpop.f32.mrb[93].mxu0  ;;  %v3094_v48 = vpop.f32.mrb[93].mxu1 }
 0x8e3   :  { %4013 = vtanh.f32 %v3124_v15  ;;  %v3100_v47 = vadd.f32 %v3053_v46, %v5949_v50  ;;  %v3102_v25 = vadd.f32 %v3094_v48, %v5950_v31  ;;  %v3055_v18 = vpop.f32.mrb[94].mxu0  ;;  %v3096_v12 = vpop.f32.mrb[94].mxu1 }
 0x8e4   :  { %v3565_v43 = vmul.f32 -1.442695, %v3099_v11  ;;  %v3056_v44 = vpop.f32.mrb[95].mxu0  ;;  %v3097_v49 = vpop.f32.mrb[95].mxu1 }
 0x8e5   :  { %v3566_v51 = vmul.f32 -1.442695, %v3100_v47  ;;  %v3567_v32 = vmul.f32 -1.442695, %v3102_v25 }
 0x8e6   :  { %4015 = vpow2.f32 %v3565_v43 }
 0x8e7   :  { %4017 = vpow2.f32 %v3566_v51 }
 0x8e8   :  { %4019 = vpow2.f32 %v3567_v32 }
 0x8e9   :  { %4021 = vtanh.f32 %v3101_v42 }
 0x8ed   :  { %v4014_v38 = vpop.eup %4013 }
 0x8ee   :  { %v3126_v35 = vmul.f32 %v4014_v38, %v4012_v13 }
 0x8f0   :  { %v4016_v34 = vpop.eup %4015  ;;  %v3151_v9 = vpack.c.bf16 %v3126_v35, %v3126_v35 }
 0x8f1   :  { %v4018_v20 = vpop.eup %4017  ;;  %v3130_v33 = vadd.f32 1.0, %v4016_v34 }
 0x8f2   :  { %v3136_v62 = vadd.f32 1.0, %v4018_v20  ;;  %3640 = vmatmul.mubr.bf16.vlgmr.msra.gmra.mrb[96].mxu1 %v3151_v9  ;;  %v4020_v27 = vpop.eup %4019 }
 0x8f3   :  { %4023 = vrcp.f32 %v3130_v33  ;;  %v4022_v6 = vpop.eup %4021  ;;  %v3143_v28 = vadd.f32 1.0, %v4020_v27 }
 0x8f4   :  { %4025 = vrcp.f32 %v3136_v62 }
 0x8f5   :  { %4027 = vrcp.f32 %v3143_v28 }
 0x8fd   :  { %v4024_v26 = vpop.eup %4023 }
 0x8fe   :  { %v4026_v39 = vpop.eup %4025  ;;  %v3147_v7 = vmul.f32 %v4024_v26, %v4022_v6 }
 0x8ff   :  { %v3146_v8 = vmul.f32 %v4026_v39, %v5566_v17  ;;  %v4028_v4 = vpop.eup %4027 }
 0x901   :  { %v3148_v5 = vadd.f32 %v3147_v7, %v3146_v8 }
 0x903   :  { %4029 = vtanh.f32 %v3148_v5 }
 0x90d   :  { %v4030_v52 = vpop.eup %4029 }
 0x90e   :  { %v3150_v53 = vmul.f32 %v4030_v52, %v4028_v4 }
 0x910   :  { %v3168_v54 = vpack.c.bf16 %v3150_v53, %v3150_v53 }
 0x912   :  { %3620 = vmatmul.mubr.bf16.vlgmr.msra.gmra.mrb[96].mxu0 %v3168_v54 }
 0x9c5   :  { %v3355_v55 = vpop.f32.mrb[96].mxu1 }
 0x9c6   :  { %v3641_v0 = vpop.f32.mrb[97].mxu1 }
 0x9c7   :  { %v3358_v56 = vpop.f32.mrb[98].mxu1 }
 0x9c8   :  { %v3642_v3 = vpop.f32.mrb[99].mxu1 }
 0x9e5   :  { %v3267_v21 = vpop.f32.mrb[96].mxu0 }
 0x9e6   :  { %v3356_v17 = vadd.f32 %v3355_v55, %v3267_v21  ;;  %v3621_v58 = vpop.f32.mrb[97].mxu0 }
 0x9e7   :  { %v3270_v59 = vpop.f32.mrb[98].mxu0 }
 0x9e8   :  { %v3368_v60 = vadd.f32 %v3584_v57, %v3356_v17  ;;  %v3622_v10 = vpop.f32.mrb[99].mxu0 }
 0x9ea   :  { %3369 = vst [vmem:[#allocation14] sm:$0xff] %v3368_v60 }
 0x9eb   :  { %4302 = shalt.err (!%p4299_p10)
}
 0x9ec   :  { %s4303_s6 = scalar_lea.hbm %s5601_s7, 128 }
 0x9ed   :  { %p4304_p11 = scmp.ne.s32.totalorder %s5601_s7, %s4303_s6  ;;  %p4307_p12 = scmp.lt.u32.totalorder %s4303_s6, %s5601_s7 }
 0x9ef   :  { %p4309_p13 = pnand %p4307_p12, %p4304_p11 }
 0x9f1   :  { %4312 = shalt.err (!%p4309_p13)
}
 0x9f2   :  { %3379 = dma.vmem_to_hbm [thread:$0]  %s3377_s15, 128, %s5601_s7, [#allocation5]  }
 0x9f3   :  { %4321 = dma.done.wait [#allocation5], 128  }
 0x9f4   :  { %4322 = vsyncadd [#allocation5], 4294967168 }
 0x9f5   :  { %3383 = vsyncpa [#allocation4], 1 }
 0x9f6   :  { %3384 = vsyncpa [#allocation7], 1 }
 0x9f7   :  { %3385 = vsyncpa [#allocation10], 1 }
 0x9f8   :  { %3386 = vsyncpa [#allocation13], 1 }
 0x9f9   :  { %3387 = vsyncpa [#allocation5], 1 }

</bundles_post_ra>
